<compile_context>
chip_gen: v7x
topology: tpu7x:2x2x1
jax: 0.10.0
libtpu: 0.0.40
codegen_flags: <defaults>
</compile_context>

<pallas_src>
import numpy as np
import jax
import jax.numpy as jnp
from jax import lax
from jax.experimental import pallas as pl
from jax.experimental.pallas import tpu as pltpu


def _batch_tile(B, cap=32):
    """Pick a batch tile: full B for small batches, else a multiple of 8 dividing B."""
    if B <= cap:
        return B
    tb = cap
    while tb >= 8:
        if B % tb == 0:
            return tb
        tb -= 8
    return B


# -----------------------------------------------------------------------------
# Kernel 1: bidirectional GRU with length masking (pack/pad_packed semantics).
#   x_ref   : (T, tb, Din) f32   time-major input tile
#   len_ref : (tb, 1)      i32
#   wih_*   : (Din, 3H)    bf16  fused gate columns [r | z | n]
#   bih_*   : (1, 3H)      f32
#   whh_*   : (H, 3H)      bf16
#   bhh_*   : (1, 3H)      f32
#   out_ref : (T, tb, H)   f32   = (fwd + bwd) / 2, zero at padding
#   xpf/xpb : (T, tb, 3H)  f32   VMEM scratch, hoisted input projections
#   msk_ref : (T, tb, 1)   f32   VMEM scratch, hoisted length mask
# -----------------------------------------------------------------------------
def bigru_kernel(x_ref, len_ref,
                 wih_f_ref, bih_f_ref, whh_f_ref, bhh_f_ref,
                 wih_b_ref, bih_b_ref, whh_b_ref, bhh_b_ref,
                 out_ref, xpf_ref, xpb_ref, msk_ref):
    T, tb, Din = x_ref.shape
    H = whh_f_ref.shape[0]
    H3 = 3 * H

    # ---- hoisted input projections: one big MXU matmul per direction -------
    x2d = x_ref[...].reshape(T * tb, Din).astype(jnp.bfloat16)
    xpf_ref[...] = (jnp.dot(x2d, wih_f_ref[...],
                            preferred_element_type=jnp.float32)
                    + bih_f_ref[...]).reshape(T, tb, H3)
    xpb_ref[...] = (jnp.dot(x2d, wih_b_ref[...],
                            preferred_element_type=jnp.float32)
                    + bih_b_ref[...]).reshape(T, tb, H3)

    # ---- hoisted length mask for all timesteps ------------------------------
    lens = len_ref[...]                                       # (tb, 1) i32
    t_iota = lax.broadcasted_iota(jnp.int32, (T, tb, 1), 0)
    msk_ref[...] = (t_iota < lens[None, :, :]).astype(jnp.float32)

    # ---- weights loaded once (VMEM-resident across the unrolled loop) ------
    whh_f = whh_f_ref[...]
    whh_b = whh_b_ref[...]
    bhh_f = bhh_f_ref[...]
    bhh_b = bhh_b_ref[...]

    h0 = jnp.zeros((tb, H), dtype=jnp.float32)

    def gates(xp, hh, h):
        # PyTorch GRU: xp = W_ih x + b_ih ; hh = W_hh h + b_hh (fused gates)
        r = jax.nn.sigmoid(xp[:, 0:H] + hh[:, 0:H])
        z = jax.nn.sigmoid(xp[:, H:2 * H] + hh[:, H:2 * H])
        n = jnp.tanh(xp[:, 2 * H:3 * H] + r * hh[:, 2 * H:3 * H])
        return (1.0 - z) * n + z * h

    # forward direction: t = 0 .. T-1
    def fwd_body(t, h):
        m = msk_ref[t]                                        # (tb, 1)
        hh = jnp.dot(h.astype(jnp.bfloat16), whh_f,
                     preferred_element_type=jnp.float32) + bhh_f
        h_new = gates(xpf_ref[t], hh, h)
        h = m * h_new + (1.0 - m) * h                         # padding keeps h
        out_ref[t] = m * h                                    # padded outputs 0
        return h

    lax.fori_loop(0, T, fwd_body, h0, unroll=True)

    # backward direction: t = T-1 .. 0 ; combine as (fwd + bwd) / 2
    def bwd_body(i, h):
        t = T - 1 - i
        m = msk_ref[t]
        hh = jnp.dot(h.astype(jnp.bfloat16), whh_b,
                     preferred_element_type=jnp.float32) + bhh_b
        h_new = gates(xpb_ref[t], hh, h)
        h = m * h_new + (1.0 - m) * h
        out_ref[t] = (out_ref[t] + m * h) * 0.5
        return h

    lax.fori_loop(0, T, bwd_body, h0, unroll=True)


def bigru(x_tbd, lens_b1, p, *, batch_tile=None):
    T, B, Din = x_tbd.shape
    H = p["whh_f"].shape[0]
    H3 = 3 * H
    tb = _batch_tile(B) if batch_tile is None else batch_tile
    assert B % tb == 0

    resident = lambda shape: pl.BlockSpec(shape, lambda i: (0, 0))

    return pl.pallas_call(
        bigru_kernel,
        out_shape=jax.ShapeDtypeStruct((T, B, H), jnp.float32),
        grid=(B // tb,),
        in_specs=[
            pl.BlockSpec((T, tb, Din), lambda i: (0, i, 0)),
            pl.BlockSpec((tb, 1), lambda i: (i, 0)),
            resident((Din, H3)), resident((1, H3)),
            resident((H, H3)), resident((1, H3)),
            resident((Din, H3)), resident((1, H3)),
            resident((H, H3)), resident((1, H3)),
        ],
        out_specs=pl.BlockSpec((T, tb, H), lambda i: (0, i, 0)),
        scratch_shapes=[
            pltpu.VMEM((T, tb, H3), jnp.float32),   # fwd input projections
            pltpu.VMEM((T, tb, H3), jnp.float32),   # bwd input projections
            pltpu.VMEM((T, tb, 1), jnp.float32),    # length mask
        ],
        compiler_params=pltpu.CompilerParams(
            dimension_semantics=("parallel",),      # shards batch across TCs (v7x)
            vmem_limit_bytes=48 * 1024 * 1024,      # stays under v7x 64 MiB VMEM
        ),
    )(x_tbd, lens_b1,
      p["wih_f"], p["bih_f"], p["whh_f"], p["bhh_f"],
      p["wih_b"], p["bih_b"], p["whh_b"], p["bhh_b"])


# -----------------------------------------------------------------------------
# Kernel 2: GPO pooling head + l2norm.
#   emb_ref  : (T, tb, P)  gpo bi-GRU output (time-major)
#   linw_ref : (1, P)      Linear(P, 1, bias=False) weight
#   feat_ref : (tb, T, D)  features sorted descending along T (padding zeroed)
#   len_ref  : (tb, 1)     i32
#   out_ref  : (tb, D)     l2-normalized pooled features
# -----------------------------------------------------------------------------
def gpo_pool_kernel(emb_ref, linw_ref, feat_ref, len_ref, out_ref):
    T, tb, P = emb_ref.shape

    # GPO scores: Linear(P,1). P=32 is tiny -> VPU mul + lane reduce (an MXU
    # (N,1) matmul would need a column->matrix relayout that costs more here).
    w = linw_ref[...]                                        # (1, P)
    scores_tm = jnp.sum(emb_ref[...] * w[None, :, :], axis=-1)   # (T, tb)
    scores = jnp.transpose(scores_tm)                        # (tb, T)

    lens = len_ref[...]                                      # (tb, 1)
    iota = lax.broadcasted_iota(jnp.int32, (tb, T), 1)
    mask = iota < lens                                       # (tb, T)
    scores = jnp.where(mask, scores, -10000.0)

    # masked softmax with temperature 0.1 over the lane (T) axis
    s = scores * 10.0
    m = jnp.max(s, axis=1, keepdims=True)
    e = jnp.exp(s - m)
    denom = jnp.sum(e, axis=1, keepdims=True)
    wts = e * pl.reciprocal(denom, approx=True)              # (tb, T), EUP recip

    # weighted T-reduction on the MXU: batched (1,T)@(T,D) per row
    feats = feat_ref[...]                                    # (tb, T, D)
    pooled = jnp.einsum('bqt,btd->bqd', wts[:, None, :], feats,
                        preferred_element_type=jnp.float32)[:, 0, :]

    # l2norm: norm = sqrt(sum x^2) + eps ; x / norm  (reciprocal on the EUP)
    nsq = jnp.sum(pooled * pooled, axis=-1, keepdims=True)
    inv = pl.reciprocal(jnp.sqrt(nsq) + 1e-8, approx=True)
    out_ref[...] = pooled * inv


def gpo_pool(gpo_emb_tm, lin_w, sorted_feat_bm, lens_b1, *, batch_tile=None):
    T, B, P = gpo_emb_tm.shape
    D = sorted_feat_bm.shape[2]
    tb = _batch_tile(B) if batch_tile is None else batch_tile
    assert B % tb == 0

    return pl.pallas_call(
        gpo_pool_kernel,
        out_shape=jax.ShapeDtypeStruct((B, D), jnp.float32),
        grid=(B // tb,),
        in_specs=[
            pl.BlockSpec((T, tb, P), lambda i: (0, i, 0)),
            pl.BlockSpec((1, P), lambda i: (0, 0)),
            pl.BlockSpec((tb, T, D), lambda i: (i, 0, 0)),
            pl.BlockSpec((tb, 1), lambda i: (i, 0)),
        ],
        out_specs=pl.BlockSpec((tb, D), lambda i: (i, 0)),
        compiler_params=pltpu.CompilerParams(
            dimension_semantics=("parallel",),
            vmem_limit_bytes=48 * 1024 * 1024,
        ),
    )(gpo_emb_tm, lin_w, sorted_feat_bm, lens_b1)


# -----------------------------------------------------------------------------
# Glue
# -----------------------------------------------------------------------------
def positional_encoding_1d(d_model, length):
    pos = np.arange(length, dtype=np.float32)[:, None]
    div_term = np.exp(np.arange(0, d_model, 2, dtype=np.float32) *
                      -(np.log(10000.0) / d_model))
    pe = np.zeros((length, d_model), dtype=np.float32)
    pe[:, 0::2] = np.sin(pos * div_term)
    pe[:, 1::2] = np.cos(pos * div_term)
    return jnp.asarray(pe)


def init_gru_params(key, d_in, d_hidden):
    k = 1.0 / np.sqrt(d_hidden)
    ks = jax.random.split(key, 8)
    u = lambda kk, shape: jax.random.uniform(kk, shape, jnp.float32, -k, k)
    H3 = 3 * d_hidden
    return {
        # fused gate columns [r | z | n]; MXU operands stored in bf16,
        # biases (added on the VPU in f32) stay f32.
        "wih_f": u(ks[0], (d_in, H3)).astype(jnp.bfloat16),
        "whh_f": u(ks[1], (d_hidden, H3)).astype(jnp.bfloat16),
        "bih_f": u(ks[2], (1, H3)),
        "bhh_f": u(ks[3], (1, H3)),
        "wih_b": u(ks[4], (d_in, H3)).astype(jnp.bfloat16),
        "whh_b": u(ks[5], (d_hidden, H3)).astype(jnp.bfloat16),
        "bih_b": u(ks[6], (1, H3)),
        "bhh_b": u(ks[7], (1, H3)),
    }


# NOTE: the GPO module was not supplied with the PyTorch source; it is
# implemented following the standard VSE-infty GPO(32, 32) definition
# (PE -> biGRU -> Linear -> masked softmax over sorted features).
def text_encoder_forward(params, x_ids, lengths):
    B, T = x_ids.shape
    lens_b1 = lengths.reshape(B, 1).astype(jnp.int32)

    # Embedding lookup (gather) stays in JAX glue; gathered directly into the
    # time-major (T, B, Dw) layout the GRU kernel consumes (no transpose).
    x_emb_tm = params["embed"][x_ids.T]                       # (T, B, Dw)

    # Main bidirectional GRU (Pallas kernel); packed-sequence semantics via mask.
    cap_tbh = bigru(x_emb_tm, lens_b1, params["rnn"])         # (T, B, H)

    # GPO: positional encodings -> biGRU (Pallas kernel). Pre-masking the PE by
    # length (as in the reference) is redundant: the GRU kernel already gates
    # padded timesteps, so we feed the shared PE broadcast directly.
    # TODO(synk): gpo_emb depends only on (T, lengths); it could be cached per
    # length bucket outside the jitted forward to skip this pallas_call.
    pe = positional_encoding_1d(32, T)                        # (T, 32)
    pes_tm = jnp.broadcast_to(pe[:, None, :], (T, B, 32))     # (T, B, 32)
    gpo_tbh = bigru(pes_tm, lens_b1, params["gpo_rnn"])       # (T, B, 32)

    # Descending sort of features along time (plain JAX glue).
    # TODO(synk): torch.sort(dim=1, descending=True) has no Pallas primitive;
    # done in JAX glue here (-inf fill is robust to feature scale).
    mask_bt = jnp.arange(T)[None, :] < lengths[:, None]       # (B, T)
    cap_bth = jnp.transpose(cap_tbh, (1, 0, 2))               # (B, T, H)
    feat_m = jnp.where(mask_bt[:, :, None], cap_bth, -jnp.inf)
    sorted_feat = -jnp.sort(-feat_m, axis=1)
    sorted_feat = jnp.where(mask_bt[:, :, None], sorted_feat, 0.0)

    # Pooling + l2norm (Pallas kernel).
    pooled = gpo_pool(gpo_tbh, params["gpo_lin"], sorted_feat, lens_b1)
    return pooled


if __name__ == "__main__":
    vocab_size, word_dim, embed_size = 64, 32, 32
    B, T = 4, 8

    key = jax.random.PRNGKey(0)
    k_emb, k_rnn, k_gpo, k_lin, k_x = jax.random.split(key, 5)

    params = {
        # nn.Embedding(vocab, word_dim), init uniform(-0.1, 0.1)
        "embed": jax.random.uniform(k_emb, (vocab_size, word_dim),
                                    jnp.float32, -0.1, 0.1),
        # nn.GRU(word_dim, embed_size, bidirectional=True)
        "rnn": init_gru_params(k_rnn, word_dim, embed_size),
        # GPO(32, 32): nn.GRU(32, 32, bidirectional=True) + Linear(32,1,bias=False)
        "gpo_rnn": init_gru_params(k_gpo, 32, 32),
        "gpo_lin": jax.random.uniform(k_lin, (1, 32), jnp.float32, -0.1, 0.1),
    }

    x_ids = jax.random.randint(k_x, (B, T), 0, vocab_size, dtype=jnp.int32)
    # pack_padded_sequence(enforce_sorted=True) requires descending lengths.
    lengths = jnp.array([8, 7, 5, 3], dtype=jnp.int32)

    out = jax.jit(text_encoder_forward)(params, x_ids, lengths)
    out = jax.block_until_ready(out)

    assert out.shape == (B, embed_size)
    assert bool(jnp.all(jnp.isfinite(out)))
    # l2norm check (approx EUP reciprocal -> slightly looser tolerance)
    assert bool(jnp.allclose(jnp.linalg.norm(out, axis=-1), 1.0, atol=5e-3))
    print("KERNEL_OK")
</pallas_src>

<mosaic_0001>
module attributes {stable_mosaic.version = 11 : i64} {
  func.func @gpo_pool_kernel(%arg0: i32, %arg1: memref<8x4x32xf32, #tpu.memory_space<vmem>>, %arg2: memref<1x32xf32, #tpu.memory_space<vmem>>, %arg3: memref<4x8x32xf32, #tpu.memory_space<vmem>>, %arg4: memref<4x1xi32, #tpu.memory_space<vmem>>, %arg5: memref<4x32xf32, #tpu.memory_space<vmem>>) attributes {dimension_semantics = [#tpu.dimension_semantics<parallel>], iteration_bounds = array<i64: 1>, scalar_prefetch = 0 : i64, scratch_operands = 0 : i64, tpu.core_type = #tpu.core_type<tc>, window_params = [{transform_indices = @transform_0, window_bounds = array<i64: 8, 4, 32>}, {pipeline_mode = #tpu.pipeline_mode<synchronous>, transform_indices = @transform_1, window_bounds = array<i64: 1, 32>}, {transform_indices = @transform_2, window_bounds = array<i64: 4, 8, 32>}, {transform_indices = @transform_3, window_bounds = array<i64: 4, 1>}, {transform_indices = @transform_4, window_bounds = array<i64: 4, 32>}]} {
    %c0 = arith.constant 0 : index
    %c0_0 = arith.constant 0 : index
    %0 = vector.load %arg2[%c0, %c0_0] : memref<1x32xf32, #tpu.memory_space<vmem>>, vector<1x32xf32>
    %c0_1 = arith.constant 0 : index
    %c0_2 = arith.constant 0 : index
    %c0_3 = arith.constant 0 : index
    %1 = vector.load %arg1[%c0_1, %c0_2, %c0_3] : memref<8x4x32xf32, #tpu.memory_space<vmem>>, vector<8x4x32xf32>
    %2 = vector.shape_cast %0 : vector<1x32xf32> to vector<1x1x32xf32>
    %3 = vector.broadcast %2 : vector<1x1x32xf32> to vector<8x4x32xf32>
    %4 = arith.mulf %1, %3 : vector<8x4x32xf32>
    %cst = arith.constant dense<0.000000e+00> : vector<8x4xf32>
    %5 = vector.multi_reduction <add>, %4, %cst [2] : vector<8x4x32xf32> to vector<8x4xf32>
    %6 = tpu.transpose %5, [1, 0] : vector<8x4xf32> -> vector<4x8xf32>
    %c0_4 = arith.constant 0 : index
    %c0_5 = arith.constant 0 : index
    %7 = vector.load %arg4[%c0_4, %c0_5] : memref<4x1xi32, #tpu.memory_space<vmem>>, vector<4x1xi32>
    %8 = tpu.iota {dimensions = array<i32: 1>} : vector<4x8xi32>
    %9 = vector.broadcast %7 : vector<4x1xi32> to vector<4x8xi32>
    %10 = arith.cmpi slt, %8, %9 : vector<4x8xi32>
    %cst_6 = arith.constant -1.000000e+04 : f32
    %11 = vector.broadcast %cst_6 : f32 to vector<4x8xf32>
    %12 = arith.select %10, %6, %11 : vector<4x8xi1>, vector<4x8xf32>
    %cst_7 = arith.constant 1.000000e+01 : f32
    %13 = vector.broadcast %cst_7 : f32 to vector<4x8xf32>
    %14 = arith.mulf %12, %13 : vector<4x8xf32>
    %cst_8 = arith.constant dense<0xFF800000> : vector<4xf32>
    %15 = vector.multi_reduction <maximumf>, %14, %cst_8 [1] : vector<4x8xf32> to vector<4xf32>
    %16 = vector.shape_cast %15 : vector<4xf32> to vector<4x1xf32>
    %17 = vector.broadcast %16 : vector<4x1xf32> to vector<4x8xf32>
    %18 = arith.subf %14, %17 : vector<4x8xf32>
    %19 = math.exp %18 : vector<4x8xf32>
    %cst_9 = arith.constant dense<0.000000e+00> : vector<4xf32>
    %20 = vector.multi_reduction <add>, %19, %cst_9 [1] : vector<4x8xf32> to vector<4xf32>
    %21 = vector.shape_cast %20 : vector<4xf32> to vector<4x1xf32>
    %22 = tpu.reciprocal %21 {approx = true} : vector<4x1xf32> -> vector<4x1xf32>
    %23 = vector.broadcast %22 : vector<4x1xf32> to vector<4x8xf32>
    %24 = arith.mulf %19, %23 : vector<4x8xf32>
    %c0_10 = arith.constant 0 : index
    %c0_11 = arith.constant 0 : index
    %c0_12 = arith.constant 0 : index
    %25 = vector.load %arg3[%c0_10, %c0_11, %c0_12] : memref<4x8x32xf32, #tpu.memory_space<vmem>>, vector<4x8x32xf32>
    %26 = vector.shape_cast %24 : vector<4x8xf32> to vector<4x1x8xf32>
    "tpu.trace_start"() <{level = 10 : i32, message = "bqt,btd->bqd"}> : () -> ()
    %cst_13 = arith.constant dense<0.000000e+00> : vector<4x1x32xf32>
    %27 = tpu.matmul %26, %25, %cst_13 {dimension_numbers = #tpu.dot_dimension_numbers<[2], [1], [1], [2], [0, 0, 0, 1, 1, 2], [0], [0]>} : vector<4x1x8xf32>, vector<4x8x32xf32>, vector<4x1x32xf32> -> vector<4x1x32xf32>
    "tpu.trace_stop"() : () -> ()
    %28 = vector.shape_cast %27 : vector<4x1x32xf32> to vector<4x32xf32>
    %29 = arith.mulf %28, %28 : vector<4x32xf32>
    %cst_14 = arith.constant dense<0.000000e+00> : vector<4xf32>
    %30 = vector.multi_reduction <add>, %29, %cst_14 [1] : vector<4x32xf32> to vector<4xf32>
    %31 = vector.shape_cast %30 : vector<4xf32> to vector<4x1xf32>
    %32 = math.sqrt %31 : vector<4x1xf32>
    %cst_15 = arith.constant 9.99999993E-9 : f32
    %33 = vector.broadcast %cst_15 : f32 to vector<4x1xf32>
    %34 = arith.addf %32, %33 : vector<4x1xf32>
    %35 = tpu.reciprocal %34 {approx = true} : vector<4x1xf32> -> vector<4x1xf32>
    %36 = vector.broadcast %35 : vector<4x1xf32> to vector<4x32xf32>
    %37 = arith.mulf %28, %36 : vector<4x32xf32>
    %c0_16 = arith.constant 0 : index
    %c0_17 = arith.constant 0 : index
    %38 = vector.load %arg5[%c0_16, %c0_17] : memref<4x32xf32, #tpu.memory_space<vmem>>, vector<4x32xf32>
    tpu.vector_store %arg5[%c0_16, %c0_17], %37 {strides = array<i32>} : memref<4x32xf32, #tpu.memory_space<vmem>>, vector<4x32xf32>,
    return
  }
  func.func @transform_0(%arg0: i32) -> (i32, i32, i32) {
    %c0_i32 = arith.constant 0 : i32
    %c0_i32_0 = arith.constant 0 : i32
    %c0_i32_1 = arith.constant 0 : i32
    return %c0_i32, %arg0, %c0_i32_0 : i32, i32, i32
  }
  func.func @transform_1(%arg0: i32) -> (i32, i32) {
    %c0_i32 = arith.constant 0 : i32
    %c0_i32_0 = arith.constant 0 : i32
    %c0_i32_1 = arith.constant 0 : i32
    return %c0_i32, %c0_i32_0 : i32, i32
  }
  func.func @transform_2(%arg0: i32) -> (i32, i32, i32) {
    %c0_i32 = arith.constant 0 : i32
    %c0_i32_0 = arith.constant 0 : i32
    %c0_i32_1 = arith.constant 0 : i32
    return %arg0, %c0_i32, %c0_i32_0 : i32, i32, i32
  }
  func.func @transform_3(%arg0: i32) -> (i32, i32) {
    %c0_i32 = arith.constant 0 : i32
    %c0_i32_0 = arith.constant 0 : i32
    return %arg0, %c0_i32 : i32, i32
  }
  func.func @transform_4(%arg0: i32) -> (i32, i32) {
    %c0_i32 = arith.constant 0 : i32
    %c0_i32_0 = arith.constant 0 : i32
    return %arg0, %c0_i32 : i32, i32
  }
}

module attributes {stable_mosaic.version = 11 : i64} {
  func.func @bigru_kernel(%arg0: i32, %arg1: memref<8x4x32xf32, #tpu.memory_space<vmem>>, %arg2: memref<4x1xi32, #tpu.memory_space<vmem>>, %arg3: memref<32x96xbf16, #tpu.memory_space<vmem>>, %arg4: memref<1x96xf32, #tpu.memory_space<vmem>>, %arg5: memref<32x96xbf16, #tpu.memory_space<vmem>>, %arg6: memref<1x96xf32, #tpu.memory_space<vmem>>, %arg7: memref<32x96xbf16, #tpu.memory_space<vmem>>, %arg8: memref<1x96xf32, #tpu.memory_space<vmem>>, %arg9: memref<32x96xbf16, #tpu.memory_space<vmem>>, %arg10: memref<1x96xf32, #tpu.memory_space<vmem>>, %arg11: memref<8x4x32xf32, #tpu.memory_space<vmem>>, %arg12: memref<8x4x96xf32, #tpu.memory_space<vmem>>, %arg13: memref<8x4x96xf32, #tpu.memory_space<vmem>>, %arg14: memref<8x4x1xf32, #tpu.memory_space<vmem>>) attributes {dimension_semantics = [#tpu.dimension_semantics<parallel>], iteration_bounds = array<i64: 1>, scalar_prefetch = 0 : i64, scratch_operands = 3 : i64, tpu.core_type = #tpu.core_type<tc>, window_params = [{transform_indices = @transform_0, window_bounds = array<i64: 8, 4, 32>}, {transform_indices = @transform_1, window_bounds = array<i64: 4, 1>}, {pipeline_mode = #tpu.pipeline_mode<synchronous>, transform_indices = @transform_2, window_bounds = array<i64: 32, 96>}, {pipeline_mode = #tpu.pipeline_mode<synchronous>, transform_indices = @transform_3, window_bounds = array<i64: 1, 96>}, {pipeline_mode = #tpu.pipeline_mode<synchronous>, transform_indices = @transform_4, window_bounds = array<i64: 32, 96>}, {pipeline_mode = #tpu.pipeline_mode<synchronous>, transform_indices = @transform_5, window_bounds = array<i64: 1, 96>}, {pipeline_mode = #tpu.pipeline_mode<synchronous>, transform_indices = @transform_6, window_bounds = array<i64: 32, 96>}, {pipeline_mode = #tpu.pipeline_mode<synchronous>, transform_indices = @transform_7, window_bounds = array<i64: 1, 96>}, {pipeline_mode = #tpu.pipeline_mode<synchronous>, transform_indices = @transform_8, window_bounds = array<i64: 32, 96>}, {pipeline_mode = #tpu.pipeline_mode<synchronous>, transform_indices = @transform_9, window_bounds = array<i64: 1, 96>}, {transform_indices = @transform_10, window_bounds = array<i64: 8, 4, 32>}]} {
    %c0 = arith.constant 0 : index
    %c0_0 = arith.constant 0 : index
    %c0_1 = arith.constant 0 : index
    %0 = vector.load %arg1[%c0, %c0_0, %c0_1] : memref<8x4x32xf32, #tpu.memory_space<vmem>>, vector<8x4x32xf32>
    %1 = vector.shape_cast %0 : vector<8x4x32xf32> to vector<32x32xf32>
    %2 = arith.truncf %1 : vector<32x32xf32> to vector<32x32xbf16>
    %c0_2 = arith.constant 0 : index
    %c0_3 = arith.constant 0 : index
    %3 = vector.load %arg3[%c0_2, %c0_3] : memref<32x96xbf16, #tpu.memory_space<vmem>>, vector<32x96xbf16>
    %cst = arith.constant dense<0.000000e+00> : vector<32x96xf32>
    %4 = tpu.matmul %2, %3, %cst {dimension_numbers = #tpu.dot_dimension_numbers<[1], [0], [0], [1], [0, 0, 1, 1], [], []>} : vector<32x32xbf16>, vector<32x96xbf16>, vector<32x96xf32> -> vector<32x96xf32>
    %c0_4 = arith.constant 0 : index
    %c0_5 = arith.constant 0 : index
    %5 = vector.load %arg4[%c0_4, %c0_5] : memref<1x96xf32, #tpu.memory_space<vmem>>, vector<1x96xf32>
    %6 = vector.broadcast %5 : vector<1x96xf32> to vector<32x96xf32>
    %7 = arith.addf %4, %6 : vector<32x96xf32>
    %8 = vector.shape_cast %7 : vector<32x96xf32> to vector<8x4x96xf32>
    %c0_6 = arith.constant 0 : index
    %c0_7 = arith.constant 0 : index
    %c0_8 = arith.constant 0 : index
    %9 = vector.load %arg12[%c0_6, %c0_7, %c0_8] : memref<8x4x96xf32, #tpu.memory_space<vmem>>, vector<8x4x96xf32>
    tpu.vector_store %arg12[%c0_6, %c0_7, %c0_8], %8 {strides = array<i32>} : memref<8x4x96xf32, #tpu.memory_space<vmem>>, vector<8x4x96xf32>,
    %c0_9 = arith.constant 0 : index
    %c0_10 = arith.constant 0 : index
    %10 = vector.load %arg7[%c0_9, %c0_10] : memref<32x96xbf16, #tpu.memory_space<vmem>>, vector<32x96xbf16>
    %cst_11 = arith.constant dense<0.000000e+00> : vector<32x96xf32>
    %11 = tpu.matmul %2, %10, %cst_11 {dimension_numbers = #tpu.dot_dimension_numbers<[1], [0], [0], [1], [0, 0, 1, 1], [], []>} : vector<32x32xbf16>, vector<32x96xbf16>, vector<32x96xf32> -> vector<32x96xf32>
    %c0_12 = arith.constant 0 : index
    %c0_13 = arith.constant 0 : index
    %12 = vector.load %arg8[%c0_12, %c0_13] : memref<1x96xf32, #tpu.memory_space<vmem>>, vector<1x96xf32>
    %13 = vector.broadcast %12 : vector<1x96xf32> to vector<32x96xf32>
    %14 = arith.addf %11, %13 : vector<32x96xf32>
    %15 = vector.shape_cast %14 : vector<32x96xf32> to vector<8x4x96xf32>
    %c0_14 = arith.constant 0 : index
    %c0_15 = arith.constant 0 : index
    %c0_16 = arith.constant 0 : index
    %16 = vector.load %arg13[%c0_14, %c0_15, %c0_16] : memref<8x4x96xf32, #tpu.memory_space<vmem>>, vector<8x4x96xf32>
    tpu.vector_store %arg13[%c0_14, %c0_15, %c0_16], %15 {strides = array<i32>} : memref<8x4x96xf32, #tpu.memory_space<vmem>>, vector<8x4x96xf32>,
    %c0_17 = arith.constant 0 : index
    %c0_18 = arith.constant 0 : index
    %17 = vector.load %arg2[%c0_17, %c0_18] : memref<4x1xi32, #tpu.memory_space<vmem>>, vector<4x1xi32>
    %18 = tpu.iota {dimensions = array<i32: 0>} : vector<8x4x1xi32>
    %19 = vector.shape_cast %17 : vector<4x1xi32> to vector<1x4x1xi32>
    %20 = vector.broadcast %19 : vector<1x4x1xi32> to vector<8x4x1xi32>
    %21 = arith.cmpi slt, %18, %20 : vector<8x4x1xi32>
    %22 = arith.extui %21 : vector<8x4x1xi1> to vector<8x4x1xi32>
    %23 = arith.sitofp %22 : vector<8x4x1xi32> to vector<8x4x1xf32>
    %c0_19 = arith.constant 0 : index
    %c0_20 = arith.constant 0 : index
    %c0_21 = arith.constant 0 : index
    %24 = vector.load %arg14[%c0_19, %c0_20, %c0_21] : memref<8x4x1xf32, #tpu.memory_space<vmem>>, vector<8x4x1xf32>
    tpu.vector_store %arg14[%c0_19, %c0_20, %c0_21], %23 {strides = array<i32>} : memref<8x4x1xf32, #tpu.memory_space<vmem>>, vector<8x4x1xf32>,
    %c0_22 = arith.constant 0 : index
    %c0_23 = arith.constant 0 : index
    %25 = vector.load %arg5[%c0_22, %c0_23] : memref<32x96xbf16, #tpu.memory_space<vmem>>, vector<32x96xbf16>
    %c0_24 = arith.constant 0 : index
    %c0_25 = arith.constant 0 : index
    %26 = vector.load %arg9[%c0_24, %c0_25] : memref<32x96xbf16, #tpu.memory_space<vmem>>, vector<32x96xbf16>
    %c0_26 = arith.constant 0 : index
    %c0_27 = arith.constant 0 : index
    %27 = vector.load %arg6[%c0_26, %c0_27] : memref<1x96xf32, #tpu.memory_space<vmem>>, vector<1x96xf32>
    %c0_28 = arith.constant 0 : index
    %c0_29 = arith.constant 0 : index
    %28 = vector.load %arg10[%c0_28, %c0_29] : memref<1x96xf32, #tpu.memory_space<vmem>>, vector<1x96xf32>
    %cst_30 = arith.constant 0.000000e+00 : f32
    %29 = vector.broadcast %cst_30 : f32 to vector<4x32xf32>
    %c0_i32 = arith.constant 0 : i32
    %30 = arith.index_cast %c0_i32 : i32 to index
    %c0_31 = arith.constant 0 : index
    %c0_32 = arith.constant 0 : index
    %31 = vector.load %arg14[%30, %c0_31, %c0_32] : memref<8x4x1xf32, #tpu.memory_space<vmem>>, vector<1x4x1xf32>
    %32 = vector.shape_cast %31 : vector<1x4x1xf32> to vector<4x1xf32>
    %33 = arith.truncf %29 : vector<4x32xf32> to vector<4x32xbf16>
    %cst_33 = arith.constant dense<0.000000e+00> : vector<4x96xf32>
    %34 = tpu.matmul %33, %25, %cst_33 {dimension_numbers = #tpu.dot_dimension_numbers<[1], [0], [0], [1], [0, 0, 1, 1], [], []>} : vector<4x32xbf16>, vector<32x96xbf16>, vector<4x96xf32> -> vector<4x96xf32>
    %35 = vector.broadcast %27 : vector<1x96xf32> to vector<4x96xf32>
    %36 = arith.addf %34, %35 : vector<4x96xf32>
    %37 = arith.index_cast %c0_i32 : i32 to index
    %c0_34 = arith.constant 0 : index
    %c0_35 = arith.constant 0 : index
    %38 = vector.load %arg12[%37, %c0_34, %c0_35] : memref<8x4x96xf32, #tpu.memory_space<vmem>>, vector<1x4x96xf32>
    %39 = vector.shape_cast %38 : vector<1x4x96xf32> to vector<4x96xf32>
    %40 = vector.extract_strided_slice %39 {offsets = [0, 0], sizes = [4, 32], strides = [1, 1]} : vector<4x96xf32> to vector<4x32xf32>
    %41 = vector.extract_strided_slice %36 {offsets = [0, 0], sizes = [4, 32], strides = [1, 1]} : vector<4x96xf32> to vector<4x32xf32>
    %42 = arith.addf %40, %41 : vector<4x32xf32>
    %43 = arith.negf %42 : vector<4x32xf32>
    %44 = math.exp %43 : vector<4x32xf32>
    %cst_36 = arith.constant 1.000000e+00 : f32
    %45 = vector.broadcast %cst_36 : f32 to vector<4x32xf32>
    %46 = arith.addf %45, %44 : vector<4x32xf32>
    %47 = arith.divf %45, %46 : vector<4x32xf32>
    %48 = vector.extract_strided_slice %39 {offsets = [0, 32], sizes = [4, 32], strides = [1, 1]} : vector<4x96xf32> to vector<4x32xf32>
    %49 = vector.extract_strided_slice %36 {offsets = [0, 32], sizes = [4, 32], strides = [1, 1]} : vector<4x96xf32> to vector<4x32xf32>
    %50 = arith.addf %48, %49 : vector<4x32xf32>
    %51 = arith.negf %50 : vector<4x32xf32>
    %52 = math.exp %51 : vector<4x32xf32>
    %cst_37 = arith.constant 1.000000e+00 : f32
    %53 = vector.broadcast %cst_37 : f32 to vector<4x32xf32>
    %54 = arith.addf %53, %52 : vector<4x32xf32>
    %55 = arith.divf %53, %54 : vector<4x32xf32>
    %56 = vector.extract_strided_slice %39 {offsets = [0, 64], sizes = [4, 32], strides = [1, 1]} : vector<4x96xf32> to vector<4x32xf32>
    %57 = vector.extract_strided_slice %36 {offsets = [0, 64], sizes = [4, 32], strides = [1, 1]} : vector<4x96xf32> to vector<4x32xf32>
    %58 = arith.mulf %47, %57 : vector<4x32xf32>
    %59 = arith.addf %56, %58 : vector<4x32xf32>
    %60 = math.tanh %59 : vector<4x32xf32>
    %cst_38 = arith.constant 1.000000e+00 : f32
    %61 = vector.broadcast %cst_38 : f32 to vector<4x32xf32>
    %62 = arith.subf %61, %55 : vector<4x32xf32>
    %63 = arith.mulf %62, %60 : vector<4x32xf32>
    %64 = arith.mulf %55, %29 : vector<4x32xf32>
    %65 = arith.addf %63, %64 : vector<4x32xf32>
    %66 = vector.broadcast %32 : vector<4x1xf32> to vector<4x32xf32>
    %67 = arith.mulf %66, %65 : vector<4x32xf32>
    %cst_39 = arith.constant 1.000000e+00 : f32
    %68 = vector.broadcast %cst_39 : f32 to vector<4x1xf32>
    %69 = arith.subf %68, %32 : vector<4x1xf32>
    %70 = vector.broadcast %69 : vector<4x1xf32> to vector<4x32xf32>
    %71 = arith.mulf %70, %29 : vector<4x32xf32>
    %72 = arith.addf %67, %71 : vector<4x32xf32>
    %73 = vector.broadcast %32 : vector<4x1xf32> to vector<4x32xf32>
    %74 = arith.mulf %73, %72 : vector<4x32xf32>
    %75 = arith.index_cast %c0_i32 : i32 to index
    %c0_40 = arith.constant 0 : index
    %c0_41 = arith.constant 0 : index
    %76 = vector.load %arg11[%75, %c0_40, %c0_41] : memref<8x4x32xf32, #tpu.memory_space<vmem>>, vector<1x4x32xf32>
    %77 = vector.shape_cast %76 : vector<1x4x32xf32> to vector<4x32xf32>
    %78 = vector.shape_cast %74 : vector<4x32xf32> to vector<1x4x32xf32>
    tpu.vector_store %arg11[%75, %c0_40, %c0_41], %78 {strides = array<i32>} : memref<8x4x32xf32, #tpu.memory_space<vmem>>, vector<1x4x32xf32>,
    %c1_i32 = arith.constant 1 : i32
    %79 = arith.index_cast %c1_i32 : i32 to index
    %c0_42 = arith.constant 0 : index
    %c0_43 = arith.constant 0 : index
    %80 = vector.load %arg14[%79, %c0_42, %c0_43] : memref<8x4x1xf32, #tpu.memory_space<vmem>>, vector<1x4x1xf32>
    %81 = vector.shape_cast %80 : vector<1x4x1xf32> to vector<4x1xf32>
    %82 = arith.truncf %72 : vector<4x32xf32> to vector<4x32xbf16>
    %cst_44 = arith.constant dense<0.000000e+00> : vector<4x96xf32>
    %83 = tpu.matmul %82, %25, %cst_44 {dimension_numbers = #tpu.dot_dimension_numbers<[1], [0], [0], [1], [0, 0, 1, 1], [], []>} : vector<4x32xbf16>, vector<32x96xbf16>, vector<4x96xf32> -> vector<4x96xf32>
    %84 = vector.broadcast %27 : vector<1x96xf32> to vector<4x96xf32>
    %85 = arith.addf %83, %84 : vector<4x96xf32>
    %86 = arith.index_cast %c1_i32 : i32 to index
    %c0_45 = arith.constant 0 : index
    %c0_46 = arith.constant 0 : index
    %87 = vector.load %arg12[%86, %c0_45, %c0_46] : memref<8x4x96xf32, #tpu.memory_space<vmem>>, vector<1x4x96xf32>
    %88 = vector.shape_cast %87 : vector<1x4x96xf32> to vector<4x96xf32>
    %89 = vector.extract_strided_slice %88 {offsets = [0, 0], sizes = [4, 32], strides = [1, 1]} : vector<4x96xf32> to vector<4x32xf32>
    %90 = vector.extract_strided_slice %85 {offsets = [0, 0], sizes = [4, 32], strides = [1, 1]} : vector<4x96xf32> to vector<4x32xf32>
    %91 = arith.addf %89, %90 : vector<4x32xf32>
    %92 = arith.negf %91 : vector<4x32xf32>
    %93 = math.exp %92 : vector<4x32xf32>
    %cst_47 = arith.constant 1.000000e+00 : f32
    %94 = vector.broadcast %cst_47 : f32 to vector<4x32xf32>
    %95 = arith.addf %94, %93 : vector<4x32xf32>
    %96 = arith.divf %94, %95 : vector<4x32xf32>
    %97 = vector.extract_strided_slice %88 {offsets = [0, 32], sizes = [4, 32], strides = [1, 1]} : vector<4x96xf32> to vector<4x32xf32>
    %98 = vector.extract_strided_slice %85 {offsets = [0, 32], sizes = [4, 32], strides = [1, 1]} : vector<4x96xf32> to vector<4x32xf32>
    %99 = arith.addf %97, %98 : vector<4x32xf32>
    %100 = arith.negf %99 : vector<4x32xf32>
    %101 = math.exp %100 : vector<4x32xf32>
    %cst_48 = arith.constant 1.000000e+00 : f32
    %102 = vector.broadcast %cst_48 : f32 to vector<4x32xf32>
    %103 = arith.addf %102, %101 : vector<4x32xf32>
    %104 = arith.divf %102, %103 : vector<4x32xf32>
    %105 = vector.extract_strided_slice %88 {offsets = [0, 64], sizes = [4, 32], strides = [1, 1]} : vector<4x96xf32> to vector<4x32xf32>
    %106 = vector.extract_strided_slice %85 {offsets = [0, 64], sizes = [4, 32], strides = [1, 1]} : vector<4x96xf32> to vector<4x32xf32>
    %107 = arith.mulf %96, %106 : vector<4x32xf32>
    %108 = arith.addf %105, %107 : vector<4x32xf32>
    %109 = math.tanh %108 : vector<4x32xf32>
    %cst_49 = arith.constant 1.000000e+00 : f32
    %110 = vector.broadcast %cst_49 : f32 to vector<4x32xf32>
    %111 = arith.subf %110, %104 : vector<4x32xf32>
    %112 = arith.mulf %111, %109 : vector<4x32xf32>
    %113 = arith.mulf %104, %72 : vector<4x32xf32>
    %114 = arith.addf %112, %113 : vector<4x32xf32>
    %115 = vector.broadcast %81 : vector<4x1xf32> to vector<4x32xf32>
    %116 = arith.mulf %115, %114 : vector<4x32xf32>
    %cst_50 = arith.constant 1.000000e+00 : f32
    %117 = vector.broadcast %cst_50 : f32 to vector<4x1xf32>
    %118 = arith.subf %117, %81 : vector<4x1xf32>
    %119 = vector.broadcast %118 : vector<4x1xf32> to vector<4x32xf32>
    %120 = arith.mulf %119, %72 : vector<4x32xf32>
    %121 = arith.addf %116, %120 : vector<4x32xf32>
    %122 = vector.broadcast %81 : vector<4x1xf32> to vector<4x32xf32>
    %123 = arith.mulf %122, %121 : vector<4x32xf32>
    %124 = arith.index_cast %c1_i32 : i32 to index
    %c0_51 = arith.constant 0 : index
    %c0_52 = arith.constant 0 : index
    %125 = vector.load %arg11[%124, %c0_51, %c0_52] : memref<8x4x32xf32, #tpu.memory_space<vmem>>, vector<1x4x32xf32>
    %126 = vector.shape_cast %125 : vector<1x4x32xf32> to vector<4x32xf32>
    %127 = vector.shape_cast %123 : vector<4x32xf32> to vector<1x4x32xf32>
    tpu.vector_store %arg11[%124, %c0_51, %c0_52], %127 {strides = array<i32>} : memref<8x4x32xf32, #tpu.memory_space<vmem>>, vector<1x4x32xf32>,
    %c2_i32 = arith.constant 2 : i32
    %128 = arith.index_cast %c2_i32 : i32 to index
    %c0_53 = arith.constant 0 : index
    %c0_54 = arith.constant 0 : index
    %129 = vector.load %arg14[%128, %c0_53, %c0_54] : memref<8x4x1xf32, #tpu.memory_space<vmem>>, vector<1x4x1xf32>
    %130 = vector.shape_cast %129 : vector<1x4x1xf32> to vector<4x1xf32>
    %131 = arith.truncf %121 : vector<4x32xf32> to vector<4x32xbf16>
    %cst_55 = arith.constant dense<0.000000e+00> : vector<4x96xf32>
    %132 = tpu.matmul %131, %25, %cst_55 {dimension_numbers = #tpu.dot_dimension_numbers<[1], [0], [0], [1], [0, 0, 1, 1], [], []>} : vector<4x32xbf16>, vector<32x96xbf16>, vector<4x96xf32> -> vector<4x96xf32>
    %133 = vector.broadcast %27 : vector<1x96xf32> to vector<4x96xf32>
    %134 = arith.addf %132, %133 : vector<4x96xf32>
    %135 = arith.index_cast %c2_i32 : i32 to index
    %c0_56 = arith.constant 0 : index
    %c0_57 = arith.constant 0 : index
    %136 = vector.load %arg12[%135, %c0_56, %c0_57] : memref<8x4x96xf32, #tpu.memory_space<vmem>>, vector<1x4x96xf32>
    %137 = vector.shape_cast %136 : vector<1x4x96xf32> to vector<4x96xf32>
    %138 = vector.extract_strided_slice %137 {offsets = [0, 0], sizes = [4, 32], strides = [1, 1]} : vector<4x96xf32> to vector<4x32xf32>
    %139 = vector.extract_strided_slice %134 {offsets = [0, 0], sizes = [4, 32], strides = [1, 1]} : vector<4x96xf32> to vector<4x32xf32>
    %140 = arith.addf %138, %139 : vector<4x32xf32>
    %141 = arith.negf %140 : vector<4x32xf32>
    %142 = math.exp %141 : vector<4x32xf32>
    %cst_58 = arith.constant 1.000000e+00 : f32
    %143 = vector.broadcast %cst_58 : f32 to vector<4x32xf32>
    %144 = arith.addf %143, %142 : vector<4x32xf32>
    %145 = arith.divf %143, %144 : vector<4x32xf32>
    %146 = vector.extract_strided_slice %137 {offsets = [0, 32], sizes = [4, 32], strides = [1, 1]} : vector<4x96xf32> to vector<4x32xf32>
    %147 = vector.extract_strided_slice %134 {offsets = [0, 32], sizes = [4, 32], strides = [1, 1]} : vector<4x96xf32> to vector<4x32xf32>
    %148 = arith.addf %146, %147 : vector<4x32xf32>
    %149 = arith.negf %148 : vector<4x32xf32>
    %150 = math.exp %149 : vector<4x32xf32>
    %cst_59 = arith.constant 1.000000e+00 : f32
    %151 = vector.broadcast %cst_59 : f32 to vector<4x32xf32>
    %152 = arith.addf %151, %150 : vector<4x32xf32>
    %153 = arith.divf %151, %152 : vector<4x32xf32>
    %154 = vector.extract_strided_slice %137 {offsets = [0, 64], sizes = [4, 32], strides = [1, 1]} : vector<4x96xf32> to vector<4x32xf32>
    %155 = vector.extract_strided_slice %134 {offsets = [0, 64], sizes = [4, 32], strides = [1, 1]} : vector<4x96xf32> to vector<4x32xf32>
    %156 = arith.mulf %145, %155 : vector<4x32xf32>
    %157 = arith.addf %154, %156 : vector<4x32xf32>
    %158 = math.tanh %157 : vector<4x32xf32>
    %cst_60 = arith.constant 1.000000e+00 : f32
    %159 = vector.broadcast %cst_60 : f32 to vector<4x32xf32>
    %160 = arith.subf %159, %153 : vector<4x32xf32>
    %161 = arith.mulf %160, %158 : vector<4x32xf32>
    %162 = arith.mulf %153, %121 : vector<4x32xf32>
    %163 = arith.addf %161, %162 : vector<4x32xf32>
    %164 = vector.broadcast %130 : vector<4x1xf32> to vector<4x32xf32>
    %165 = arith.mulf %164, %163 : vector<4x32xf32>
    %cst_61 = arith.constant 1.000000e+00 : f32
    %166 = vector.broadcast %cst_61 : f32 to vector<4x1xf32>
    %167 = arith.subf %166, %130 : vector<4x1xf32>
    %168 = vector.broadcast %167 : vector<4x1xf32> to vector<4x32xf32>
    %169 = arith.mulf %168, %121 : vector<4x32xf32>
    %170 = arith.addf %165, %169 : vector<4x32xf32>
    %171 = vector.broadcast %130 : vector<4x1xf32> to vector<4x32xf32>
    %172 = arith.mulf %171, %170 : vector<4x32xf32>
    %173 = arith.index_cast %c2_i32 : i32 to index
    %c0_62 = arith.constant 0 : index
    %c0_63 = arith.constant 0 : index
    %174 = vector.load %arg11[%173, %c0_62, %c0_63] : memref<8x4x32xf32, #tpu.memory_space<vmem>>, vector<1x4x32xf32>
    %175 = vector.shape_cast %174 : vector<1x4x32xf32> to vector<4x32xf32>
    %176 = vector.shape_cast %172 : vector<4x32xf32> to vector<1x4x32xf32>
    tpu.vector_store %arg11[%173, %c0_62, %c0_63], %176 {strides = array<i32>} : memref<8x4x32xf32, #tpu.memory_space<vmem>>, vector<1x4x32xf32>,
    %c3_i32 = arith.constant 3 : i32
    %177 = arith.index_cast %c3_i32 : i32 to index
    %c0_64 = arith.constant 0 : index
    %c0_65 = arith.constant 0 : index
    %178 = vector.load %arg14[%177, %c0_64, %c0_65] : memref<8x4x1xf32, #tpu.memory_space<vmem>>, vector<1x4x1xf32>
    %179 = vector.shape_cast %178 : vector<1x4x1xf32> to vector<4x1xf32>
    %180 = arith.truncf %170 : vector<4x32xf32> to vector<4x32xbf16>
    %cst_66 = arith.constant dense<0.000000e+00> : vector<4x96xf32>
    %181 = tpu.matmul %180, %25, %cst_66 {dimension_numbers = #tpu.dot_dimension_numbers<[1], [0], [0], [1], [0, 0, 1, 1], [], []>} : vector<4x32xbf16>, vector<32x96xbf16>, vector<4x96xf32> -> vector<4x96xf32>
    %182 = vector.broadcast %27 : vector<1x96xf32> to vector<4x96xf32>
    %183 = arith.addf %181, %182 : vector<4x96xf32>
    %184 = arith.index_cast %c3_i32 : i32 to index
    %c0_67 = arith.constant 0 : index
    %c0_68 = arith.constant 0 : index
    %185 = vector.load %arg12[%184, %c0_67, %c0_68] : memref<8x4x96xf32, #tpu.memory_space<vmem>>, vector<1x4x96xf32>
    %186 = vector.shape_cast %185 : vector<1x4x96xf32> to vector<4x96xf32>
    %187 = vector.extract_strided_slice %186 {offsets = [0, 0], sizes = [4, 32], strides = [1, 1]} : vector<4x96xf32> to vector<4x32xf32>
    %188 = vector.extract_strided_slice %183 {offsets = [0, 0], sizes = [4, 32], strides = [1, 1]} : vector<4x96xf32> to vector<4x32xf32>
    %189 = arith.addf %187, %188 : vector<4x32xf32>
    %190 = arith.negf %189 : vector<4x32xf32>
    %191 = math.exp %190 : vector<4x32xf32>
    %cst_69 = arith.constant 1.000000e+00 : f32
    %192 = vector.broadcast %cst_69 : f32 to vector<4x32xf32>
    %193 = arith.addf %192, %191 : vector<4x32xf32>
    %194 = arith.divf %192, %193 : vector<4x32xf32>
    %195 = vector.extract_strided_slice %186 {offsets = [0, 32], sizes = [4, 32], strides = [1, 1]} : vector<4x96xf32> to vector<4x32xf32>
    %196 = vector.extract_strided_slice %183 {offsets = [0, 32], sizes = [4, 32], strides = [1, 1]} : vector<4x96xf32> to vector<4x32xf32>
    %197 = arith.addf %195, %196 : vector<4x32xf32>
    %198 = arith.negf %197 : vector<4x32xf32>
    %199 = math.exp %198 : vector<4x32xf32>
    %cst_70 = arith.constant 1.000000e+00 : f32
    %200 = vector.broadcast %cst_70 : f32 to vector<4x32xf32>
    %201 = arith.addf %200, %199 : vector<4x32xf32>
    %202 = arith.divf %200, %201 : vector<4x32xf32>
    %203 = vector.extract_strided_slice %186 {offsets = [0, 64], sizes = [4, 32], strides = [1, 1]} : vector<4x96xf32> to vector<4x32xf32>
    %204 = vector.extract_strided_slice %183 {offsets = [0, 64], sizes = [4, 32], strides = [1, 1]} : vector<4x96xf32> to vector<4x32xf32>
    %205 = arith.mulf %194, %204 : vector<4x32xf32>
    %206 = arith.addf %203, %205 : vector<4x32xf32>
    %207 = math.tanh %206 : vector<4x32xf32>
    %cst_71 = arith.constant 1.000000e+00 : f32
    %208 = vector.broadcast %cst_71 : f32 to vector<4x32xf32>
    %209 = arith.subf %208, %202 : vector<4x32xf32>
    %210 = arith.mulf %209, %207 : vector<4x32xf32>
    %211 = arith.mulf %202, %170 : vector<4x32xf32>
    %212 = arith.addf %210, %211 : vector<4x32xf32>
    %213 = vector.broadcast %179 : vector<4x1xf32> to vector<4x32xf32>
    %214 = arith.mulf %213, %212 : vector<4x32xf32>
    %cst_72 = arith.constant 1.000000e+00 : f32
    %215 = vector.broadcast %cst_72 : f32 to vector<4x1xf32>
    %216 = arith.subf %215, %179 : vector<4x1xf32>
    %217 = vector.broadcast %216 : vector<4x1xf32> to vector<4x32xf32>
    %218 = arith.mulf %217, %170 : vector<4x32xf32>
    %219 = arith.addf %214, %218 : vector<4x32xf32>
    %220 = vector.broadcast %179 : vector<4x1xf32> to vector<4x32xf32>
    %221 = arith.mulf %220, %219 : vector<4x32xf32>
    %222 = arith.index_cast %c3_i32 : i32 to index
    %c0_73 = arith.constant 0 : index
    %c0_74 = arith.constant 0 : index
    %223 = vector.load %arg11[%222, %c0_73, %c0_74] : memref<8x4x32xf32, #tpu.memory_space<vmem>>, vector<1x4x32xf32>
    %224 = vector.shape_cast %223 : vector<1x4x32xf32> to vector<4x32xf32>
    %225 = vector.shape_cast %221 : vector<4x32xf32> to vector<1x4x32xf32>
    tpu.vector_store %arg11[%222, %c0_73, %c0_74], %225 {strides = array<i32>} : memref<8x4x32xf32, #tpu.memory_space<vmem>>, vector<1x4x32xf32>,
    %c4_i32 = arith.constant 4 : i32
    %226 = arith.index_cast %c4_i32 : i32 to index
    %c0_75 = arith.constant 0 : index
    %c0_76 = arith.constant 0 : index
    %227 = vector.load %arg14[%226, %c0_75, %c0_76] : memref<8x4x1xf32, #tpu.memory_space<vmem>>, vector<1x4x1xf32>
    %228 = vector.shape_cast %227 : vector<1x4x1xf32> to vector<4x1xf32>
    %229 = arith.truncf %219 : vector<4x32xf32> to vector<4x32xbf16>
    %cst_77 = arith.constant dense<0.000000e+00> : vector<4x96xf32>
    %230 = tpu.matmul %229, %25, %cst_77 {dimension_numbers = #tpu.dot_dimension_numbers<[1], [0], [0], [1], [0, 0, 1, 1], [], []>} : vector<4x32xbf16>, vector<32x96xbf16>, vector<4x96xf32> -> vector<4x96xf32>
    %231 = vector.broadcast %27 : vector<1x96xf32> to vector<4x96xf32>
    %232 = arith.addf %230, %231 : vector<4x96xf32>
    %233 = arith.index_cast %c4_i32 : i32 to index
    %c0_78 = arith.constant 0 : index
    %c0_79 = arith.constant 0 : index
    %234 = vector.load %arg12[%233, %c0_78, %c0_79] : memref<8x4x96xf32, #tpu.memory_space<vmem>>, vector<1x4x96xf32>
    %235 = vector.shape_cast %234 : vector<1x4x96xf32> to vector<4x96xf32>
    %236 = vector.extract_strided_slice %235 {offsets = [0, 0], sizes = [4, 32], strides = [1, 1]} : vector<4x96xf32> to vector<4x32xf32>
    %237 = vector.extract_strided_slice %232 {offsets = [0, 0], sizes = [4, 32], strides = [1, 1]} : vector<4x96xf32> to vector<4x32xf32>
    %238 = arith.addf %236, %237 : vector<4x32xf32>
    %239 = arith.negf %238 : vector<4x32xf32>
    %240 = math.exp %239 : vector<4x32xf32>
    %cst_80 = arith.constant 1.000000e+00 : f32
    %241 = vector.broadcast %cst_80 : f32 to vector<4x32xf32>
    %242 = arith.addf %241, %240 : vector<4x32xf32>
    %243 = arith.divf %241, %242 : vector<4x32xf32>
    %244 = vector.extract_strided_slice %235 {offsets = [0, 32], sizes = [4, 32], strides = [1, 1]} : vector<4x96xf32> to vector<4x32xf32>
    %245 = vector.extract_strided_slice %232 {offsets = [0, 32], sizes = [4, 32], strides = [1, 1]} : vector<4x96xf32> to vector<4x32xf32>
    %246 = arith.addf %244, %245 : vector<4x32xf32>
    %247 = arith.negf %246 : vector<4x32xf32>
    %248 = math.exp %247 : vector<4x32xf32>
    %cst_81 = arith.constant 1.000000e+00 : f32
    %249 = vector.broadcast %cst_81 : f32 to vector<4x32xf32>
    %250 = arith.addf %249, %248 : vector<4x32xf32>
    %251 = arith.divf %249, %250 : vector<4x32xf32>
    %252 = vector.extract_strided_slice %235 {offsets = [0, 64], sizes = [4, 32], strides = [1, 1]} : vector<4x96xf32> to vector<4x32xf32>
    %253 = vector.extract_strided_slice %232 {offsets = [0, 64], sizes = [4, 32], strides = [1, 1]} : vector<4x96xf32> to vector<4x32xf32>
    %254 = arith.mulf %243, %253 : vector<4x32xf32>
    %255 = arith.addf %252, %254 : vector<4x32xf32>
    %256 = math.tanh %255 : vector<4x32xf32>
    %cst_82 = arith.constant 1.000000e+00 : f32
    %257 = vector.broadcast %cst_82 : f32 to vector<4x32xf32>
    %258 = arith.subf %257, %251 : vector<4x32xf32>
    %259 = arith.mulf %258, %256 : vector<4x32xf32>
    %260 = arith.mulf %251, %219 : vector<4x32xf32>
    %261 = arith.addf %259, %260 : vector<4x32xf32>
    %262 = vector.broadcast %228 : vector<4x1xf32> to vector<4x32xf32>
    %263 = arith.mulf %262, %261 : vector<4x32xf32>
    %cst_83 = arith.constant 1.000000e+00 : f32
    %264 = vector.broadcast %cst_83 : f32 to vector<4x1xf32>
    %265 = arith.subf %264, %228 : vector<4x1xf32>
    %266 = vector.broadcast %265 : vector<4x1xf32> to vector<4x32xf32>
    %267 = arith.mulf %266, %219 : vector<4x32xf32>
    %268 = arith.addf %263, %267 : vector<4x32xf32>
    %269 = vector.broadcast %228 : vector<4x1xf32> to vector<4x32xf32>
    %270 = arith.mulf %269, %268 : vector<4x32xf32>
    %271 = arith.index_cast %c4_i32 : i32 to index
    %c0_84 = arith.constant 0 : index
    %c0_85 = arith.constant 0 : index
    %272 = vector.load %arg11[%271, %c0_84, %c0_85] : memref<8x4x32xf32, #tpu.memory_space<vmem>>, vector<1x4x32xf32>
    %273 = vector.shape_cast %272 : vector<1x4x32xf32> to vector<4x32xf32>
    %274 = vector.shape_cast %270 : vector<4x32xf32> to vector<1x4x32xf32>
    tpu.vector_store %arg11[%271, %c0_84, %c0_85], %274 {strides = array<i32>} : memref<8x4x32xf32, #tpu.memory_space<vmem>>, vector<1x4x32xf32>,
    %c5_i32 = arith.constant 5 : i32
    %275 = arith.index_cast %c5_i32 : i32 to index
    %c0_86 = arith.constant 0 : index
    %c0_87 = arith.constant 0 : index
    %276 = vector.load %arg14[%275, %c0_86, %c0_87] : memref<8x4x1xf32, #tpu.memory_space<vmem>>, vector<1x4x1xf32>
    %277 = vector.shape_cast %276 : vector<1x4x1xf32> to vector<4x1xf32>
    %278 = arith.truncf %268 : vector<4x32xf32> to vector<4x32xbf16>
    %cst_88 = arith.constant dense<0.000000e+00> : vector<4x96xf32>
    %279 = tpu.matmul %278, %25, %cst_88 {dimension_numbers = #tpu.dot_dimension_numbers<[1], [0], [0], [1], [0, 0, 1, 1], [], []>} : vector<4x32xbf16>, vector<32x96xbf16>, vector<4x96xf32> -> vector<4x96xf32>
    %280 = vector.broadcast %27 : vector<1x96xf32> to vector<4x96xf32>
    %281 = arith.addf %279, %280 : vector<4x96xf32>
    %282 = arith.index_cast %c5_i32 : i32 to index
    %c0_89 = arith.constant 0 : index
    %c0_90 = arith.constant 0 : index
    %283 = vector.load %arg12[%282, %c0_89, %c0_90] : memref<8x4x96xf32, #tpu.memory_space<vmem>>, vector<1x4x96xf32>
    %284 = vector.shape_cast %283 : vector<1x4x96xf32> to vector<4x96xf32>
    %285 = vector.extract_strided_slice %284 {offsets = [0, 0], sizes = [4, 32], strides = [1, 1]} : vector<4x96xf32> to vector<4x32xf32>
    %286 = vector.extract_strided_slice %281 {offsets = [0, 0], sizes = [4, 32], strides = [1, 1]} : vector<4x96xf32> to vector<4x32xf32>
    %287 = arith.addf %285, %286 : vector<4x32xf32>
    %288 = arith.negf %287 : vector<4x32xf32>
    %289 = math.exp %288 : vector<4x32xf32>
    %cst_91 = arith.constant 1.000000e+00 : f32
    %290 = vector.broadcast %cst_91 : f32 to vector<4x32xf32>
    %291 = arith.addf %290, %289 : vector<4x32xf32>
    %292 = arith.divf %290, %291 : vector<4x32xf32>
    %293 = vector.extract_strided_slice %284 {offsets = [0, 32], sizes = [4, 32], strides = [1, 1]} : vector<4x96xf32> to vector<4x32xf32>
    %294 = vector.extract_strided_slice %281 {offsets = [0, 32], sizes = [4, 32], strides = [1, 1]} : vector<4x96xf32> to vector<4x32xf32>
    %295 = arith.addf %293, %294 : vector<4x32xf32>
    %296 = arith.negf %295 : vector<4x32xf32>
    %297 = math.exp %296 : vector<4x32xf32>
    %cst_92 = arith.constant 1.000000e+00 : f32
    %298 = vector.broadcast %cst_92 : f32 to vector<4x32xf32>
    %299 = arith.addf %298, %297 : vector<4x32xf32>
    %300 = arith.divf %298, %299 : vector<4x32xf32>
    %301 = vector.extract_strided_slice %284 {offsets = [0, 64], sizes = [4, 32], strides = [1, 1]} : vector<4x96xf32> to vector<4x32xf32>
    %302 = vector.extract_strided_slice %281 {offsets = [0, 64], sizes = [4, 32], strides = [1, 1]} : vector<4x96xf32> to vector<4x32xf32>
    %303 = arith.mulf %292, %302 : vector<4x32xf32>
    %304 = arith.addf %301, %303 : vector<4x32xf32>
    %305 = math.tanh %304 : vector<4x32xf32>
    %cst_93 = arith.constant 1.000000e+00 : f32
    %306 = vector.broadcast %cst_93 : f32 to vector<4x32xf32>
    %307 = arith.subf %306, %300 : vector<4x32xf32>
    %308 = arith.mulf %307, %305 : vector<4x32xf32>
    %309 = arith.mulf %300, %268 : vector<4x32xf32>
    %310 = arith.addf %308, %309 : vector<4x32xf32>
    %311 = vector.broadcast %277 : vector<4x1xf32> to vector<4x32xf32>
    %312 = arith.mulf %311, %310 : vector<4x32xf32>
    %cst_94 = arith.constant 1.000000e+00 : f32
    %313 = vector.broadcast %cst_94 : f32 to vector<4x1xf32>
    %314 = arith.subf %313, %277 : vector<4x1xf32>
    %315 = vector.broadcast %314 : vector<4x1xf32> to vector<4x32xf32>
    %316 = arith.mulf %315, %268 : vector<4x32xf32>
    %317 = arith.addf %312, %316 : vector<4x32xf32>
    %318 = vector.broadcast %277 : vector<4x1xf32> to vector<4x32xf32>
    %319 = arith.mulf %318, %317 : vector<4x32xf32>
    %320 = arith.index_cast %c5_i32 : i32 to index
    %c0_95 = arith.constant 0 : index
    %c0_96 = arith.constant 0 : index
    %321 = vector.load %arg11[%320, %c0_95, %c0_96] : memref<8x4x32xf32, #tpu.memory_space<vmem>>, vector<1x4x32xf32>
    %322 = vector.shape_cast %321 : vector<1x4x32xf32> to vector<4x32xf32>
    %323 = vector.shape_cast %319 : vector<4x32xf32> to vector<1x4x32xf32>
    tpu.vector_store %arg11[%320, %c0_95, %c0_96], %323 {strides = array<i32>} : memref<8x4x32xf32, #tpu.memory_space<vmem>>, vector<1x4x32xf32>,
    %c6_i32 = arith.constant 6 : i32
    %324 = arith.index_cast %c6_i32 : i32 to index
    %c0_97 = arith.constant 0 : index
    %c0_98 = arith.constant 0 : index
    %325 = vector.load %arg14[%324, %c0_97, %c0_98] : memref<8x4x1xf32, #tpu.memory_space<vmem>>, vector<1x4x1xf32>
    %326 = vector.shape_cast %325 : vector<1x4x1xf32> to vector<4x1xf32>
    %327 = arith.truncf %317 : vector<4x32xf32> to vector<4x32xbf16>
    %cst_99 = arith.constant dense<0.000000e+00> : vector<4x96xf32>
    %328 = tpu.matmul %327, %25, %cst_99 {dimension_numbers = #tpu.dot_dimension_numbers<[1], [0], [0], [1], [0, 0, 1, 1], [], []>} : vector<4x32xbf16>, vector<32x96xbf16>, vector<4x96xf32> -> vector<4x96xf32>
    %329 = vector.broadcast %27 : vector<1x96xf32> to vector<4x96xf32>
    %330 = arith.addf %328, %329 : vector<4x96xf32>
    %331 = arith.index_cast %c6_i32 : i32 to index
    %c0_100 = arith.constant 0 : index
    %c0_101 = arith.constant 0 : index
    %332 = vector.load %arg12[%331, %c0_100, %c0_101] : memref<8x4x96xf32, #tpu.memory_space<vmem>>, vector<1x4x96xf32>
    %333 = vector.shape_cast %332 : vector<1x4x96xf32> to vector<4x96xf32>
    %334 = vector.extract_strided_slice %333 {offsets = [0, 0], sizes = [4, 32], strides = [1, 1]} : vector<4x96xf32> to vector<4x32xf32>
    %335 = vector.extract_strided_slice %330 {offsets = [0, 0], sizes = [4, 32], strides = [1, 1]} : vector<4x96xf32> to vector<4x32xf32>
    %336 = arith.addf %334, %335 : vector<4x32xf32>
    %337 = arith.negf %336 : vector<4x32xf32>
    %338 = math.exp %337 : vector<4x32xf32>
    %cst_102 = arith.constant 1.000000e+00 : f32
    %339 = vector.broadcast %cst_102 : f32 to vector<4x32xf32>
    %340 = arith.addf %339, %338 : vector<4x32xf32>
    %341 = arith.divf %339, %340 : vector<4x32xf32>
    %342 = vector.extract_strided_slice %333 {offsets = [0, 32], sizes = [4, 32], strides = [1, 1]} : vector<4x96xf32> to vector<4x32xf32>
    %343 = vector.extract_strided_slice %330 {offsets = [0, 32], sizes = [4, 32], strides = [1, 1]} : vector<4x96xf32> to vector<4x32xf32>
    %344 = arith.addf %342, %343 : vector<4x32xf32>
    %345 = arith.negf %344 : vector<4x32xf32>
    %346 = math.exp %345 : vector<4x32xf32>
    %cst_103 = arith.constant 1.000000e+00 : f32
    %347 = vector.broadcast %cst_103 : f32 to vector<4x32xf32>
    %348 = arith.addf %347, %346 : vector<4x32xf32>
    %349 = arith.divf %347, %348 : vector<4x32xf32>
    %350 = vector.extract_strided_slice %333 {offsets = [0, 64], sizes = [4, 32], strides = [1, 1]} : vector<4x96xf32> to vector<4x32xf32>
    %351 = vector.extract_strided_slice %330 {offsets = [0, 64], sizes = [4, 32], strides = [1, 1]} : vector<4x96xf32> to vector<4x32xf32>
    %352 = arith.mulf %341, %351 : vector<4x32xf32>
    %353 = arith.addf %350, %352 : vector<4x32xf32>
    %354 = math.tanh %353 : vector<4x32xf32>
    %cst_104 = arith.constant 1.000000e+00 : f32
    %355 = vector.broadcast %cst_104 : f32 to vector<4x32xf32>
    %356 = arith.subf %355, %349 : vector<4x32xf32>
    %357 = arith.mulf %356, %354 : vector<4x32xf32>
    %358 = arith.mulf %349, %317 : vector<4x32xf32>
    %359 = arith.addf %357, %358 : vector<4x32xf32>
    %360 = vector.broadcast %326 : vector<4x1xf32> to vector<4x32xf32>
    %361 = arith.mulf %360, %359 : vector<4x32xf32>
    %cst_105 = arith.constant 1.000000e+00 : f32
    %362 = vector.broadcast %cst_105 : f32 to vector<4x1xf32>
    %363 = arith.subf %362, %326 : vector<4x1xf32>
    %364 = vector.broadcast %363 : vector<4x1xf32> to vector<4x32xf32>
    %365 = arith.mulf %364, %317 : vector<4x32xf32>
    %366 = arith.addf %361, %365 : vector<4x32xf32>
    %367 = vector.broadcast %326 : vector<4x1xf32> to vector<4x32xf32>
    %368 = arith.mulf %367, %366 : vector<4x32xf32>
    %369 = arith.index_cast %c6_i32 : i32 to index
    %c0_106 = arith.constant 0 : index
    %c0_107 = arith.constant 0 : index
    %370 = vector.load %arg11[%369, %c0_106, %c0_107] : memref<8x4x32xf32, #tpu.memory_space<vmem>>, vector<1x4x32xf32>
    %371 = vector.shape_cast %370 : vector<1x4x32xf32> to vector<4x32xf32>
    %372 = vector.shape_cast %368 : vector<4x32xf32> to vector<1x4x32xf32>
    tpu.vector_store %arg11[%369, %c0_106, %c0_107], %372 {strides = array<i32>} : memref<8x4x32xf32, #tpu.memory_space<vmem>>, vector<1x4x32xf32>,
    %c7_i32 = arith.constant 7 : i32
    %373 = arith.index_cast %c7_i32 : i32 to index
    %c0_108 = arith.constant 0 : index
    %c0_109 = arith.constant 0 : index
    %374 = vector.load %arg14[%373, %c0_108, %c0_109] : memref<8x4x1xf32, #tpu.memory_space<vmem>>, vector<1x4x1xf32>
    %375 = vector.shape_cast %374 : vector<1x4x1xf32> to vector<4x1xf32>
    %376 = arith.truncf %366 : vector<4x32xf32> to vector<4x32xbf16>
    %cst_110 = arith.constant dense<0.000000e+00> : vector<4x96xf32>
    %377 = tpu.matmul %376, %25, %cst_110 {dimension_numbers = #tpu.dot_dimension_numbers<[1], [0], [0], [1], [0, 0, 1, 1], [], []>} : vector<4x32xbf16>, vector<32x96xbf16>, vector<4x96xf32> -> vector<4x96xf32>
    %378 = vector.broadcast %27 : vector<1x96xf32> to vector<4x96xf32>
    %379 = arith.addf %377, %378 : vector<4x96xf32>
    %380 = arith.index_cast %c7_i32 : i32 to index
    %c0_111 = arith.constant 0 : index
    %c0_112 = arith.constant 0 : index
    %381 = vector.load %arg12[%380, %c0_111, %c0_112] : memref<8x4x96xf32, #tpu.memory_space<vmem>>, vector<1x4x96xf32>
    %382 = vector.shape_cast %381 : vector<1x4x96xf32> to vector<4x96xf32>
    %383 = vector.extract_strided_slice %382 {offsets = [0, 0], sizes = [4, 32], strides = [1, 1]} : vector<4x96xf32> to vector<4x32xf32>
    %384 = vector.extract_strided_slice %379 {offsets = [0, 0], sizes = [4, 32], strides = [1, 1]} : vector<4x96xf32> to vector<4x32xf32>
    %385 = arith.addf %383, %384 : vector<4x32xf32>
    %386 = arith.negf %385 : vector<4x32xf32>
    %387 = math.exp %386 : vector<4x32xf32>
    %cst_113 = arith.constant 1.000000e+00 : f32
    %388 = vector.broadcast %cst_113 : f32 to vector<4x32xf32>
    %389 = arith.addf %388, %387 : vector<4x32xf32>
    %390 = arith.divf %388, %389 : vector<4x32xf32>
    %391 = vector.extract_strided_slice %382 {offsets = [0, 32], sizes = [4, 32], strides = [1, 1]} : vector<4x96xf32> to vector<4x32xf32>
    %392 = vector.extract_strided_slice %379 {offsets = [0, 32], sizes = [4, 32], strides = [1, 1]} : vector<4x96xf32> to vector<4x32xf32>
    %393 = arith.addf %391, %392 : vector<4x32xf32>
    %394 = arith.negf %393 : vector<4x32xf32>
    %395 = math.exp %394 : vector<4x32xf32>
    %cst_114 = arith.constant 1.000000e+00 : f32
    %396 = vector.broadcast %cst_114 : f32 to vector<4x32xf32>
    %397 = arith.addf %396, %395 : vector<4x32xf32>
    %398 = arith.divf %396, %397 : vector<4x32xf32>
    %399 = vector.extract_strided_slice %382 {offsets = [0, 64], sizes = [4, 32], strides = [1, 1]} : vector<4x96xf32> to vector<4x32xf32>
    %400 = vector.extract_strided_slice %379 {offsets = [0, 64], sizes = [4, 32], strides = [1, 1]} : vector<4x96xf32> to vector<4x32xf32>
    %401 = arith.mulf %390, %400 : vector<4x32xf32>
    %402 = arith.addf %399, %401 : vector<4x32xf32>
    %403 = math.tanh %402 : vector<4x32xf32>
    %cst_115 = arith.constant 1.000000e+00 : f32
    %404 = vector.broadcast %cst_115 : f32 to vector<4x32xf32>
    %405 = arith.subf %404, %398 : vector<4x32xf32>
    %406 = arith.mulf %405, %403 : vector<4x32xf32>
    %407 = arith.mulf %398, %366 : vector<4x32xf32>
    %408 = arith.addf %406, %407 : vector<4x32xf32>
    %409 = vector.broadcast %375 : vector<4x1xf32> to vector<4x32xf32>
    %410 = arith.mulf %409, %408 : vector<4x32xf32>
    %cst_116 = arith.constant 1.000000e+00 : f32
    %411 = vector.broadcast %cst_116 : f32 to vector<4x1xf32>
    %412 = arith.subf %411, %375 : vector<4x1xf32>
    %413 = vector.broadcast %412 : vector<4x1xf32> to vector<4x32xf32>
    %414 = arith.mulf %413, %366 : vector<4x32xf32>
    %415 = arith.addf %410, %414 : vector<4x32xf32>
    %416 = vector.broadcast %375 : vector<4x1xf32> to vector<4x32xf32>
    %417 = arith.mulf %416, %415 : vector<4x32xf32>
    %418 = arith.index_cast %c7_i32 : i32 to index
    %c0_117 = arith.constant 0 : index
    %c0_118 = arith.constant 0 : index
    %419 = vector.load %arg11[%418, %c0_117, %c0_118] : memref<8x4x32xf32, #tpu.memory_space<vmem>>, vector<1x4x32xf32>
    %420 = vector.shape_cast %419 : vector<1x4x32xf32> to vector<4x32xf32>
    %421 = vector.shape_cast %417 : vector<4x32xf32> to vector<1x4x32xf32>
    tpu.vector_store %arg11[%418, %c0_117, %c0_118], %421 {strides = array<i32>} : memref<8x4x32xf32, #tpu.memory_space<vmem>>, vector<1x4x32xf32>,
    %c8_i32 = arith.constant 8 : i32
    %c0_i32_119 = arith.constant 0 : i32
    %c7_i32_120 = arith.constant 7 : i32
    %422 = arith.subi %c7_i32_120, %c0_i32_119 : i32
    %423 = arith.index_cast %422 : i32 to index
    %c0_121 = arith.constant 0 : index
    %c0_122 = arith.constant 0 : index
    %424 = vector.load %arg14[%423, %c0_121, %c0_122] : memref<8x4x1xf32, #tpu.memory_space<vmem>>, vector<1x4x1xf32>
    %425 = vector.shape_cast %424 : vector<1x4x1xf32> to vector<4x1xf32>
    %426 = arith.truncf %29 : vector<4x32xf32> to vector<4x32xbf16>
    %cst_123 = arith.constant dense<0.000000e+00> : vector<4x96xf32>
    %427 = tpu.matmul %426, %26, %cst_123 {dimension_numbers = #tpu.dot_dimension_numbers<[1], [0], [0], [1], [0, 0, 1, 1], [], []>} : vector<4x32xbf16>, vector<32x96xbf16>, vector<4x96xf32> -> vector<4x96xf32>
    %428 = vector.broadcast %28 : vector<1x96xf32> to vector<4x96xf32>
    %429 = arith.addf %427, %428 : vector<4x96xf32>
    %430 = arith.index_cast %422 : i32 to index
    %c0_124 = arith.constant 0 : index
    %c0_125 = arith.constant 0 : index
    %431 = vector.load %arg13[%430, %c0_124, %c0_125] : memref<8x4x96xf32, #tpu.memory_space<vmem>>, vector<1x4x96xf32>
    %432 = vector.shape_cast %431 : vector<1x4x96xf32> to vector<4x96xf32>
    %433 = vector.extract_strided_slice %432 {offsets = [0, 0], sizes = [4, 32], strides = [1, 1]} : vector<4x96xf32> to vector<4x32xf32>
    %434 = vector.extract_strided_slice %429 {offsets = [0, 0], sizes = [4, 32], strides = [1, 1]} : vector<4x96xf32> to vector<4x32xf32>
    %435 = arith.addf %433, %434 : vector<4x32xf32>
    %436 = arith.negf %435 : vector<4x32xf32>
    %437 = math.exp %436 : vector<4x32xf32>
    %cst_126 = arith.constant 1.000000e+00 : f32
    %438 = vector.broadcast %cst_126 : f32 to vector<4x32xf32>
    %439 = arith.addf %438, %437 : vector<4x32xf32>
    %440 = arith.divf %438, %439 : vector<4x32xf32>
    %441 = vector.extract_strided_slice %432 {offsets = [0, 32], sizes = [4, 32], strides = [1, 1]} : vector<4x96xf32> to vector<4x32xf32>
    %442 = vector.extract_strided_slice %429 {offsets = [0, 32], sizes = [4, 32], strides = [1, 1]} : vector<4x96xf32> to vector<4x32xf32>
    %443 = arith.addf %441, %442 : vector<4x32xf32>
    %444 = arith.negf %443 : vector<4x32xf32>
    %445 = math.exp %444 : vector<4x32xf32>
    %cst_127 = arith.constant 1.000000e+00 : f32
    %446 = vector.broadcast %cst_127 : f32 to vector<4x32xf32>
    %447 = arith.addf %446, %445 : vector<4x32xf32>
    %448 = arith.divf %446, %447 : vector<4x32xf32>
    %449 = vector.extract_strided_slice %432 {offsets = [0, 64], sizes = [4, 32], strides = [1, 1]} : vector<4x96xf32> to vector<4x32xf32>
    %450 = vector.extract_strided_slice %429 {offsets = [0, 64], sizes = [4, 32], strides = [1, 1]} : vector<4x96xf32> to vector<4x32xf32>
    %451 = arith.mulf %440, %450 : vector<4x32xf32>
    %452 = arith.addf %449, %451 : vector<4x32xf32>
    %453 = math.tanh %452 : vector<4x32xf32>
    %cst_128 = arith.constant 1.000000e+00 : f32
    %454 = vector.broadcast %cst_128 : f32 to vector<4x32xf32>
    %455 = arith.subf %454, %448 : vector<4x32xf32>
    %456 = arith.mulf %455, %453 : vector<4x32xf32>
    %457 = arith.mulf %448, %29 : vector<4x32xf32>
    %458 = arith.addf %456, %457 : vector<4x32xf32>
    %459 = vector.broadcast %425 : vector<4x1xf32> to vector<4x32xf32>
    %460 = arith.mulf %459, %458 : vector<4x32xf32>
    %cst_129 = arith.constant 1.000000e+00 : f32
    %461 = vector.broadcast %cst_129 : f32 to vector<4x1xf32>
    %462 = arith.subf %461, %425 : vector<4x1xf32>
    %463 = vector.broadcast %462 : vector<4x1xf32> to vector<4x32xf32>
    %464 = arith.mulf %463, %29 : vector<4x32xf32>
    %465 = arith.addf %460, %464 : vector<4x32xf32>
    %466 = arith.index_cast %422 : i32 to index
    %c0_130 = arith.constant 0 : index
    %c0_131 = arith.constant 0 : index
    %467 = vector.load %arg11[%466, %c0_130, %c0_131] : memref<8x4x32xf32, #tpu.memory_space<vmem>>, vector<1x4x32xf32>
    %468 = vector.shape_cast %467 : vector<1x4x32xf32> to vector<4x32xf32>
    %469 = vector.broadcast %425 : vector<4x1xf32> to vector<4x32xf32>
    %470 = arith.mulf %469, %465 : vector<4x32xf32>
    %471 = arith.addf %468, %470 : vector<4x32xf32>
    %cst_132 = arith.constant 5.000000e-01 : f32
    %472 = vector.broadcast %cst_132 : f32 to vector<4x32xf32>
    %473 = arith.mulf %471, %472 : vector<4x32xf32>
    %474 = arith.index_cast %422 : i32 to index
    %c0_133 = arith.constant 0 : index
    %c0_134 = arith.constant 0 : index
    %475 = vector.load %arg11[%474, %c0_133, %c0_134] : memref<8x4x32xf32, #tpu.memory_space<vmem>>, vector<1x4x32xf32>
    %476 = vector.shape_cast %475 : vector<1x4x32xf32> to vector<4x32xf32>
    %477 = vector.shape_cast %473 : vector<4x32xf32> to vector<1x4x32xf32>
    tpu.vector_store %arg11[%474, %c0_133, %c0_134], %477 {strides = array<i32>} : memref<8x4x32xf32, #tpu.memory_space<vmem>>, vector<1x4x32xf32>,
    %c1_i32_135 = arith.constant 1 : i32
    %c7_i32_136 = arith.constant 7 : i32
    %478 = arith.subi %c7_i32_136, %c1_i32_135 : i32
    %479 = arith.index_cast %478 : i32 to index
    %c0_137 = arith.constant 0 : index
    %c0_138 = arith.constant 0 : index
    %480 = vector.load %arg14[%479, %c0_137, %c0_138] : memref<8x4x1xf32, #tpu.memory_space<vmem>>, vector<1x4x1xf32>
    %481 = vector.shape_cast %480 : vector<1x4x1xf32> to vector<4x1xf32>
    %482 = arith.truncf %465 : vector<4x32xf32> to vector<4x32xbf16>
    %cst_139 = arith.constant dense<0.000000e+00> : vector<4x96xf32>
    %483 = tpu.matmul %482, %26, %cst_139 {dimension_numbers = #tpu.dot_dimension_numbers<[1], [0], [0], [1], [0, 0, 1, 1], [], []>} : vector<4x32xbf16>, vector<32x96xbf16>, vector<4x96xf32> -> vector<4x96xf32>
    %484 = vector.broadcast %28 : vector<1x96xf32> to vector<4x96xf32>
    %485 = arith.addf %483, %484 : vector<4x96xf32>
    %486 = arith.index_cast %478 : i32 to index
    %c0_140 = arith.constant 0 : index
    %c0_141 = arith.constant 0 : index
    %487 = vector.load %arg13[%486, %c0_140, %c0_141] : memref<8x4x96xf32, #tpu.memory_space<vmem>>, vector<1x4x96xf32>
    %488 = vector.shape_cast %487 : vector<1x4x96xf32> to vector<4x96xf32>
    %489 = vector.extract_strided_slice %488 {offsets = [0, 0], sizes = [4, 32], strides = [1, 1]} : vector<4x96xf32> to vector<4x32xf32>
    %490 = vector.extract_strided_slice %485 {offsets = [0, 0], sizes = [4, 32], strides = [1, 1]} : vector<4x96xf32> to vector<4x32xf32>
    %491 = arith.addf %489, %490 : vector<4x32xf32>
    %492 = arith.negf %491 : vector<4x32xf32>
    %493 = math.exp %492 : vector<4x32xf32>
    %cst_142 = arith.constant 1.000000e+00 : f32
    %494 = vector.broadcast %cst_142 : f32 to vector<4x32xf32>
    %495 = arith.addf %494, %493 : vector<4x32xf32>
    %496 = arith.divf %494, %495 : vector<4x32xf32>
    %497 = vector.extract_strided_slice %488 {offsets = [0, 32], sizes = [4, 32], strides = [1, 1]} : vector<4x96xf32> to vector<4x32xf32>
    %498 = vector.extract_strided_slice %485 {offsets = [0, 32], sizes = [4, 32], strides = [1, 1]} : vector<4x96xf32> to vector<4x32xf32>
    %499 = arith.addf %497, %498 : vector<4x32xf32>
    %500 = arith.negf %499 : vector<4x32xf32>
    %501 = math.exp %500 : vector<4x32xf32>
    %cst_143 = arith.constant 1.000000e+00 : f32
    %502 = vector.broadcast %cst_143 : f32 to vector<4x32xf32>
    %503 = arith.addf %502, %501 : vector<4x32xf32>
    %504 = arith.divf %502, %503 : vector<4x32xf32>
    %505 = vector.extract_strided_slice %488 {offsets = [0, 64], sizes = [4, 32], strides = [1, 1]} : vector<4x96xf32> to vector<4x32xf32>
    %506 = vector.extract_strided_slice %485 {offsets = [0, 64], sizes = [4, 32], strides = [1, 1]} : vector<4x96xf32> to vector<4x32xf32>
    %507 = arith.mulf %496, %506 : vector<4x32xf32>
    %508 = arith.addf %505, %507 : vector<4x32xf32>
    %509 = math.tanh %508 : vector<4x32xf32>
    %cst_144 = arith.constant 1.000000e+00 : f32
    %510 = vector.broadcast %cst_144 : f32 to vector<4x32xf32>
    %511 = arith.subf %510, %504 : vector<4x32xf32>
    %512 = arith.mulf %511, %509 : vector<4x32xf32>
    %513 = arith.mulf %504, %465 : vector<4x32xf32>
    %514 = arith.addf %512, %513 : vector<4x32xf32>
    %515 = vector.broadcast %481 : vector<4x1xf32> to vector<4x32xf32>
    %516 = arith.mulf %515, %514 : vector<4x32xf32>
    %cst_145 = arith.constant 1.000000e+00 : f32
    %517 = vector.broadcast %cst_145 : f32 to vector<4x1xf32>
    %518 = arith.subf %517, %481 : vector<4x1xf32>
    %519 = vector.broadcast %518 : vector<4x1xf32> to vector<4x32xf32>
    %520 = arith.mulf %519, %465 : vector<4x32xf32>
    %521 = arith.addf %516, %520 : vector<4x32xf32>
    %522 = arith.index_cast %478 : i32 to index
    %c0_146 = arith.constant 0 : index
    %c0_147 = arith.constant 0 : index
    %523 = vector.load %arg11[%522, %c0_146, %c0_147] : memref<8x4x32xf32, #tpu.memory_space<vmem>>, vector<1x4x32xf32>
    %524 = vector.shape_cast %523 : vector<1x4x32xf32> to vector<4x32xf32>
    %525 = vector.broadcast %481 : vector<4x1xf32> to vector<4x32xf32>
    %526 = arith.mulf %525, %521 : vector<4x32xf32>
    %527 = arith.addf %524, %526 : vector<4x32xf32>
    %cst_148 = arith.constant 5.000000e-01 : f32
    %528 = vector.broadcast %cst_148 : f32 to vector<4x32xf32>
    %529 = arith.mulf %527, %528 : vector<4x32xf32>
    %530 = arith.index_cast %478 : i32 to index
    %c0_149 = arith.constant 0 : index
    %c0_150 = arith.constant 0 : index
    %531 = vector.load %arg11[%530, %c0_149, %c0_150] : memref<8x4x32xf32, #tpu.memory_space<vmem>>, vector<1x4x32xf32>
    %532 = vector.shape_cast %531 : vector<1x4x32xf32> to vector<4x32xf32>
    %533 = vector.shape_cast %529 : vector<4x32xf32> to vector<1x4x32xf32>
    tpu.vector_store %arg11[%530, %c0_149, %c0_150], %533 {strides = array<i32>} : memref<8x4x32xf32, #tpu.memory_space<vmem>>, vector<1x4x32xf32>,
    %c2_i32_151 = arith.constant 2 : i32
    %c7_i32_152 = arith.constant 7 : i32
    %534 = arith.subi %c7_i32_152, %c2_i32_151 : i32
    %535 = arith.index_cast %534 : i32 to index
    %c0_153 = arith.constant 0 : index
    %c0_154 = arith.constant 0 : index
    %536 = vector.load %arg14[%535, %c0_153, %c0_154] : memref<8x4x1xf32, #tpu.memory_space<vmem>>, vector<1x4x1xf32>
    %537 = vector.shape_cast %536 : vector<1x4x1xf32> to vector<4x1xf32>
    %538 = arith.truncf %521 : vector<4x32xf32> to vector<4x32xbf16>
    %cst_155 = arith.constant dense<0.000000e+00> : vector<4x96xf32>
    %539 = tpu.matmul %538, %26, %cst_155 {dimension_numbers = #tpu.dot_dimension_numbers<[1], [0], [0], [1], [0, 0, 1, 1], [], []>} : vector<4x32xbf16>, vector<32x96xbf16>, vector<4x96xf32> -> vector<4x96xf32>
    %540 = vector.broadcast %28 : vector<1x96xf32> to vector<4x96xf32>
    %541 = arith.addf %539, %540 : vector<4x96xf32>
    %542 = arith.index_cast %534 : i32 to index
    %c0_156 = arith.constant 0 : index
    %c0_157 = arith.constant 0 : index
    %543 = vector.load %arg13[%542, %c0_156, %c0_157] : memref<8x4x96xf32, #tpu.memory_space<vmem>>, vector<1x4x96xf32>
    %544 = vector.shape_cast %543 : vector<1x4x96xf32> to vector<4x96xf32>
    %545 = vector.extract_strided_slice %544 {offsets = [0, 0], sizes = [4, 32], strides = [1, 1]} : vector<4x96xf32> to vector<4x32xf32>
    %546 = vector.extract_strided_slice %541 {offsets = [0, 0], sizes = [4, 32], strides = [1, 1]} : vector<4x96xf32> to vector<4x32xf32>
    %547 = arith.addf %545, %546 : vector<4x32xf32>
    %548 = arith.negf %547 : vector<4x32xf32>
    %549 = math.exp %548 : vector<4x32xf32>
    %cst_158 = arith.constant 1.000000e+00 : f32
    %550 = vector.broadcast %cst_158 : f32 to vector<4x32xf32>
    %551 = arith.addf %550, %549 : vector<4x32xf32>
    %552 = arith.divf %550, %551 : vector<4x32xf32>
    %553 = vector.extract_strided_slice %544 {offsets = [0, 32], sizes = [4, 32], strides = [1, 1]} : vector<4x96xf32> to vector<4x32xf32>
    %554 = vector.extract_strided_slice %541 {offsets = [0, 32], sizes = [4, 32], strides = [1, 1]} : vector<4x96xf32> to vector<4x32xf32>
    %555 = arith.addf %553, %554 : vector<4x32xf32>
    %556 = arith.negf %555 : vector<4x32xf32>
    %557 = math.exp %556 : vector<4x32xf32>
    %cst_159 = arith.constant 1.000000e+00 : f32
    %558 = vector.broadcast %cst_159 : f32 to vector<4x32xf32>
    %559 = arith.addf %558, %557 : vector<4x32xf32>
    %560 = arith.divf %558, %559 : vector<4x32xf32>
    %561 = vector.extract_strided_slice %544 {offsets = [0, 64], sizes = [4, 32], strides = [1, 1]} : vector<4x96xf32> to vector<4x32xf32>
    %562 = vector.extract_strided_slice %541 {offsets = [0, 64], sizes = [4, 32], strides = [1, 1]} : vector<4x96xf32> to vector<4x32xf32>
    %563 = arith.mulf %552, %562 : vector<4x32xf32>
    %564 = arith.addf %561, %563 : vector<4x32xf32>
    %565 = math.tanh %564 : vector<4x32xf32>
    %cst_160 = arith.constant 1.000000e+00 : f32
    %566 = vector.broadcast %cst_160 : f32 to vector<4x32xf32>
    %567 = arith.subf %566, %560 : vector<4x32xf32>
    %568 = arith.mulf %567, %565 : vector<4x32xf32>
    %569 = arith.mulf %560, %521 : vector<4x32xf32>
    %570 = arith.addf %568, %569 : vector<4x32xf32>
    %571 = vector.broadcast %537 : vector<4x1xf32> to vector<4x32xf32>
    %572 = arith.mulf %571, %570 : vector<4x32xf32>
    %cst_161 = arith.constant 1.000000e+00 : f32
    %573 = vector.broadcast %cst_161 : f32 to vector<4x1xf32>
    %574 = arith.subf %573, %537 : vector<4x1xf32>
    %575 = vector.broadcast %574 : vector<4x1xf32> to vector<4x32xf32>
    %576 = arith.mulf %575, %521 : vector<4x32xf32>
    %577 = arith.addf %572, %576 : vector<4x32xf32>
    %578 = arith.index_cast %534 : i32 to index
    %c0_162 = arith.constant 0 : index
    %c0_163 = arith.constant 0 : index
    %579 = vector.load %arg11[%578, %c0_162, %c0_163] : memref<8x4x32xf32, #tpu.memory_space<vmem>>, vector<1x4x32xf32>
    %580 = vector.shape_cast %579 : vector<1x4x32xf32> to vector<4x32xf32>
    %581 = vector.broadcast %537 : vector<4x1xf32> to vector<4x32xf32>
    %582 = arith.mulf %581, %577 : vector<4x32xf32>
    %583 = arith.addf %580, %582 : vector<4x32xf32>
    %cst_164 = arith.constant 5.000000e-01 : f32
    %584 = vector.broadcast %cst_164 : f32 to vector<4x32xf32>
    %585 = arith.mulf %583, %584 : vector<4x32xf32>
    %586 = arith.index_cast %534 : i32 to index
    %c0_165 = arith.constant 0 : index
    %c0_166 = arith.constant 0 : index
    %587 = vector.load %arg11[%586, %c0_165, %c0_166] : memref<8x4x32xf32, #tpu.memory_space<vmem>>, vector<1x4x32xf32>
    %588 = vector.shape_cast %587 : vector<1x4x32xf32> to vector<4x32xf32>
    %589 = vector.shape_cast %585 : vector<4x32xf32> to vector<1x4x32xf32>
    tpu.vector_store %arg11[%586, %c0_165, %c0_166], %589 {strides = array<i32>} : memref<8x4x32xf32, #tpu.memory_space<vmem>>, vector<1x4x32xf32>,
    %c3_i32_167 = arith.constant 3 : i32
    %c7_i32_168 = arith.constant 7 : i32
    %590 = arith.subi %c7_i32_168, %c3_i32_167 : i32
    %591 = arith.index_cast %590 : i32 to index
    %c0_169 = arith.constant 0 : index
    %c0_170 = arith.constant 0 : index
    %592 = vector.load %arg14[%591, %c0_169, %c0_170] : memref<8x4x1xf32, #tpu.memory_space<vmem>>, vector<1x4x1xf32>
    %593 = vector.shape_cast %592 : vector<1x4x1xf32> to vector<4x1xf32>
    %594 = arith.truncf %577 : vector<4x32xf32> to vector<4x32xbf16>
    %cst_171 = arith.constant dense<0.000000e+00> : vector<4x96xf32>
    %595 = tpu.matmul %594, %26, %cst_171 {dimension_numbers = #tpu.dot_dimension_numbers<[1], [0], [0], [1], [0, 0, 1, 1], [], []>} : vector<4x32xbf16>, vector<32x96xbf16>, vector<4x96xf32> -> vector<4x96xf32>
    %596 = vector.broadcast %28 : vector<1x96xf32> to vector<4x96xf32>
    %597 = arith.addf %595, %596 : vector<4x96xf32>
    %598 = arith.index_cast %590 : i32 to index
    %c0_172 = arith.constant 0 : index
    %c0_173 = arith.constant 0 : index
    %599 = vector.load %arg13[%598, %c0_172, %c0_173] : memref<8x4x96xf32, #tpu.memory_space<vmem>>, vector<1x4x96xf32>
    %600 = vector.shape_cast %599 : vector<1x4x96xf32> to vector<4x96xf32>
    %601 = vector.extract_strided_slice %600 {offsets = [0, 0], sizes = [4, 32], strides = [1, 1]} : vector<4x96xf32> to vector<4x32xf32>
    %602 = vector.extract_strided_slice %597 {offsets = [0, 0], sizes = [4, 32], strides = [1, 1]} : vector<4x96xf32> to vector<4x32xf32>
    %603 = arith.addf %601, %602 : vector<4x32xf32>
    %604 = arith.negf %603 : vector<4x32xf32>
    %605 = math.exp %604 : vector<4x32xf32>
    %cst_174 = arith.constant 1.000000e+00 : f32
    %606 = vector.broadcast %cst_174 : f32 to vector<4x32xf32>
    %607 = arith.addf %606, %605 : vector<4x32xf32>
    %608 = arith.divf %606, %607 : vector<4x32xf32>
    %609 = vector.extract_strided_slice %600 {offsets = [0, 32], sizes = [4, 32], strides = [1, 1]} : vector<4x96xf32> to vector<4x32xf32>
    %610 = vector.extract_strided_slice %597 {offsets = [0, 32], sizes = [4, 32], strides = [1, 1]} : vector<4x96xf32> to vector<4x32xf32>
    %611 = arith.addf %609, %610 : vector<4x32xf32>
    %612 = arith.negf %611 : vector<4x32xf32>
    %613 = math.exp %612 : vector<4x32xf32>
    %cst_175 = arith.constant 1.000000e+00 : f32
    %614 = vector.broadcast %cst_175 : f32 to vector<4x32xf32>
    %615 = arith.addf %614, %613 : vector<4x32xf32>
    %616 = arith.divf %614, %615 : vector<4x32xf32>
    %617 = vector.extract_strided_slice %600 {offsets = [0, 64], sizes = [4, 32], strides = [1, 1]} : vector<4x96xf32> to vector<4x32xf32>
    %618 = vector.extract_strided_slice %597 {offsets = [0, 64], sizes = [4, 32], strides = [1, 1]} : vector<4x96xf32> to vector<4x32xf32>
    %619 = arith.mulf %608, %618 : vector<4x32xf32>
    %620 = arith.addf %617, %619 : vector<4x32xf32>
    %621 = math.tanh %620 : vector<4x32xf32>
    %cst_176 = arith.constant 1.000000e+00 : f32
    %622 = vector.broadcast %cst_176 : f32 to vector<4x32xf32>
    %623 = arith.subf %622, %616 : vector<4x32xf32>
    %624 = arith.mulf %623, %621 : vector<4x32xf32>
    %625 = arith.mulf %616, %577 : vector<4x32xf32>
    %626 = arith.addf %624, %625 : vector<4x32xf32>
    %627 = vector.broadcast %593 : vector<4x1xf32> to vector<4x32xf32>
    %628 = arith.mulf %627, %626 : vector<4x32xf32>
    %cst_177 = arith.constant 1.000000e+00 : f32
    %629 = vector.broadcast %cst_177 : f32 to vector<4x1xf32>
    %630 = arith.subf %629, %593 : vector<4x1xf32>
    %631 = vector.broadcast %630 : vector<4x1xf32> to vector<4x32xf32>
    %632 = arith.mulf %631, %577 : vector<4x32xf32>
    %633 = arith.addf %628, %632 : vector<4x32xf32>
    %634 = arith.index_cast %590 : i32 to index
    %c0_178 = arith.constant 0 : index
    %c0_179 = arith.constant 0 : index
    %635 = vector.load %arg11[%634, %c0_178, %c0_179] : memref<8x4x32xf32, #tpu.memory_space<vmem>>, vector<1x4x32xf32>
    %636 = vector.shape_cast %635 : vector<1x4x32xf32> to vector<4x32xf32>
    %637 = vector.broadcast %593 : vector<4x1xf32> to vector<4x32xf32>
    %638 = arith.mulf %637, %633 : vector<4x32xf32>
    %639 = arith.addf %636, %638 : vector<4x32xf32>
    %cst_180 = arith.constant 5.000000e-01 : f32
    %640 = vector.broadcast %cst_180 : f32 to vector<4x32xf32>
    %641 = arith.mulf %639, %640 : vector<4x32xf32>
    %642 = arith.index_cast %590 : i32 to index
    %c0_181 = arith.constant 0 : index
    %c0_182 = arith.constant 0 : index
    %643 = vector.load %arg11[%642, %c0_181, %c0_182] : memref<8x4x32xf32, #tpu.memory_space<vmem>>, vector<1x4x32xf32>
    %644 = vector.shape_cast %643 : vector<1x4x32xf32> to vector<4x32xf32>
    %645 = vector.shape_cast %641 : vector<4x32xf32> to vector<1x4x32xf32>
    tpu.vector_store %arg11[%642, %c0_181, %c0_182], %645 {strides = array<i32>} : memref<8x4x32xf32, #tpu.memory_space<vmem>>, vector<1x4x32xf32>,
    %c4_i32_183 = arith.constant 4 : i32
    %c7_i32_184 = arith.constant 7 : i32
    %646 = arith.subi %c7_i32_184, %c4_i32_183 : i32
    %647 = arith.index_cast %646 : i32 to index
    %c0_185 = arith.constant 0 : index
    %c0_186 = arith.constant 0 : index
    %648 = vector.load %arg14[%647, %c0_185, %c0_186] : memref<8x4x1xf32, #tpu.memory_space<vmem>>, vector<1x4x1xf32>
    %649 = vector.shape_cast %648 : vector<1x4x1xf32> to vector<4x1xf32>
    %650 = arith.truncf %633 : vector<4x32xf32> to vector<4x32xbf16>
    %cst_187 = arith.constant dense<0.000000e+00> : vector<4x96xf32>
    %651 = tpu.matmul %650, %26, %cst_187 {dimension_numbers = #tpu.dot_dimension_numbers<[1], [0], [0], [1], [0, 0, 1, 1], [], []>} : vector<4x32xbf16>, vector<32x96xbf16>, vector<4x96xf32> -> vector<4x96xf32>
    %652 = vector.broadcast %28 : vector<1x96xf32> to vector<4x96xf32>
    %653 = arith.addf %651, %652 : vector<4x96xf32>
    %654 = arith.index_cast %646 : i32 to index
    %c0_188 = arith.constant 0 : index
    %c0_189 = arith.constant 0 : index
    %655 = vector.load %arg13[%654, %c0_188, %c0_189] : memref<8x4x96xf32, #tpu.memory_space<vmem>>, vector<1x4x96xf32>
    %656 = vector.shape_cast %655 : vector<1x4x96xf32> to vector<4x96xf32>
    %657 = vector.extract_strided_slice %656 {offsets = [0, 0], sizes = [4, 32], strides = [1, 1]} : vector<4x96xf32> to vector<4x32xf32>
    %658 = vector.extract_strided_slice %653 {offsets = [0, 0], sizes = [4, 32], strides = [1, 1]} : vector<4x96xf32> to vector<4x32xf32>
    %659 = arith.addf %657, %658 : vector<4x32xf32>
    %660 = arith.negf %659 : vector<4x32xf32>
    %661 = math.exp %660 : vector<4x32xf32>
    %cst_190 = arith.constant 1.000000e+00 : f32
    %662 = vector.broadcast %cst_190 : f32 to vector<4x32xf32>
    %663 = arith.addf %662, %661 : vector<4x32xf32>
    %664 = arith.divf %662, %663 : vector<4x32xf32>
    %665 = vector.extract_strided_slice %656 {offsets = [0, 32], sizes = [4, 32], strides = [1, 1]} : vector<4x96xf32> to vector<4x32xf32>
    %666 = vector.extract_strided_slice %653 {offsets = [0, 32], sizes = [4, 32], strides = [1, 1]} : vector<4x96xf32> to vector<4x32xf32>
    %667 = arith.addf %665, %666 : vector<4x32xf32>
    %668 = arith.negf %667 : vector<4x32xf32>
    %669 = math.exp %668 : vector<4x32xf32>
    %cst_191 = arith.constant 1.000000e+00 : f32
    %670 = vector.broadcast %cst_191 : f32 to vector<4x32xf32>
    %671 = arith.addf %670, %669 : vector<4x32xf32>
    %672 = arith.divf %670, %671 : vector<4x32xf32>
    %673 = vector.extract_strided_slice %656 {offsets = [0, 64], sizes = [4, 32], strides = [1, 1]} : vector<4x96xf32> to vector<4x32xf32>
    %674 = vector.extract_strided_slice %653 {offsets = [0, 64], sizes = [4, 32], strides = [1, 1]} : vector<4x96xf32> to vector<4x32xf32>
    %675 = arith.mulf %664, %674 : vector<4x32xf32>
    %676 = arith.addf %673, %675 : vector<4x32xf32>
    %677 = math.tanh %676 : vector<4x32xf32>
    %cst_192 = arith.constant 1.000000e+00 : f32
    %678 = vector.broadcast %cst_192 : f32 to vector<4x32xf32>
    %679 = arith.subf %678, %672 : vector<4x32xf32>
    %680 = arith.mulf %679, %677 : vector<4x32xf32>
    %681 = arith.mulf %672, %633 : vector<4x32xf32>
    %682 = arith.addf %680, %681 : vector<4x32xf32>
    %683 = vector.broadcast %649 : vector<4x1xf32> to vector<4x32xf32>
    %684 = arith.mulf %683, %682 : vector<4x32xf32>
    %cst_193 = arith.constant 1.000000e+00 : f32
    %685 = vector.broadcast %cst_193 : f32 to vector<4x1xf32>
    %686 = arith.subf %685, %649 : vector<4x1xf32>
    %687 = vector.broadcast %686 : vector<4x1xf32> to vector<4x32xf32>
    %688 = arith.mulf %687, %633 : vector<4x32xf32>
    %689 = arith.addf %684, %688 : vector<4x32xf32>
    %690 = arith.index_cast %646 : i32 to index
    %c0_194 = arith.constant 0 : index
    %c0_195 = arith.constant 0 : index
    %691 = vector.load %arg11[%690, %c0_194, %c0_195] : memref<8x4x32xf32, #tpu.memory_space<vmem>>, vector<1x4x32xf32>
    %692 = vector.shape_cast %691 : vector<1x4x32xf32> to vector<4x32xf32>
    %693 = vector.broadcast %649 : vector<4x1xf32> to vector<4x32xf32>
    %694 = arith.mulf %693, %689 : vector<4x32xf32>
    %695 = arith.addf %692, %694 : vector<4x32xf32>
    %cst_196 = arith.constant 5.000000e-01 : f32
    %696 = vector.broadcast %cst_196 : f32 to vector<4x32xf32>
    %697 = arith.mulf %695, %696 : vector<4x32xf32>
    %698 = arith.index_cast %646 : i32 to index
    %c0_197 = arith.constant 0 : index
    %c0_198 = arith.constant 0 : index
    %699 = vector.load %arg11[%698, %c0_197, %c0_198] : memref<8x4x32xf32, #tpu.memory_space<vmem>>, vector<1x4x32xf32>
    %700 = vector.shape_cast %699 : vector<1x4x32xf32> to vector<4x32xf32>
    %701 = vector.shape_cast %697 : vector<4x32xf32> to vector<1x4x32xf32>
    tpu.vector_store %arg11[%698, %c0_197, %c0_198], %701 {strides = array<i32>} : memref<8x4x32xf32, #tpu.memory_space<vmem>>, vector<1x4x32xf32>,
    %c5_i32_199 = arith.constant 5 : i32
    %c7_i32_200 = arith.constant 7 : i32
    %702 = arith.subi %c7_i32_200, %c5_i32_199 : i32
    %703 = arith.index_cast %702 : i32 to index
    %c0_201 = arith.constant 0 : index
    %c0_202 = arith.constant 0 : index
    %704 = vector.load %arg14[%703, %c0_201, %c0_202] : memref<8x4x1xf32, #tpu.memory_space<vmem>>, vector<1x4x1xf32>
    %705 = vector.shape_cast %704 : vector<1x4x1xf32> to vector<4x1xf32>
    %706 = arith.truncf %689 : vector<4x32xf32> to vector<4x32xbf16>
    %cst_203 = arith.constant dense<0.000000e+00> : vector<4x96xf32>
    %707 = tpu.matmul %706, %26, %cst_203 {dimension_numbers = #tpu.dot_dimension_numbers<[1], [0], [0], [1], [0, 0, 1, 1], [], []>} : vector<4x32xbf16>, vector<32x96xbf16>, vector<4x96xf32> -> vector<4x96xf32>
    %708 = vector.broadcast %28 : vector<1x96xf32> to vector<4x96xf32>
    %709 = arith.addf %707, %708 : vector<4x96xf32>
    %710 = arith.index_cast %702 : i32 to index
    %c0_204 = arith.constant 0 : index
    %c0_205 = arith.constant 0 : index
    %711 = vector.load %arg13[%710, %c0_204, %c0_205] : memref<8x4x96xf32, #tpu.memory_space<vmem>>, vector<1x4x96xf32>
    %712 = vector.shape_cast %711 : vector<1x4x96xf32> to vector<4x96xf32>
    %713 = vector.extract_strided_slice %712 {offsets = [0, 0], sizes = [4, 32], strides = [1, 1]} : vector<4x96xf32> to vector<4x32xf32>
    %714 = vector.extract_strided_slice %709 {offsets = [0, 0], sizes = [4, 32], strides = [1, 1]} : vector<4x96xf32> to vector<4x32xf32>
    %715 = arith.addf %713, %714 : vector<4x32xf32>
    %716 = arith.negf %715 : vector<4x32xf32>
    %717 = math.exp %716 : vector<4x32xf32>
    %cst_206 = arith.constant 1.000000e+00 : f32
    %718 = vector.broadcast %cst_206 : f32 to vector<4x32xf32>
    %719 = arith.addf %718, %717 : vector<4x32xf32>
    %720 = arith.divf %718, %719 : vector<4x32xf32>
    %721 = vector.extract_strided_slice %712 {offsets = [0, 32], sizes = [4, 32], strides = [1, 1]} : vector<4x96xf32> to vector<4x32xf32>
    %722 = vector.extract_strided_slice %709 {offsets = [0, 32], sizes = [4, 32], strides = [1, 1]} : vector<4x96xf32> to vector<4x32xf32>
    %723 = arith.addf %721, %722 : vector<4x32xf32>
    %724 = arith.negf %723 : vector<4x32xf32>
    %725 = math.exp %724 : vector<4x32xf32>
    %cst_207 = arith.constant 1.000000e+00 : f32
    %726 = vector.broadcast %cst_207 : f32 to vector<4x32xf32>
    %727 = arith.addf %726, %725 : vector<4x32xf32>
    %728 = arith.divf %726, %727 : vector<4x32xf32>
    %729 = vector.extract_strided_slice %712 {offsets = [0, 64], sizes = [4, 32], strides = [1, 1]} : vector<4x96xf32> to vector<4x32xf32>
    %730 = vector.extract_strided_slice %709 {offsets = [0, 64], sizes = [4, 32], strides = [1, 1]} : vector<4x96xf32> to vector<4x32xf32>
    %731 = arith.mulf %720, %730 : vector<4x32xf32>
    %732 = arith.addf %729, %731 : vector<4x32xf32>
    %733 = math.tanh %732 : vector<4x32xf32>
    %cst_208 = arith.constant 1.000000e+00 : f32
    %734 = vector.broadcast %cst_208 : f32 to vector<4x32xf32>
    %735 = arith.subf %734, %728 : vector<4x32xf32>
    %736 = arith.mulf %735, %733 : vector<4x32xf32>
    %737 = arith.mulf %728, %689 : vector<4x32xf32>
    %738 = arith.addf %736, %737 : vector<4x32xf32>
    %739 = vector.broadcast %705 : vector<4x1xf32> to vector<4x32xf32>
    %740 = arith.mulf %739, %738 : vector<4x32xf32>
    %cst_209 = arith.constant 1.000000e+00 : f32
    %741 = vector.broadcast %cst_209 : f32 to vector<4x1xf32>
    %742 = arith.subf %741, %705 : vector<4x1xf32>
    %743 = vector.broadcast %742 : vector<4x1xf32> to vector<4x32xf32>
    %744 = arith.mulf %743, %689 : vector<4x32xf32>
    %745 = arith.addf %740, %744 : vector<4x32xf32>
    %746 = arith.index_cast %702 : i32 to index
    %c0_210 = arith.constant 0 : index
    %c0_211 = arith.constant 0 : index
    %747 = vector.load %arg11[%746, %c0_210, %c0_211] : memref<8x4x32xf32, #tpu.memory_space<vmem>>, vector<1x4x32xf32>
    %748 = vector.shape_cast %747 : vector<1x4x32xf32> to vector<4x32xf32>
    %749 = vector.broadcast %705 : vector<4x1xf32> to vector<4x32xf32>
    %750 = arith.mulf %749, %745 : vector<4x32xf32>
    %751 = arith.addf %748, %750 : vector<4x32xf32>
    %cst_212 = arith.constant 5.000000e-01 : f32
    %752 = vector.broadcast %cst_212 : f32 to vector<4x32xf32>
    %753 = arith.mulf %751, %752 : vector<4x32xf32>
    %754 = arith.index_cast %702 : i32 to index
    %c0_213 = arith.constant 0 : index
    %c0_214 = arith.constant 0 : index
    %755 = vector.load %arg11[%754, %c0_213, %c0_214] : memref<8x4x32xf32, #tpu.memory_space<vmem>>, vector<1x4x32xf32>
    %756 = vector.shape_cast %755 : vector<1x4x32xf32> to vector<4x32xf32>
    %757 = vector.shape_cast %753 : vector<4x32xf32> to vector<1x4x32xf32>
    tpu.vector_store %arg11[%754, %c0_213, %c0_214], %757 {strides = array<i32>} : memref<8x4x32xf32, #tpu.memory_space<vmem>>, vector<1x4x32xf32>,
    %c6_i32_215 = arith.constant 6 : i32
    %c7_i32_216 = arith.constant 7 : i32
    %758 = arith.subi %c7_i32_216, %c6_i32_215 : i32
    %759 = arith.index_cast %758 : i32 to index
    %c0_217 = arith.constant 0 : index
    %c0_218 = arith.constant 0 : index
    %760 = vector.load %arg14[%759, %c0_217, %c0_218] : memref<8x4x1xf32, #tpu.memory_space<vmem>>, vector<1x4x1xf32>
    %761 = vector.shape_cast %760 : vector<1x4x1xf32> to vector<4x1xf32>
    %762 = arith.truncf %745 : vector<4x32xf32> to vector<4x32xbf16>
    %cst_219 = arith.constant dense<0.000000e+00> : vector<4x96xf32>
    %763 = tpu.matmul %762, %26, %cst_219 {dimension_numbers = #tpu.dot_dimension_numbers<[1], [0], [0], [1], [0, 0, 1, 1], [], []>} : vector<4x32xbf16>, vector<32x96xbf16>, vector<4x96xf32> -> vector<4x96xf32>
    %764 = vector.broadcast %28 : vector<1x96xf32> to vector<4x96xf32>
    %765 = arith.addf %763, %764 : vector<4x96xf32>
    %766 = arith.index_cast %758 : i32 to index
    %c0_220 = arith.constant 0 : index
    %c0_221 = arith.constant 0 : index
    %767 = vector.load %arg13[%766, %c0_220, %c0_221] : memref<8x4x96xf32, #tpu.memory_space<vmem>>, vector<1x4x96xf32>
    %768 = vector.shape_cast %767 : vector<1x4x96xf32> to vector<4x96xf32>
    %769 = vector.extract_strided_slice %768 {offsets = [0, 0], sizes = [4, 32], strides = [1, 1]} : vector<4x96xf32> to vector<4x32xf32>
    %770 = vector.extract_strided_slice %765 {offsets = [0, 0], sizes = [4, 32], strides = [1, 1]} : vector<4x96xf32> to vector<4x32xf32>
    %771 = arith.addf %769, %770 : vector<4x32xf32>
    %772 = arith.negf %771 : vector<4x32xf32>
    %773 = math.exp %772 : vector<4x32xf32>
    %cst_222 = arith.constant 1.000000e+00 : f32
    %774 = vector.broadcast %cst_222 : f32 to vector<4x32xf32>
    %775 = arith.addf %774, %773 : vector<4x32xf32>
    %776 = arith.divf %774, %775 : vector<4x32xf32>
    %777 = vector.extract_strided_slice %768 {offsets = [0, 32], sizes = [4, 32], strides = [1, 1]} : vector<4x96xf32> to vector<4x32xf32>
    %778 = vector.extract_strided_slice %765 {offsets = [0, 32], sizes = [4, 32], strides = [1, 1]} : vector<4x96xf32> to vector<4x32xf32>
    %779 = arith.addf %777, %778 : vector<4x32xf32>
    %780 = arith.negf %779 : vector<4x32xf32>
    %781 = math.exp %780 : vector<4x32xf32>
    %cst_223 = arith.constant 1.000000e+00 : f32
    %782 = vector.broadcast %cst_223 : f32 to vector<4x32xf32>
    %783 = arith.addf %782, %781 : vector<4x32xf32>
    %784 = arith.divf %782, %783 : vector<4x32xf32>
    %785 = vector.extract_strided_slice %768 {offsets = [0, 64], sizes = [4, 32], strides = [1, 1]} : vector<4x96xf32> to vector<4x32xf32>
    %786 = vector.extract_strided_slice %765 {offsets = [0, 64], sizes = [4, 32], strides = [1, 1]} : vector<4x96xf32> to vector<4x32xf32>
    %787 = arith.mulf %776, %786 : vector<4x32xf32>
    %788 = arith.addf %785, %787 : vector<4x32xf32>
    %789 = math.tanh %788 : vector<4x32xf32>
    %cst_224 = arith.constant 1.000000e+00 : f32
    %790 = vector.broadcast %cst_224 : f32 to vector<4x32xf32>
    %791 = arith.subf %790, %784 : vector<4x32xf32>
    %792 = arith.mulf %791, %789 : vector<4x32xf32>
    %793 = arith.mulf %784, %745 : vector<4x32xf32>
    %794 = arith.addf %792, %793 : vector<4x32xf32>
    %795 = vector.broadcast %761 : vector<4x1xf32> to vector<4x32xf32>
    %796 = arith.mulf %795, %794 : vector<4x32xf32>
    %cst_225 = arith.constant 1.000000e+00 : f32
    %797 = vector.broadcast %cst_225 : f32 to vector<4x1xf32>
    %798 = arith.subf %797, %761 : vector<4x1xf32>
    %799 = vector.broadcast %798 : vector<4x1xf32> to vector<4x32xf32>
    %800 = arith.mulf %799, %745 : vector<4x32xf32>
    %801 = arith.addf %796, %800 : vector<4x32xf32>
    %802 = arith.index_cast %758 : i32 to index
    %c0_226 = arith.constant 0 : index
    %c0_227 = arith.constant 0 : index
    %803 = vector.load %arg11[%802, %c0_226, %c0_227] : memref<8x4x32xf32, #tpu.memory_space<vmem>>, vector<1x4x32xf32>
    %804 = vector.shape_cast %803 : vector<1x4x32xf32> to vector<4x32xf32>
    %805 = vector.broadcast %761 : vector<4x1xf32> to vector<4x32xf32>
    %806 = arith.mulf %805, %801 : vector<4x32xf32>
    %807 = arith.addf %804, %806 : vector<4x32xf32>
    %cst_228 = arith.constant 5.000000e-01 : f32
    %808 = vector.broadcast %cst_228 : f32 to vector<4x32xf32>
    %809 = arith.mulf %807, %808 : vector<4x32xf32>
    %810 = arith.index_cast %758 : i32 to index
    %c0_229 = arith.constant 0 : index
    %c0_230 = arith.constant 0 : index
    %811 = vector.load %arg11[%810, %c0_229, %c0_230] : memref<8x4x32xf32, #tpu.memory_space<vmem>>, vector<1x4x32xf32>
    %812 = vector.shape_cast %811 : vector<1x4x32xf32> to vector<4x32xf32>
    %813 = vector.shape_cast %809 : vector<4x32xf32> to vector<1x4x32xf32>
    tpu.vector_store %arg11[%810, %c0_229, %c0_230], %813 {strides = array<i32>} : memref<8x4x32xf32, #tpu.memory_space<vmem>>, vector<1x4x32xf32>,
    %c7_i32_231 = arith.constant 7 : i32
    %c7_i32_232 = arith.constant 7 : i32
    %814 = arith.subi %c7_i32_232, %c7_i32_231 : i32
    %815 = arith.index_cast %814 : i32 to index
    %c0_233 = arith.constant 0 : index
    %c0_234 = arith.constant 0 : index
    %816 = vector.load %arg14[%815, %c0_233, %c0_234] : memref<8x4x1xf32, #tpu.memory_space<vmem>>, vector<1x4x1xf32>
    %817 = vector.shape_cast %816 : vector<1x4x1xf32> to vector<4x1xf32>
    %818 = arith.truncf %801 : vector<4x32xf32> to vector<4x32xbf16>
    %cst_235 = arith.constant dense<0.000000e+00> : vector<4x96xf32>
    %819 = tpu.matmul %818, %26, %cst_235 {dimension_numbers = #tpu.dot_dimension_numbers<[1], [0], [0], [1], [0, 0, 1, 1], [], []>} : vector<4x32xbf16>, vector<32x96xbf16>, vector<4x96xf32> -> vector<4x96xf32>
    %820 = vector.broadcast %28 : vector<1x96xf32> to vector<4x96xf32>
    %821 = arith.addf %819, %820 : vector<4x96xf32>
    %822 = arith.index_cast %814 : i32 to index
    %c0_236 = arith.constant 0 : index
    %c0_237 = arith.constant 0 : index
    %823 = vector.load %arg13[%822, %c0_236, %c0_237] : memref<8x4x96xf32, #tpu.memory_space<vmem>>, vector<1x4x96xf32>
    %824 = vector.shape_cast %823 : vector<1x4x96xf32> to vector<4x96xf32>
    %825 = vector.extract_strided_slice %824 {offsets = [0, 0], sizes = [4, 32], strides = [1, 1]} : vector<4x96xf32> to vector<4x32xf32>
    %826 = vector.extract_strided_slice %821 {offsets = [0, 0], sizes = [4, 32], strides = [1, 1]} : vector<4x96xf32> to vector<4x32xf32>
    %827 = arith.addf %825, %826 : vector<4x32xf32>
    %828 = arith.negf %827 : vector<4x32xf32>
    %829 = math.exp %828 : vector<4x32xf32>
    %cst_238 = arith.constant 1.000000e+00 : f32
    %830 = vector.broadcast %cst_238 : f32 to vector<4x32xf32>
    %831 = arith.addf %830, %829 : vector<4x32xf32>
    %832 = arith.divf %830, %831 : vector<4x32xf32>
    %833 = vector.extract_strided_slice %824 {offsets = [0, 32], sizes = [4, 32], strides = [1, 1]} : vector<4x96xf32> to vector<4x32xf32>
    %834 = vector.extract_strided_slice %821 {offsets = [0, 32], sizes = [4, 32], strides = [1, 1]} : vector<4x96xf32> to vector<4x32xf32>
    %835 = arith.addf %833, %834 : vector<4x32xf32>
    %836 = arith.negf %835 : vector<4x32xf32>
    %837 = math.exp %836 : vector<4x32xf32>
    %cst_239 = arith.constant 1.000000e+00 : f32
    %838 = vector.broadcast %cst_239 : f32 to vector<4x32xf32>
    %839 = arith.addf %838, %837 : vector<4x32xf32>
    %840 = arith.divf %838, %839 : vector<4x32xf32>
    %841 = vector.extract_strided_slice %824 {offsets = [0, 64], sizes = [4, 32], strides = [1, 1]} : vector<4x96xf32> to vector<4x32xf32>
    %842 = vector.extract_strided_slice %821 {offsets = [0, 64], sizes = [4, 32], strides = [1, 1]} : vector<4x96xf32> to vector<4x32xf32>
    %843 = arith.mulf %832, %842 : vector<4x32xf32>
    %844 = arith.addf %841, %843 : vector<4x32xf32>
    %845 = math.tanh %844 : vector<4x32xf32>
    %cst_240 = arith.constant 1.000000e+00 : f32
    %846 = vector.broadcast %cst_240 : f32 to vector<4x32xf32>
    %847 = arith.subf %846, %840 : vector<4x32xf32>
    %848 = arith.mulf %847, %845 : vector<4x32xf32>
    %849 = arith.mulf %840, %801 : vector<4x32xf32>
    %850 = arith.addf %848, %849 : vector<4x32xf32>
    %851 = vector.broadcast %817 : vector<4x1xf32> to vector<4x32xf32>
    %852 = arith.mulf %851, %850 : vector<4x32xf32>
    %cst_241 = arith.constant 1.000000e+00 : f32
    %853 = vector.broadcast %cst_241 : f32 to vector<4x1xf32>
    %854 = arith.subf %853, %817 : vector<4x1xf32>
    %855 = vector.broadcast %854 : vector<4x1xf32> to vector<4x32xf32>
    %856 = arith.mulf %855, %801 : vector<4x32xf32>
    %857 = arith.addf %852, %856 : vector<4x32xf32>
    %858 = arith.index_cast %814 : i32 to index
    %c0_242 = arith.constant 0 : index
    %c0_243 = arith.constant 0 : index
    %859 = vector.load %arg11[%858, %c0_242, %c0_243] : memref<8x4x32xf32, #tpu.memory_space<vmem>>, vector<1x4x32xf32>
    %860 = vector.shape_cast %859 : vector<1x4x32xf32> to vector<4x32xf32>
    %861 = vector.broadcast %817 : vector<4x1xf32> to vector<4x32xf32>
    %862 = arith.mulf %861, %857 : vector<4x32xf32>
    %863 = arith.addf %860, %862 : vector<4x32xf32>
    %cst_244 = arith.constant 5.000000e-01 : f32
    %864 = vector.broadcast %cst_244 : f32 to vector<4x32xf32>
    %865 = arith.mulf %863, %864 : vector<4x32xf32>
    %866 = arith.index_cast %814 : i32 to index
    %c0_245 = arith.constant 0 : index
    %c0_246 = arith.constant 0 : index
    %867 = vector.load %arg11[%866, %c0_245, %c0_246] : memref<8x4x32xf32, #tpu.memory_space<vmem>>, vector<1x4x32xf32>
    %868 = vector.shape_cast %867 : vector<1x4x32xf32> to vector<4x32xf32>
    %869 = vector.shape_cast %865 : vector<4x32xf32> to vector<1x4x32xf32>
    tpu.vector_store %arg11[%866, %c0_245, %c0_246], %869 {strides = array<i32>} : memref<8x4x32xf32, #tpu.memory_space<vmem>>, vector<1x4x32xf32>,
    %c8_i32_247 = arith.constant 8 : i32
    return
  }
  func.func @transform_0(%arg0: i32) -> (i32, i32, i32) {
    %c0_i32 = arith.constant 0 : i32
    %c0_i32_0 = arith.constant 0 : i32
    %c0_i32_1 = arith.constant 0 : i32
    return %c0_i32, %arg0, %c0_i32_0 : i32, i32, i32
  }
  func.func @transform_1(%arg0: i32) -> (i32, i32) {
    %c0_i32 = arith.constant 0 : i32
    %c0_i32_0 = arith.constant 0 : i32
    return %arg0, %c0_i32 : i32, i32
  }
  func.func @transform_2(%arg0: i32) -> (i32, i32) {
    %c0_i32 = arith.constant 0 : i32
    %c0_i32_0 = arith.constant 0 : i32
    %c0_i32_1 = arith.constant 0 : i32
    return %c0_i32, %c0_i32_0 : i32, i32
  }
  func.func @transform_3(%arg0: i32) -> (i32, i32) {
    %c0_i32 = arith.constant 0 : i32
    %c0_i32_0 = arith.constant 0 : i32
    %c0_i32_1 = arith.constant 0 : i32
    return %c0_i32, %c0_i32_0 : i32, i32
  }
  func.func @transform_4(%arg0: i32) -> (i32, i32) {
    %c0_i32 = arith.constant 0 : i32
    %c0_i32_0 = arith.constant 0 : i32
    %c0_i32_1 = arith.constant 0 : i32
    return %c0_i32, %c0_i32_0 : i32, i32
  }
  func.func @transform_5(%arg0: i32) -> (i32, i32) {
    %c0_i32 = arith.constant 0 : i32
    %c0_i32_0 = arith.constant 0 : i32
    %c0_i32_1 = arith.constant 0 : i32
    return %c0_i32, %c0_i32_0 : i32, i32
  }
  func.func @transform_6(%arg0: i32) -> (i32, i32) {
    %c0_i32 = arith.constant 0 : i32
    %c0_i32_0 = arith.constant 0 : i32
    %c0_i32_1 = arith.constant 0 : i32
    return %c0_i32, %c0_i32_0 : i32, i32
  }
  func.func @transform_7(%arg0: i32) -> (i32, i32) {
    %c0_i32 = arith.constant 0 : i32
    %c0_i32_0 = arith.constant 0 : i32
    %c0_i32_1 = arith.constant 0 : i32
    return %c0_i32, %c0_i32_0 : i32, i32
  }
  func.func @transform_8(%arg0: i32) -> (i32, i32) {
    %c0_i32 = arith.constant 0 : i32
    %c0_i32_0 = arith.constant 0 : i32
    %c0_i32_1 = arith.constant 0 : i32
    return %c0_i32, %c0_i32_0 : i32, i32
  }
  func.func @transform_9(%arg0: i32) -> (i32, i32) {
    %c0_i32 = arith.constant 0 : i32
    %c0_i32_0 = arith.constant 0 : i32
    %c0_i32_1 = arith.constant 0 : i32
    return %c0_i32, %c0_i32_0 : i32, i32
  }
  func.func @transform_10(%arg0: i32) -> (i32, i32, i32) {
    %c0_i32 = arith.constant 0 : i32
    %c0_i32_0 = arith.constant 0 : i32
    %c0_i32_1 = arith.constant 0 : i32
    return %c0_i32, %arg0, %c0_i32_0 : i32, i32, i32
  }
}

</mosaic_0001>

<bundles_post_ra>
// kernel: text_encoder_forward.5
= control target key start
LH: loop header
LB: loop body
LE: loop exit
PB: predicated region body
PF: predicated region fallthrough
CT: control target
= control target key end

     0   :  { %vm41_vm0 = vcmask 257024   ;;  %s739_s0 = inlined_call_operand.vmem [shape: f32[8,4,32], index: 0, kind: input, shape index: {}]   ;;  %s740_s1 = inlined_call_operand.vmem [shape: f32[1,32], index: 1, kind: input, shape index: {}]   ;;  %s741_s2 = inlined_call_operand.vmem [shape: f32[4,8,32], index: 2, kind: input, shape index: {}]   ;;  %s742_s3 = inlined_call_operand.vmem [shape: s32[4,1], index: 3, kind: input, shape index: {}]   ;;  %s743_s4 = inlined_call_operand.hbm [shape: f32[4,32], index: 4, kind: output, shape index: {}]  }
   0x1   :  { %v557_v0 = vld [vmem:[%s740_s1] ss:$0 sm:$0xff]  ;;  %v21_v3 = vld [vmem:[%s739_s0 + $0x8] sm:$0xf]  ;;  %v20_v4 = vld [vmem:[%s739_s0 + $0x4] sm:$0xf] }
   0x2   :  { %v19_v1 = vld [vmem:[%s739_s0] sm:$0xf]  ;;  %v22_v5 = vld [vmem:[%s739_s0 + $0xc] sm:$0xf]  ;;  %v35_v6 = vmul.f32 %v557_v0, %v21_v3  ;;  %v34_v7 = vmul.f32 %v557_v0, %v20_v4  ;;  %v23_v9 = vld [vmem:[%s739_s0 + $0x10] sm:$0xf] }
   0x3   :  { %v33_v2 = vmul.f32 %v557_v0, %v19_v1  ;;  %v36_v8 = vmul.f32 %v557_v0, %v22_v5  ;;  %v24_v11 = vld [vmem:[%s739_s0 + $0x14] sm:$0xf] }
   0x5   :  { %v42_v10 = vsel %vm41_vm0, %v33_v2, 0.0 }
   0x6   :  { %9 = vsyncpa [#allocation3], 0  ;;  %43 = vadd.xlane.f32.xlu0 %v42_v10  ;;  %v48_v12 = vsel %vm41_vm0, %v35_v6, 0.0  ;;  %v45_v13 = vsel %vm41_vm0, %v34_v7, 0.0  ;;  %v37_v14 = vmul.f32 %v557_v0, %v23_v9  ;;  %v51_v15 = vsel %vm41_vm0, %v36_v8, 0.0  ;;  %v175_v2 = vld [vmem:[%s741_s2 + $0x8] sm:$0xff] }
   0x7   :  { %49 = vadd.xlane.f32.xlu1 %v48_v12  ;;  %v38_v16 = vmul.f32 %v557_v0, %v24_v11  ;;  %v25_v17 = vld [vmem:[%s739_s0 + $0x18] sm:$0xf]  ;;  %v26_v18 = vld [vmem:[%s739_s0 + $0x1c] sm:$0xf]  ;;  %v628_v25 = vmov 0   ;;  %v74_v27 = vlaneseq  ;;  %vm108_vm1 = vcmask 1041409  }
   0x8   :  { %v54_v19 = vsel %vm41_vm0, %v37_v14, 0.0  ;;  %v39_v20 = vmul.f32 %v557_v0, %v25_v17  ;;  %v40_v22 = vmul.f32 %v557_v0, %v26_v18  ;;  %595 = vset.pattern.permute.xlu0 %v628_v25  ;;  %v155_v26 = vld [vmem:[%s742_s3] sm:$0xf]  ;;  %vm110_vm2 = vcmask 1042434   ;;  %v176_v12 = vld [vmem:[%s741_s2 + $0x10] sm:$0xff] }
   0x9   :  { %v57_v21 = vsel %vm41_vm0, %v38_v16, 0.0  ;;  %v75_v28 = vand.u32 127, %v74_v27  ;;  %v696_v29 = vshrl.u32 %v74_v27, 7  ;;  %vm112_vm3 = vcmask 1043459   ;;  %v174_v0 = vld [vmem:[%s741_s2] sm:$0xff] }
   0xa   :  { %46 = vadd.xlane.f32.xlu0 %v45_v13  ;;  %v60_v23 = vsel %vm41_vm0, %v39_v20, 0.0  ;;  %v63_v24 = vsel %vm41_vm0, %v40_v22, 0.0  ;;  %vm114_vm4 = vcmask 1044484   ;;  %vm116_vm5 = vcmask 1045509  }
   0xb   :  { %52 = vadd.xlane.f32.xlu1 %v51_v15  ;;  %v78_v31 = vsub.s32 %v75_v28, %v696_v29  ;;  %vm118_vm6 = vcmask 1046534   ;;  %vm120_vm7 = vcmask 1047559   ;;  %vm162_vm9 = vcmask 60416   ;;  %v177_v15 = vld [vmem:[%s741_s2 + $0x18] sm:$0xff]  ;;  %s632_s2 = smov [#allocation2]  }
   0xc   :  { %v629_v1 = vmov 0.0   ;;  %vm630_vm10 = vmmov 0   ;;  %v631_v4 = vmov 1966171168   ;;  %vm203_vm11 = vcmask 64512   ;;  %s549_s14 = sshll.u32 %s632_s2, 4  ;;  %s550_s14 = int_to_ptr.vmem [resolvable:$true] %s549_s14 }
   0xd   :  { %570 = vmatprep.subr.mxu0 %v629_v1  ;;  %572 = vmatprep.mubr.msk.f32.mxu0 %vm630_vm10, %v629_v1  ;;  %v180_v5 = vunpack.c.l.s4 %v631_v4  ;;  %s604_s15 = scalar_lea.vmem %s550_s14, 64  ;;  %p609_p1 = scmp.lt.s32.totalorder %s550_s14, %s550_s14 }
   0xe   :  { %55 = vadd.xlane.f32.xlu0 %v54_v19  ;;  %571 = vmatpush3.msra.mxu0 %v174_v0  ;;  %p605_p0 = scmp.ne.s32.totalorder %s550_s14, %s604_s15  ;;  %p610_p2 = scmp.lt.s32.totalorder %s604_s15, %s604_s15 }
   0xf   :  { %58 = vadd.xlane.f32.xlu1 %v57_v21  ;;  %575 = vmatprep.subr.mxu1 %v629_v1  ;;  %v181_v6 = vunpack.c.0.s8 %v180_v5 }
  0x10   :  { %580 = vmatprep.subr.mxu0 %v629_v1  ;;  %577 = vmatprep.mubr.msk.f32.mxu1 %vm630_vm10, %v629_v1  ;;  %p611_p3 = por %p610_p2, %p609_p1 }
  0x11   :  { %576 = vmatpush3.msra.mxu1 %v175_v2  ;;  %v184_v7 = vsub.s32 %v181_v6, %v696_v29 }
  0x12   :  { %61 = vadd.xlane.f32.xlu0 %v60_v23  ;;  %585 = vmatprep.subr.mxu1 %v629_v1  ;;  %p612_p4 = pnand %p611_p3, %p605_p0 }
  0x13   :  { %64 = vadd.xlane.f32.xlu1 %v63_v24 }
  0x28   :  { %157 = vperm.xlu0 %595, %v155_v26  }
  0x93   :  { %v44_v30 = vpop.xlane.xlu0 %43 }
  0x94   :  { %v50_v32 = vpop.xlane.xlu1 %49  ;;  %v79_v34 = vrot.slane %v44_v30, %v78_v31 }
  0x95   :  { %v87_v37 = vrot.slane %v50_v32, %v78_v31 }
  0x97   :  { %v47_v33 = vpop.xlane.xlu0 %46 }
  0x98   :  { %v83_v35 = vrot.slane %v47_v33, %v78_v31  ;;  %v53_v36 = vpop.xlane.xlu1 %52 }
  0x99   :  { %v91_v38 = vrot.slane %v53_v36, %v78_v31 }
  0x9a   :  { %v109_v39 = vsel %vm108_vm1, %v83_v35, %v79_v34 }
  0x9b   :  { %v111_v40 = vsel %vm110_vm2, %v87_v37, %v109_v39  ;;  %v56_v41 = vpop.xlane.xlu0 %55 }
  0x9c   :  { %v113_v42 = vsel %vm112_vm3, %v91_v38, %v111_v40  ;;  %v95_v43 = vrot.slane %v56_v41, %v78_v31  ;;  %v59_v44 = vpop.xlane.xlu1 %58 }
  0x9d   :  { %v99_v45 = vrot.slane %v59_v44, %v78_v31 }
  0x9e   :  { %v115_v46 = vsel %vm114_vm4, %v95_v43, %v113_v42 }
  0x9f   :  { %v62_v47 = vpop.xlane.xlu0 %61  ;;  %v117_v51 = vsel %vm116_vm5, %v99_v45, %v115_v46 }
  0xa0   :  { %v103_v48 = vrot.slane %v62_v47, %v78_v31  ;;  %v65_v49 = vpop.xlane.xlu1 %64 }
  0xa1   :  { %v107_v50 = vrot.slane %v65_v49, %v78_v31 }
  0xa2   :  { %v119_v52 = vsel %vm118_vm6, %v103_v48, %v117_v51 }
  0xa3   :  { %v121_v53 = vsel %vm120_vm7, %v107_v50, %v119_v52 }
  0xa4   :  { %123 = vxpose.xlu1.b32.start.end [1/1] (short) (narrow) %v121_v53, 8 }
  0xa7   :  { %v158_v54 = vpop.permute.xlu0 %157 }
  0xa8   :  { %vm159_vm8 = vcmp.lt.s32.totalorder %v75_v28, %v158_v54 }
 0x124   :  { %v139_v55 = vpop.trf.xlu1 }
 0x125   :  { %v160_v56 = vsel %vm159_vm8, %v139_v55, -10000.0 }
 0x126   :  { %v161_v57 = vmul.f32 10.0, %v160_v56 }
 0x128   :  { %v163_v58 = vsel %vm162_vm9, %v161_v57, -inf }
 0x129   :  { %164 = vmax.xlane.f32.xlu0 %v163_v58 }
 0x1b6   :  { %v165_v59 = vpop.xlane.xlu0 %164 }
 0x1b7   :  { %v166_v60 = vsub.f32 %v161_v57, %v165_v59 }
 0x1b9   :  { %v167_v61 = vmul.f32 1.442695, %v166_v60 }
 0x1bb   :  { %596 = vpow2.f32 %v167_v61 }
 0x1c5   :  { %v597_v62 = vpop.eup %596 }
 0x1c6   :  { %v169_v63 = vsel %vm162_vm9, %v597_v62, 0.0 }
 0x1c7   :  { %170 = vadd.xlane.f32.xlu1 %v169_v63 }
 0x254   :  { %v171_v3 = vpop.xlane.xlu1 %170 }
 0x255   :  { %598 = vrcp.f32 %v171_v3 }
 0x25f   :  { %v599_v8 = vpop.eup %598 }
 0x260   :  { %v173_v9 = vmul.f32 %v599_v8, %v597_v62 }
 0x262   :  { %v185_v10 = vrot.slane %v173_v9, %v184_v7 }
 0x264   :  { %v193_v11 = vrot.slane %v185_v10, %v184_v7  ;;  %v186_v13 = vcombine.high %v185_v10, %v185_v10 }
 0x266   :  { %573 = vmatmul.mubr.msk.f32.vlgmr.msra.gmra.mrb[0].mxu0 %vm203_vm11, %v193_v11  ;;  %v200_v14 = vrot.slane %v186_v13, %v184_v7  ;;  %v201_v16 = vcombine.high %v193_v11, %v193_v11 }
 0x267   :  { %581 = vmatpush3.msra.mxu0 %v176_v12  ;;  %582 = vmatprep.mubr.msk.f32.mxu0 %vm630_vm10, %v629_v1 }
 0x268   :  { %578 = vmatmul.mubr.msk.f32.vlgmr.msra.gmra.mrb[0].mxu1 %vm203_vm11, %v200_v14  ;;  %v202_v17 = vcombine.high %v200_v14, %v200_v14 }
 0x269   :  { %586 = vmatpush3.msra.mxu1 %v177_v15  ;;  %587 = vmatprep.mubr.msk.f32.mxu1 %vm630_vm10, %v629_v1 }
 0x26a   :  { %583 = vmatmul.mubr.msk.f32.vlgmr.msra.gmra.mrb[2].mxu0 %vm203_vm11, %v201_v16 }
 0x26c   :  { %588 = vmatmul.mubr.msk.f32.vlgmr.msra.gmra.mrb[2].mxu1 %vm203_vm11, %v202_v17 }
 0x339   :  { %v272_v18 = vpop.f32.mrb[0].mxu0 }
 0x33a   :  { %v574_v19 = vpop.f32.mrb[1].mxu0  ;;  %v492_v24 = vmul.f32 %v272_v18, %v272_v18 }
 0x33b   :  { %v344_v20 = vpop.f32.mrb[0].mxu1 }
 0x33c   :  { %v493_v21 = vmul.f32 %v344_v20, %v344_v20  ;;  %v579_v22 = vpop.f32.mrb[1].mxu1 }
 0x33d   :  { %v416_v23 = vpop.f32.mrb[2].mxu0 }
 0x33e   :  { %v500_v25 = vrot.slane %v493_v21, 7  ;;  %v494_v26 = vmul.f32 %v416_v23, %v416_v23  ;;  %v584_v27 = vpop.f32.mrb[3].mxu0 }
 0x33f   :  { %v488_v28 = vpop.f32.mrb[2].mxu1 }
 0x340   :  { %v502_v29 = vrot.slane %v494_v26, 6  ;;  %v495_v30 = vmul.f32 %v488_v28, %v488_v28  ;;  %v589_v31 = vpop.f32.mrb[3].mxu1  ;;  %v501_v32 = vsel %vm108_vm1, %v500_v25, %v492_v24 }
 0x342   :  { %v504_v33 = vrot.slane %v495_v30, 5  ;;  %v503_v34 = vsel %vm110_vm2, %v502_v29, %v501_v32 }
 0x344   :  { %v505_v35 = vsel %vm112_vm3, %v504_v33, %v503_v34 }
 0x345   :  { %v507_v36 = vsel %vm41_vm0, %v505_v35, 0.0 }
 0x346   :  { %508 = vadd.xlane.f32.xlu0 %v507_v36 }
 0x3d3   :  { %v509_v37 = vpop.xlane.xlu0 %508 }
 0x3d4   :  { %600 = vrsqrt.f32 %v509_v37  ;;  %vm512_vm12 = vcmp.eq.f32.partialorder %v509_v37, inf  ;;  %v515_v40 = vand.u32 2147483648, %v509_v37  ;;  %vm514_vm13 = vcmp.eq.f32.partialorder %v509_v37, 0.0 }
 0x3de   :  { %v601_v38 = vpop.eup %600 }
 0x3df   :  { %v511_v39 = vmul.f32 %v601_v38, %v509_v37 }
 0x3e1   :  { %v513_v41 = vsel %vm512_vm12, %v509_v37, %v511_v39 }
 0x3e2   :  { %v516_v42 = vsel %vm514_vm13, %v515_v40, %v513_v41 }
 0x3e3   :  { %v517_v43 = vadd.f32 1e-08, %v516_v42 }
 0x3e5   :  { %602 = vrcp.f32 %v517_v43 }
 0x3ef   :  { %v603_v44 = vpop.eup %602 }
 0x3f0   :  { %v520_v45 = vrot.slane %v603_v44, 1  ;;  %v521_v46 = vrot.slane %v603_v44, 2  ;;  %v522_v47 = vrot.slane %v603_v44, 3  ;;  %v527_v51 = vmul.f32 %v603_v44, %v272_v18 }
 0x3f2   :  { %v528_v48 = vmul.f32 %v520_v45, %v344_v20  ;;  %v529_v49 = vmul.f32 %v521_v46, %v416_v23  ;;  %v530_v50 = vmul.f32 %v522_v47, %v488_v28 }
 0x3f4   :  { %v535_v52 = vrot.slane %v528_v48, 7  ;;  %v537_v53 = vrot.slane %v529_v49, 6  ;;  %v539_v55 = vrot.slane %v530_v50, 5 }
 0x3f6   :  { %v536_v54 = vsel %vm108_vm1, %v535_v52, %v527_v51 }
 0x3f7   :  { %v538_v56 = vsel %vm110_vm2, %v537_v53, %v536_v54 }
 0x3f8   :  { %v540_v57 = vsel %vm112_vm3, %v539_v55, %v538_v56 }
 0x3f9   :  { %542 = vst.msk [vmem:[#allocation2] sm:$0xf] %vm41_vm0, %v540_v57 }
 0x3fa   :  { %615 = shalt.err (!%p612_p4)
}
 0x3fb   :  { %s616_s18 = scalar_lea.hbm %s743_s4, 64 }
 0x3fc   :  { %p617_p5 = scmp.ne.s32.totalorder %s743_s4, %s616_s18  ;;  %p620_p6 = scmp.lt.u32.totalorder %s616_s18, %s743_s4 }
 0x3fe   :  { %p622_p7 = pnand %p620_p6, %p617_p5 }
 0x400   :  { %625 = shalt.err (!%p622_p7)
}
 0x401   :  { %552 = dma.vmem_to_hbm [thread:$0]  %s550_s14, 64, %s743_s4, [#allocation3]  }
 0x402   :  { %626 = dma.done.wait [#allocation3], 64  }
 0x403   :  { %627 = vsyncadd [#allocation3], 4294967232 }
 0x404   :  { %556 = vsyncpa [#allocation3], 1 }

// kernel: text_encoder_forward.3
= control target key start
LH: loop header
LB: loop body
LE: loop exit
PB: predicated region body
PF: predicated region fallthrough
CT: control target
= control target key end

     0   :  { %v2291_v1 = vmov 0   ;;  %vm85_vm0 = vcmask 261120   ;;  %v2292_v10 = vmov 0.0   ;;  %vm2293_vm1 = vmmov 0   ;;  %s2294_s30 = smov 64   ;;  %s2295_s15 = smov 96   ;;  %s2923_s2 = inlined_call_operand.vmem [shape: bf16[32,96], index: 2, kind: input, shape index: {}]   ;;  %s2924_s0 = inlined_call_operand.vmem [shape: f32[8,4,32], index: 0, kind: input, shape index: {}]   ;;  %s2925_s4 = inlined_call_operand.vmem [shape: bf16[32,96], index: 4, kind: input, shape index: {}]   ;;  %s2926_s3 = inlined_call_operand.vmem [shape: f32[1,96], index: 3, kind: input, shape index: {}]   ;;  %s2927_s1 = inlined_call_operand.vmem [shape: s32[4,1], index: 1, kind: input, shape index: {}]   ;;  %s2928_s5 = inlined_call_operand.vmem [shape: f32[1,96], index: 5, kind: input, shape index: {}]   ;;  %s2929_s6 = inlined_call_operand.vmem [shape: bf16[32,96], index: 6, kind: input, shape index: {}]   ;;  %s2930_s7 = inlined_call_operand.vmem [shape: f32[1,96], index: 7, kind: input, shape index: {}]   ;;  %s2931_s8 = inlined_call_operand.vmem [shape: bf16[32,96], index: 8, kind: input, shape index: {}]   ;;  %s2932_s9 = inlined_call_operand.vmem [shape: f32[1,96], index: 9, kind: input, shape index: {}]   ;;  %s2933_s10 = inlined_call_operand.vmem [shape: f32[8,4,32], index: 10, kind: output, shape index: {}]  }
   0x1   :  { %v2182_v0 = vld [vmem:[%s2923_s2] sm:$0xff]   ;;  %2180 = vset.pattern.permute.xlu1 %v2291_v1  ;;  %2181 = vset.pattern.permute.xlu0 %v2291_v1  ;;  %v2183_v2 = vld [vmem:[%s2923_s2 + $0x8] sm:$0xff]   ;;  %v2186_v6 = vld [vmem:[%s2924_s0 + $0x10] sm:$0xff]   ;;  %vm153_vm2 = vcmask 781312   ;;  %vm279_vm3 = vcmask 3072   ;;  %vm406_vm12 = vcmask 257024  }
   0x2   :  { %2031 = vmatprep.subr.bf16.mxu0 %v2182_v0  ;;  %v2184_v3 = vld [vmem:[%s2924_s0] sm:$0xff]   ;;  %v2185_v4 = vld [vmem:[%s2924_s0 + $0x8] sm:$0xff]   ;;  %v2187_v7 = vld [vmem:[%s2924_s0 + $0x18] sm:$0xff]  }
   0x3   :  { %2032 = vmatpush3.bf16.msra.mxu0 %v2182_v0  ;;  %v60_v5 = vpack.c.bf16 %v2185_v4, %v2184_v3  ;;  %v2372_v8 = vpack.c.bf16 %v2187_v7, %v2186_v6  ;;  %v2377_v9 = vld [vmem:[%s2925_s4] sm:$0xff]   ;;  %v2387_v11 = vld [vmem:[%s2925_s4 + $0x8] sm:$0xff]  }
   0x4   :  { %2033 = vmatprep.subr.bf16.mxu0 %v2183_v2  ;;  %v1900_v12 = vld [vmem:[%s2926_s3] ss:$0 sm:$0xff]  ;;  %v2191_v47 = vld [vmem:[%s2929_s6 + $0x8] sm:$0xff]  }
   0x5   :  { %2035 = vmatprep.mubr.msk.bf16.mxu0 %vm85_vm0, %v60_v5  ;;  %2043 = vmatprep.mubr.msk.bf16.mxu1 %vm85_vm0, %v60_v5  ;;  %v2407_v16 = vld [vmem:[%s2927_s1] sm:$0xf] }
   0x6   :  { %vm255_vm4 = vcmp.gt.s32.totalorder %v2407_v16, 0  ;;  %v2421_v27 = vld [vmem:[%s2928_s5] ss:$0 sm:$0xff]  ;;  %vm256_vm5 = vcmp.gt.s32.totalorder %v2407_v16, 1  ;;  %vm257_vm6 = vcmp.gt.s32.totalorder %v2407_v16, 2  ;;  %vm258_vm7 = vcmp.gt.s32.totalorder %v2407_v16, 3 }
   0x7   :  { %2034 = vmatpush3.bf16.msra.mxu0 %v2183_v2  ;;  %v1910_v22 = vsel %vm255_vm4, 1.0, %v2292_v10  ;;  %v2190_v45 = vld [vmem:[%s2929_s6] sm:$0xff]   ;;  %vm259_vm8 = vcmp.gt.s32.totalorder %v2407_v16, 4  ;;  %vm260_vm9 = vcmp.gt.s32.totalorder %v2407_v16, 5  ;;  %vm261_vm10 = vcmp.gt.s32.totalorder %v2407_v16, 6 }
   0x8   :  { %2047 = vmatprep.subr.bf16.mxu0 %v2292_v10  ;;  %280 = vst.msk [vmem:[#allocation4] sm:$0xf] %vm279_vm3, %v1910_v22  ;;  %2039 = vmatprep.subr.bf16.mxu1 %v2190_v45  ;;  %v1905_v59 = vld [vmem:[%s2930_s7] ss:$0 sm:$0xff]  ;;  %vm262_vm11 = vcmp.gt.s32.totalorder %v2407_v16, 7 }
   0x9   :  { %2040 = vmatpush3.bf16.msra.mxu1 %v2190_v45 }
   0xa   :  { %2036 = vmatmul.mubr.msk.bf16.vlgmr.msra.gmra.mrb[0].mxu0 %vm85_vm0, %v2372_v8  ;;  %2041 = vmatprep.subr.bf16.mxu1 %v2191_v47 }
   0xb   :  { %2048 = vmatpush3.bf16.msra.mxu0 %v2377_v9  ;;  %2051 = vmatprep.mubr.msk.bf16.mxu0 %vm2293_vm1, %v2292_v10 }
   0xc   :  { %2049 = vmatprep.subr.bf16.mxu0 %v2292_v10 }
   0xd   :  { %2042 = vmatpush3.bf16.msra.mxu1 %v2191_v47 }
   0xe   :  { %2055 = vmatprep.subr.bf16.mxu1 %v2292_v10 }
   0xf   :  { %2050 = vmatpush3.bf16.msra.mxu0 %v2387_v11  ;;  %v298_v33 = vld [vmem:[#allocation4] sm:$0xf] }
  0x10   :  { %2063 = vmatprep.subr.bf16.mxu0 %v2292_v10  ;;  %389 = vperm.xlu1 %2180, %v298_v33   ;;  %v393_v34 = vsub.f32 1.0, %v298_v33 }
  0x11   :  { %2044 = vmatmul.mubr.msk.bf16.vlgmr.msra.gmra.mrb[0].mxu1 %vm85_vm0, %v2372_v8 }
  0x12   :  { %2052 = vmatmul.mubr.bf16.vlgmr.msra.gmra.mrb[4].mxu0 %v2291_v1  ;;  %2056 = vmatpush3.bf16.msra.mxu1 %v2377_v9 }
  0x13   :  { %2064 = vmatpush3.bf16.msra.mxu0 %v2377_v9  ;;  %2067 = vmatprep.mubr.msk.bf16.mxu0 %vm2293_vm1, %v2292_v10 }
  0x14   :  { %2065 = vmatprep.subr.bf16.mxu0 %v2292_v10  ;;  %396 = vperm.xlu1 %2180, %v393_v34  }
  0x15   :  { %2059 = vmatprep.mubr.msk.bf16.mxu1 %vm2293_vm1, %v2292_v10  ;;  %2057 = vmatprep.subr.bf16.mxu1 %v2292_v10 }
  0x16   :  { %2058 = vmatpush3.bf16.msra.mxu1 %v2387_v11 }
  0x17   :  { %2066 = vmatpush3.bf16.msra.mxu0 %v2387_v11  ;;  %2071 = vmatprep.subr.bf16.mxu1 %v2292_v10 }
  0x18   :  { %2079 = vmatprep.subr.bf16.mxu0 %v2292_v10 }
  0x8f   :  { %v2444_v48 = vpop.permute.xlu1 %389 }
  0x93   :  { %v397_v53 = vpop.permute.xlu1 %396 }
  0x94   :  { %v399_v56 = vmul.f32 0.0, %v397_v53 }
  0xdd   :  { %v2037_v13 = vpop.f32.mrb[0].mxu0 }
  0xde   :  { %v135_v14 = vadd.f32 %v2037_v13, %v1900_v12  ;;  %v126_v15 = vpop.f32.mrb[1].mxu0  ;;  %v1911_v13 = vsel %vm256_vm5, 1.0, %v2292_v10 }
  0xdf   :  { %v127_v17 = vadd.f32 %v1900_v12, %v126_v15  ;;  %v2038_v18 = vpop.f32.mrb[2].mxu0  ;;  %281 = vst.msk [vmem:[#allocation4 + $0x4] sm:$0xf] %vm279_vm3, %v1911_v13 }
  0xe0   :  { %v147_v19 = vcombine.high %v135_v14, %v135_v14  ;;  %158 = vst.msk [vmem:[#allocation2 + $0x10] sm:$0xf] %vm153_vm2, %v135_v14  ;;  %v138_v20 = vadd.f32 %v2038_v18, %v1900_v12  ;;  %v129_v21 = vpop.f32.mrb[3].mxu0 }
  0xe1   :  { %v145_v23 = vcombine.high %v127_v17, %v127_v17  ;;  %154 = vst.msk [vmem:[#allocation2] sm:$0xf] %vm153_vm2, %v127_v17  ;;  %v130_v24 = vadd.f32 %v1900_v12, %v129_v21 }
  0xe2   :  { %159 = vst.msk [vmem:[#allocation2 + $0x14] sm:$0xf] %vm153_vm2, %v147_v19  ;;  %v148_v25 = vcombine.high %v138_v20, %v138_v20  ;;  %160 = vst.msk [vmem:[#allocation2 + $0x18] sm:$0xf] %vm153_vm2, %v138_v20 }
  0xe3   :  { %155 = vst.msk [vmem:[#allocation2 + $0x4] sm:$0xf] %vm153_vm2, %v145_v23  ;;  %v146_v26 = vcombine.high %v130_v24, %v130_v24  ;;  %156 = vst.msk [vmem:[#allocation2 + $0x8] sm:$0xf] %vm153_vm2, %v130_v24 }
  0xe4   :  { %161 = vst.msk [vmem:[#allocation2 + $0x1c] sm:$0xf] %vm153_vm2, %v148_v25  ;;  %v2045_v60 = vpop.f32.mrb[0].mxu1 }
  0xe5   :  { %157 = vst.msk [vmem:[#allocation2 + $0xc] sm:$0xf] %vm153_vm2, %v146_v26  ;;  %v354_v28 = vpop.f32.mrb[4].mxu0  ;;  %v228_v61 = vadd.f32 %v2045_v60, %v1905_v59  ;;  %v219_v62 = vpop.f32.mrb[1].mxu1 }
  0xe6   :  { %v355_v29 = vadd.f32 %v2421_v27, %v354_v28  ;;  %v2053_v30 = vpop.f32.mrb[5].mxu0  ;;  %v220_v63 = vadd.f32 %v1905_v59, %v219_v62  ;;  %v2046_v0 = vpop.f32.mrb[2].mxu1  ;;  %v409_v20 = vld [vmem:[#allocation4 + $0x4] sm:$0xf] }
  0xe7   :  { %v357_v31 = vpop.f32.mrb[6].mxu0  ;;  %v240_v2 = vcombine.high %v228_v61, %v228_v61  ;;  %250 = vst.msk [vmem:[#allocation3 + $0x10] sm:$0xf] %vm153_vm2, %v228_v61  ;;  %v231_v3 = vadd.f32 %v2046_v0, %v1905_v59  ;;  %v222_v4 = vpop.f32.mrb[3].mxu1  ;;  %v491_v30 = vsub.f32 1.0, %v409_v20 }
  0xe8   :  { %369 = vrot.lane.b32.xlu0 %v355_v29, %s2294_s30  ;;  %v2054_v32 = vpop.f32.mrb[7].mxu0  ;;  %v360_v35 = vld [vmem:[#allocation2] sm:$0xf]  ;;  %v238_v5 = vcombine.high %v220_v63, %v220_v63  ;;  %246 = vst.msk [vmem:[#allocation3] sm:$0xf] %vm153_vm2, %v220_v63  ;;  %v223_v6 = vadd.f32 %v1905_v59, %v222_v4 }
  0xe9   :  { %v361_v36 = vadd.f32 %v360_v35, %v355_v29  ;;  %251 = vst.msk [vmem:[#allocation3 + $0x14] sm:$0xf] %vm153_vm2, %v240_v2  ;;  %v241_v7 = vcombine.high %v231_v3, %v231_v3  ;;  %252 = vst.msk [vmem:[#allocation3 + $0x18] sm:$0xf] %vm153_vm2, %v231_v3 }
  0xea   :  { %247 = vst.msk [vmem:[#allocation3 + $0x4] sm:$0xf] %vm153_vm2, %v238_v5  ;;  %v239_v8 = vcombine.high %v223_v6, %v223_v6  ;;  %248 = vst.msk [vmem:[#allocation3 + $0x8] sm:$0xf] %vm153_vm2, %v223_v6  ;;  %v458_v21 = vld [vmem:[#allocation2 + $0x4] sm:$0xf] }
  0xeb   :  { %v1921_v37 = vmul.f32 -1.442695, %v361_v36  ;;  %253 = vst.msk [vmem:[#allocation3 + $0x1c] sm:$0xf] %vm153_vm2, %v241_v7 }
  0xec   :  { %249 = vst.msk [vmem:[#allocation3 + $0xc] sm:$0xf] %vm153_vm2, %v239_v8 }
  0xed   :  { %2194 = vpow2.f32 %v1921_v37 }
  0xf7   :  { %v2195_v38 = vpop.eup %2194 }
  0xf8   :  { %v365_v39 = vadd.f32 1.0, %v2195_v38 }
  0xfa   :  { %2196 = vrcp.f32 %v365_v39 }
 0x104   :  { %v2197_v40 = vpop.eup %2196 }
 0x105   :  { %v379_v49 = vsub.f32 1.0, %v2197_v40  ;;  %v385_v51 = vmul.f32 0.0, %v2197_v40 }
 0x15a   :  { %v370_v41 = vpop.permute.xlu0 %369 }
 0x15b   :  { %v372_v42 = vmul.f32 %v2197_v40, %v370_v41 }
 0x15d   :  { %374 = vrot.lane.b32.xlu0 %v372_v42, %s2294_s30 }
 0x1cf   :  { %v375_v43 = vpop.permute.xlu0 %374 }
 0x1d0   :  { %v377_v44 = vadd.f32 %v375_v43, %v360_v35 }
 0x1d2   :  { %2198 = vtanh.f32 %v377_v44 }
 0x1dc   :  { %v2199_v46 = vpop.eup %2198 }
 0x1dd   :  { %381 = vrot.lane.b32.xlu0 %v2199_v46, %s2295_s15  ;;  %v1912_v46 = vsel %vm257_vm6, 1.0, %v2292_v10 }
 0x1de   :  { %282 = vst.msk [vmem:[#allocation4 + $0x8] sm:$0xf] %vm279_vm3, %v1912_v46 }
 0x1e5   :  { %v507_v53 = vld [vmem:[#allocation4 + $0x8] sm:$0xf] }
 0x1e6   :  { %v589_v63 = vsub.f32 1.0, %v507_v53 }
 0x24f   :  { %v382_v50 = vpop.permute.xlu0 %381 }
 0x250   :  { %v384_v52 = vmul.f32 %v382_v50, %v379_v49 }
 0x252   :  { %v386_v54 = vadd.f32 %v385_v51, %v384_v52 }
 0x254   :  { %v392_v55 = vmul.f32 %v2444_v48, %v386_v54  ;;  %v556_v54 = vld [vmem:[#allocation2 + $0x8] sm:$0xf] }
 0x256   :  { %v2447_v57 = vadd.f32 %v399_v56, %v392_v55 }
 0x258   :  { %v410_v58 = vpack.c.bf16 %v2447_v57, %v2447_v57 }
 0x25a   :  { %412 = vrot.lane.b32.xlu1 %v410_v58, %s2295_s15 }
 0x2cc   :  { %v413_v12 = vpop.permute.xlu1 %412 }
 0x2cd   :  { %2060 = vmatmul.mubr.msk.bf16.vlgmr.msra.gmra.mrb[4].mxu1 %vm85_vm0, %v413_v12 }
 0x2ce   :  { %2072 = vmatpush3.bf16.msra.mxu1 %v2377_v9  ;;  %2075 = vmatprep.mubr.msk.bf16.mxu1 %vm2293_vm1, %v2292_v10 }
 0x2cf   :  { %2073 = vmatprep.subr.bf16.mxu1 %v2292_v10 }
 0x2d2   :  { %2074 = vmatpush3.bf16.msra.mxu1 %v2387_v11 }
 0x2d3   :  { %2087 = vmatprep.subr.bf16.mxu1 %v2292_v10 }
 0x3a0   :  { %v451_v14 = vpop.f32.mrb[4].mxu1 }
 0x3a1   :  { %v452_v15 = vadd.f32 %v2421_v27, %v451_v14  ;;  %v2061_v17 = vpop.f32.mrb[5].mxu1 }
 0x3a2   :  { %v454_v18 = vpop.f32.mrb[6].mxu1 }
 0x3a3   :  { %467 = vrot.lane.b32.xlu0 %v452_v15, %s2294_s30  ;;  %v2062_v19 = vpop.f32.mrb[7].mxu1  ;;  %v459_v22 = vadd.f32 %v458_v21, %v452_v15 }
 0x3a5   :  { %v1923_v23 = vmul.f32 -1.442695, %v459_v22 }
 0x3a7   :  { %487 = vperm.xlu0 %2181, %v409_v20   ;;  %2200 = vpow2.f32 %v1923_v23  ;;  %v1913_v20 = vsel %vm258_vm7, 1.0, %v2292_v10 }
 0x3a8   :  { %283 = vst.msk [vmem:[#allocation4 + $0xc] sm:$0xf] %vm279_vm3, %v1913_v20 }
 0x3b1   :  { %v2201_v24 = vpop.eup %2200 }
 0x3b2   :  { %v463_v25 = vadd.f32 1.0, %v2201_v24 }
 0x3b4   :  { %2202 = vrcp.f32 %v463_v25 }
 0x3be   :  { %v2203_v26 = vpop.eup %2202 }
 0x3bf   :  { %v477_v35 = vsub.f32 1.0, %v2203_v26  ;;  %v483_v37 = vmul.f32 %v2203_v26, %v2447_v57 }
 0x415   :  { %v468_v28 = vpop.permute.xlu0 %467 }
 0x416   :  { %v470_v29 = vmul.f32 %v2203_v26, %v468_v28  ;;  %v605_v26 = vld [vmem:[#allocation4 + $0xc] sm:$0xf] }
 0x417   :  { %v654_v28 = vld [vmem:[#allocation2 + $0xc] sm:$0xf] }
 0x418   :  { %472 = vrot.lane.b32.xlu1 %v470_v29, %s2294_s30 }
 0x41c   :  { %494 = vperm.xlu1 %2180, %v491_v30  }
 0x426   :  { %v2478_v39 = vpop.permute.xlu0 %487 }
 0x48a   :  { %v473_v31 = vpop.permute.xlu1 %472 }
 0x48b   :  { %v475_v32 = vadd.f32 %v473_v31, %v458_v21 }
 0x48d   :  { %2204 = vtanh.f32 %v475_v32 }
 0x497   :  { %v2205_v33 = vpop.eup %2204 }
 0x498   :  { %479 = vrot.lane.b32.xlu1 %v2205_v33, %s2295_s15 }
 0x49b   :  { %v495_v34 = vpop.permute.xlu1 %494 }
 0x49c   :  { %v497_v41 = vmul.f32 %v495_v34, %v2447_v57 }
 0x50a   :  { %v480_v36 = vpop.permute.xlu1 %479 }
 0x50b   :  { %v482_v38 = vmul.f32 %v480_v36, %v477_v35  ;;  %v687_v36 = vsub.f32 1.0, %v605_v26 }
 0x50d   :  { %v484_v40 = vadd.f32 %v483_v37, %v482_v38 }
 0x50f   :  { %v490_v42 = vmul.f32 %v2478_v39, %v484_v40 }
 0x511   :  { %v2482_v43 = vadd.f32 %v497_v41, %v490_v42 }
 0x513   :  { %v508_v44 = vpack.c.bf16 %v2482_v43, %v2482_v43 }
 0x515   :  { %510 = vrot.lane.b32.xlu0 %v508_v44, %s2295_s15 }
 0x587   :  { %v511_v45 = vpop.permute.xlu0 %510 }
 0x588   :  { %2068 = vmatmul.mubr.msk.bf16.vlgmr.msra.gmra.mrb[8].mxu0 %vm85_vm0, %v511_v45 }
 0x589   :  { %2080 = vmatpush3.bf16.msra.mxu0 %v2377_v9  ;;  %2083 = vmatprep.mubr.msk.bf16.mxu0 %vm2293_vm1, %v2292_v10 }
 0x58a   :  { %2081 = vmatprep.subr.bf16.mxu0 %v2292_v10 }
 0x58d   :  { %2082 = vmatpush3.bf16.msra.mxu0 %v2387_v11 }
 0x58e   :  { %2095 = vmatprep.subr.bf16.mxu0 %v2292_v10 }
 0x65b   :  { %v549_v47 = vpop.f32.mrb[8].mxu0 }
 0x65c   :  { %v550_v49 = vadd.f32 %v2421_v27, %v549_v47  ;;  %v2069_v50 = vpop.f32.mrb[9].mxu0 }
 0x65d   :  { %v552_v51 = vpop.f32.mrb[10].mxu0 }
 0x65e   :  { %565 = vrot.lane.b32.xlu1 %v550_v49, %s2294_s30  ;;  %v2070_v52 = vpop.f32.mrb[11].mxu0  ;;  %v557_v55 = vadd.f32 %v556_v54, %v550_v49 }
 0x660   :  { %v1926_v56 = vmul.f32 -1.442695, %v557_v55  ;;  %v1914_v55 = vsel %vm259_vm8, 1.0, %v2292_v10 }
 0x661   :  { %284 = vst.msk [vmem:[#allocation4 + $0x10] sm:$0xf] %vm279_vm3, %v1914_v55 }
 0x662   :  { %585 = vperm.xlu1 %2180, %v507_v53   ;;  %2206 = vpow2.f32 %v1926_v56 }
 0x66c   :  { %v2207_v58 = vpop.eup %2206 }
 0x66d   :  { %v561_v59 = vadd.f32 1.0, %v2207_v58 }
 0x66f   :  { %2208 = vrcp.f32 %v561_v59 }
 0x679   :  { %v2209_v60 = vpop.eup %2208 }
 0x67a   :  { %v575_v5 = vsub.f32 1.0, %v2209_v60  ;;  %v581_v7 = vmul.f32 %v2209_v60, %v2482_v43 }
 0x6d0   :  { %v566_v61 = vpop.permute.xlu1 %565 }
 0x6d1   :  { %v568_v62 = vmul.f32 %v2209_v60, %v566_v61 }
 0x6d3   :  { %570 = vrot.lane.b32.xlu0 %v568_v62, %s2294_s30  ;;  %v703_v62 = vld [vmem:[#allocation4 + $0x10] sm:$0xf] }
 0x6d7   :  { %592 = vperm.xlu0 %2181, %v589_v63   ;;  %v752_v63 = vld [vmem:[#allocation2 + $0x10] sm:$0xf] }
 0x6e1   :  { %v2501_v4 = vpop.permute.xlu1 %585 }
 0x745   :  { %v571_v0 = vpop.permute.xlu0 %570 }
 0x746   :  { %v573_v2 = vadd.f32 %v571_v0, %v556_v54 }
 0x748   :  { %2210 = vtanh.f32 %v573_v2 }
 0x752   :  { %v2211_v3 = vpop.eup %2210 }
 0x753   :  { %577 = vrot.lane.b32.xlu1 %v2211_v3, %s2295_s15 }
 0x756   :  { %v593_v12 = vpop.permute.xlu0 %592 }
 0x757   :  { %v595_v14 = vmul.f32 %v593_v12, %v2482_v43  ;;  %v785_v12 = vsub.f32 1.0, %v703_v62 }
 0x7c5   :  { %v578_v6 = vpop.permute.xlu1 %577 }
 0x7c6   :  { %v580_v8 = vmul.f32 %v578_v6, %v575_v5 }
 0x7c8   :  { %v582_v13 = vadd.f32 %v581_v7, %v580_v8 }
 0x7ca   :  { %v588_v15 = vmul.f32 %v2501_v4, %v582_v13 }
 0x7cc   :  { %v2506_v17 = vadd.f32 %v595_v14, %v588_v15 }
 0x7ce   :  { %v606_v18 = vpack.c.bf16 %v2506_v17, %v2506_v17 }
 0x7d0   :  { %608 = vrot.lane.b32.xlu0 %v606_v18, %s2295_s15 }
 0x842   :  { %v609_v19 = vpop.permute.xlu0 %608 }
 0x843   :  { %2076 = vmatmul.mubr.msk.bf16.vlgmr.msra.gmra.mrb[8].mxu1 %vm85_vm0, %v609_v19 }
 0x844   :  { %2088 = vmatpush3.bf16.msra.mxu1 %v2377_v9  ;;  %2091 = vmatprep.mubr.msk.bf16.mxu1 %vm2293_vm1, %v2292_v10 }
 0x845   :  { %2089 = vmatprep.subr.bf16.mxu1 %v2292_v10 }
 0x848   :  { %2090 = vmatpush3.bf16.msra.mxu1 %v2387_v11 }
 0x849   :  { %2103 = vmatprep.subr.bf16.mxu1 %v2292_v10 }
 0x916   :  { %v647_v21 = vpop.f32.mrb[8].mxu1 }
 0x917   :  { %v648_v22 = vadd.f32 %v2421_v27, %v647_v21  ;;  %v2077_v23 = vpop.f32.mrb[9].mxu1 }
 0x918   :  { %v650_v24 = vpop.f32.mrb[10].mxu1 }
 0x919   :  { %663 = vrot.lane.b32.xlu1 %v648_v22, %s2294_s30  ;;  %v2078_v25 = vpop.f32.mrb[11].mxu1  ;;  %v655_v29 = vadd.f32 %v654_v28, %v648_v22 }
 0x91b   :  { %v1929_v30 = vmul.f32 -1.442695, %v655_v29 }
 0x91d   :  { %683 = vperm.xlu1 %2180, %v605_v26   ;;  %2212 = vpow2.f32 %v1929_v30 }
 0x927   :  { %v2213_v31 = vpop.eup %2212 }
 0x928   :  { %v659_v32 = vadd.f32 1.0, %v2213_v31  ;;  %v1915_v31 = vsel %vm260_vm9, 1.0, %v2292_v10 }
 0x929   :  { %285 = vst.msk [vmem:[#allocation4 + $0x14] sm:$0xf] %vm279_vm3, %v1915_v31 }
 0x92a   :  { %2214 = vrcp.f32 %v659_v32 }
 0x934   :  { %v2215_v33 = vpop.eup %2214 }
 0x935   :  { %v673_v42 = vsub.f32 1.0, %v2215_v33  ;;  %v679_v45 = vmul.f32 %v2215_v33, %v2506_v17 }
 0x98b   :  { %v664_v34 = vpop.permute.xlu1 %663 }
 0x98c   :  { %v666_v35 = vmul.f32 %v2215_v33, %v664_v34 }
 0x98e   :  { %668 = vrot.lane.b32.xlu0 %v666_v35, %s2294_s30 }
 0x992   :  { %690 = vperm.xlu0 %2181, %v687_v36   ;;  %v801_v36 = vld [vmem:[#allocation4 + $0x14] sm:$0xf] }
 0x99c   :  { %v2525_v41 = vpop.permute.xlu1 %683 }
 0xa00   :  { %v669_v37 = vpop.permute.xlu0 %668 }
 0xa01   :  { %v671_v38 = vadd.f32 %v669_v37, %v654_v28  ;;  %v850_v37 = vld [vmem:[#allocation2 + $0x14] sm:$0xf] }
 0xa03   :  { %2216 = vtanh.f32 %v671_v38 }
 0xa0d   :  { %v2217_v40 = vpop.eup %2216 }
 0xa0e   :  { %675 = vrot.lane.b32.xlu1 %v2217_v40, %s2295_s15 }
 0xa11   :  { %v691_v47 = vpop.permute.xlu0 %690 }
 0xa12   :  { %v693_v50 = vmul.f32 %v691_v47, %v2506_v17  ;;  %v883_v47 = vsub.f32 1.0, %v801_v36 }
 0xa80   :  { %v676_v44 = vpop.permute.xlu1 %675 }
 0xa81   :  { %v678_v46 = vmul.f32 %v676_v44, %v673_v42 }
 0xa83   :  { %v680_v49 = vadd.f32 %v679_v45, %v678_v46 }
 0xa85   :  { %v686_v51 = vmul.f32 %v2525_v41, %v680_v49 }
 0xa87   :  { %v2530_v52 = vadd.f32 %v693_v50, %v686_v51 }
 0xa89   :  { %v704_v53 = vpack.c.bf16 %v2530_v52, %v2530_v52 }
 0xa8b   :  { %706 = vrot.lane.b32.xlu0 %v704_v53, %s2295_s15 }
 0xafd   :  { %v707_v54 = vpop.permute.xlu0 %706 }
 0xafe   :  { %2084 = vmatmul.mubr.msk.bf16.vlgmr.msra.gmra.mrb[12].mxu0 %vm85_vm0, %v707_v54 }
 0xaff   :  { %2096 = vmatpush3.bf16.msra.mxu0 %v2377_v9  ;;  %2099 = vmatprep.mubr.msk.bf16.mxu0 %vm2293_vm1, %v2292_v10 }
 0xb00   :  { %2097 = vmatprep.subr.bf16.mxu0 %v2292_v10 }
 0xb03   :  { %2098 = vmatpush3.bf16.msra.mxu0 %v2387_v11 }
 0xb04   :  { %2111 = vmatprep.subr.bf16.mxu0 %v2292_v10 }
 0xbd1   :  { %v745_v56 = vpop.f32.mrb[12].mxu0 }
 0xbd2   :  { %v746_v58 = vadd.f32 %v2421_v27, %v745_v56  ;;  %v2085_v59 = vpop.f32.mrb[13].mxu0 }
 0xbd3   :  { %v748_v60 = vpop.f32.mrb[14].mxu0 }
 0xbd4   :  { %761 = vrot.lane.b32.xlu1 %v746_v58, %s2294_s30  ;;  %v2086_v61 = vpop.f32.mrb[15].mxu0  ;;  %v753_v0 = vadd.f32 %v752_v63, %v746_v58 }
 0xbd6   :  { %v1932_v2 = vmul.f32 -1.442695, %v753_v0 }
 0xbd8   :  { %781 = vperm.xlu1 %2180, %v703_v62   ;;  %2218 = vpow2.f32 %v1932_v2  ;;  %v2586_v2 = vld [vmem:[%s2931_s8] sm:$0xff]  }
 0xbe2   :  { %v2219_v3 = vpop.eup %2218 }
 0xbe3   :  { %v757_v5 = vadd.f32 1.0, %v2219_v3 }
 0xbe5   :  { %2220 = vrcp.f32 %v757_v5  ;;  %v2593_v5 = vld [vmem:[%s2931_s8 + $0x8] sm:$0xff]  }
 0xbef   :  { %v2221_v6 = vpop.eup %2220 }
 0xbf0   :  { %v771_v19 = vsub.f32 1.0, %v2221_v6  ;;  %v777_v21 = vmul.f32 %v2221_v6, %v2530_v52 }
 0xc46   :  { %v762_v7 = vpop.permute.xlu1 %761 }
 0xc47   :  { %v764_v8 = vmul.f32 %v2221_v6, %v762_v7  ;;  %v1916_v6 = vsel %vm261_vm10, 1.0, %v2292_v10 }
 0xc48   :  { %286 = vst.msk [vmem:[#allocation4 + $0x18] sm:$0xf] %vm279_vm3, %v1916_v6 }
 0xc49   :  { %766 = vrot.lane.b32.xlu0 %v764_v8, %s2294_s30 }
 0xc4d   :  { %788 = vperm.xlu0 %2181, %v785_v12  }
 0xc57   :  { %v2549_v18 = vpop.permute.xlu1 %781 }
 0xcbb   :  { %v767_v13 = vpop.permute.xlu0 %766 }
 0xcbc   :  { %v769_v14 = vadd.f32 %v767_v13, %v752_v63 }
 0xcbe   :  { %2222 = vtanh.f32 %v769_v14 }
 0xcc8   :  { %v2223_v15 = vpop.eup %2222 }
 0xcc9   :  { %773 = vrot.lane.b32.xlu1 %v2223_v15, %s2295_s15  ;;  %v2618_v15 = vld [vmem:[%s2932_s9] ss:$0 sm:$0xff] }
 0xccc   :  { %v789_v23 = vpop.permute.xlu0 %788 }
 0xccd   :  { %v791_v25 = vmul.f32 %v789_v23, %v2530_v52  ;;  %v948_v23 = vld [vmem:[#allocation2 + $0x18] sm:$0xf] }
 0xd3b   :  { %v774_v20 = vpop.permute.xlu1 %773 }
 0xd3c   :  { %v776_v22 = vmul.f32 %v774_v20, %v771_v19 }
 0xd3e   :  { %v778_v24 = vadd.f32 %v777_v21, %v776_v22 }
 0xd40   :  { %v784_v26 = vmul.f32 %v2549_v18, %v778_v24 }
 0xd42   :  { %v2554_v28 = vadd.f32 %v791_v25, %v784_v26  ;;  %v1154_v25 = vld [vmem:[#allocation3 + $0x1c] sm:$0xf] }
 0xd44   :  { %v802_v29 = vpack.c.bf16 %v2554_v28, %v2554_v28 }
 0xd46   :  { %804 = vrot.lane.b32.xlu0 %v802_v29, %s2295_s15 }
 0xdb8   :  { %v805_v30 = vpop.permute.xlu0 %804 }
 0xdb9   :  { %2092 = vmatmul.mubr.msk.bf16.vlgmr.msra.gmra.mrb[12].mxu1 %vm85_vm0, %v805_v30 }
 0xdba   :  { %2104 = vmatpush3.bf16.msra.mxu1 %v2377_v9  ;;  %2107 = vmatprep.mubr.msk.bf16.mxu1 %vm2293_vm1, %v2292_v10 }
 0xdbb   :  { %2105 = vmatprep.subr.bf16.mxu1 %v2292_v10 }
 0xdbe   :  { %2106 = vmatpush3.bf16.msra.mxu1 %v2387_v11 }
 0xdbf   :  { %2119 = vmatprep.subr.bf16.mxu1 %v2292_v10 }
 0xe8c   :  { %v843_v32 = vpop.f32.mrb[12].mxu1 }
 0xe8d   :  { %v844_v33 = vadd.f32 %v2421_v27, %v843_v32  ;;  %v2093_v34 = vpop.f32.mrb[13].mxu1 }
 0xe8e   :  { %v846_v9 = vpop.f32.mrb[14].mxu1 }
 0xe8f   :  { %859 = vrot.lane.b32.xlu1 %v844_v33, %s2294_s30  ;;  %v2094_v35 = vpop.f32.mrb[15].mxu1  ;;  %v851_v11 = vadd.f32 %v850_v37, %v844_v33 }
 0xe91   :  { %v1935_v38 = vmul.f32 -1.442695, %v851_v11 }
 0xe93   :  { %879 = vperm.xlu1 %2180, %v801_v36   ;;  %2224 = vpow2.f32 %v1935_v38  ;;  %v899_v36 = vld [vmem:[#allocation4 + $0x18] sm:$0xf] }
 0xe9d   :  { %v2225_v40 = vpop.eup %2224 }
 0xe9e   :  { %v855_v42 = vadd.f32 1.0, %v2225_v40  ;;  %v981_v40 = vsub.f32 1.0, %v899_v36 }
 0xea0   :  { %2226 = vrcp.f32 %v855_v42 }
 0xeaa   :  { %v2227_v44 = vpop.eup %2226 }
 0xeab   :  { %v869_v54 = vsub.f32 1.0, %v2227_v44  ;;  %v875_v56 = vmul.f32 %v2227_v44, %v2554_v28 }
 0xf01   :  { %v860_v45 = vpop.permute.xlu1 %859 }
 0xf02   :  { %v862_v46 = vmul.f32 %v2227_v44, %v860_v45 }
 0xf04   :  { %864 = vrot.lane.b32.xlu0 %v862_v46, %s2294_s30 }
 0xf08   :  { %886 = vperm.xlu0 %2181, %v883_v47  }
 0xf12   :  { %v2573_v53 = vpop.permute.xlu1 %879 }
 0xf76   :  { %v865_v49 = vpop.permute.xlu0 %864 }
 0xf77   :  { %v867_v50 = vadd.f32 %v865_v49, %v850_v37 }
 0xf79   :  { %2228 = vtanh.f32 %v867_v50 }
 0xf83   :  { %v2229_v51 = vpop.eup %2228 }
 0xf84   :  { %871 = vrot.lane.b32.xlu1 %v2229_v51, %s2295_s15 }
 0xf87   :  { %v887_v59 = vpop.permute.xlu0 %886 }
 0xf88   :  { %v889_v61 = vmul.f32 %v887_v59, %v2554_v28 }
 0xff6   :  { %v872_v55 = vpop.permute.xlu1 %871 }
 0xff7   :  { %v874_v58 = vmul.f32 %v872_v55, %v869_v54 }
 0xff9   :  { %v876_v60 = vadd.f32 %v875_v56, %v874_v58 }
 0xffb   :  { %v882_v62 = vmul.f32 %v2573_v53, %v876_v60 }
 0xffd   :  { %v2578_v63 = vadd.f32 %v889_v61, %v882_v62 }
 0xfff   :  { %v900_v0 = vpack.c.bf16 %v2578_v63, %v2578_v63 }
0x1001   :  { %902 = vrot.lane.b32.xlu0 %v900_v0, %s2295_s15 }
0x1073   :  { %v903_v3 = vpop.permute.xlu0 %902 }
0x1074   :  { %2100 = vmatmul.mubr.msk.bf16.vlgmr.msra.gmra.mrb[16].mxu0 %vm85_vm0, %v903_v3 }
0x1075   :  { %2112 = vmatpush3.bf16.msra.mxu0 %v2586_v2  ;;  %2115 = vmatprep.mubr.msk.bf16.mxu0 %vm2293_vm1, %v2292_v10 }
0x1076   :  { %2113 = vmatprep.subr.bf16.mxu0 %v2292_v10 }
0x1079   :  { %2114 = vmatpush3.bf16.msra.mxu0 %v2593_v5 }
0x107a   :  { %2127 = vmatprep.subr.bf16.mxu0 %v2292_v10 }
0x107c   :  { %2116 = vmatmul.mubr.bf16.vlgmr.msra.gmra.mrb[20].mxu0 %v2291_v1  ;;  %v1917_v1 = vsel %vm262_vm11, 1.0, %v2292_v10 }
0x107d   :  { %2128 = vmatpush3.bf16.msra.mxu0 %v2586_v2  ;;  %2131 = vmatprep.mubr.msk.bf16.mxu0 %vm2293_vm1, %v2292_v10  ;;  %287 = vst.msk [vmem:[#allocation4 + $0x1c] sm:$0xf] %vm279_vm3, %v1917_v1 }
0x107e   :  { %2129 = vmatprep.subr.bf16.mxu0 %v2292_v10 }
0x1081   :  { %2130 = vmatpush3.bf16.msra.mxu0 %v2593_v5 }
0x1082   :  { %2143 = vmatprep.subr.bf16.mxu0 %v2292_v10 }
0x1084   :  { %v1094_v42 = vld [vmem:[#allocation4 + $0x1c] sm:$0xf] }
0x1085   :  { %v1187_v50 = vsub.f32 1.0, %v1094_v42 }
0x1147   :  { %v941_v7 = vpop.f32.mrb[16].mxu0 }
0x1148   :  { %v942_v8 = vadd.f32 %v2421_v27, %v941_v7  ;;  %v2101_v12 = vpop.f32.mrb[17].mxu0 }
0x1149   :  { %v944_v13 = vpop.f32.mrb[18].mxu0 }
0x114a   :  { %957 = vrot.lane.b32.xlu1 %v942_v8, %s2294_s30  ;;  %v2102_v14 = vpop.f32.mrb[19].mxu0  ;;  %v949_v27 = vadd.f32 %v948_v23, %v942_v8 }
0x114c   :  { %v1938_v24 = vmul.f32 -1.442695, %v949_v27 }
0x114e   :  { %2230 = vpow2.f32 %v1938_v24 }
0x114f   :  { %v1147_v19 = vpop.f32.mrb[20].mxu0 }
0x1150   :  { %v1148_v16 = vadd.f32 %v2618_v15, %v1147_v19  ;;  %v2117_v20 = vpop.f32.mrb[21].mxu0 }
0x1151   :  { %v1150_v21 = vpop.f32.mrb[22].mxu0 }
0x1152   :  { %1163 = vrot.lane.b32.xlu0 %v1148_v16, %s2294_s30  ;;  %v2118_v22 = vpop.f32.mrb[23].mxu0  ;;  %v1155_v26 = vadd.f32 %v1154_v25, %v1148_v16 }
0x1154   :  { %v1946_v29 = vmul.f32 -1.442695, %v1155_v26 }
0x1156   :  { %2232 = vpow2.f32 %v1946_v29 }
0x1158   :  { %v2231_v30 = vpop.eup %2230 }
0x1159   :  { %v953_v31 = vadd.f32 1.0, %v2231_v30 }
0x115b   :  { %2234 = vrcp.f32 %v953_v31 }
0x1160   :  { %v2233_v32 = vpop.eup %2232 }
0x1161   :  { %v1159_v33 = vadd.f32 1.0, %v2233_v32 }
0x1163   :  { %2236 = vrcp.f32 %v1159_v33 }
0x1165   :  { %v2235_v34 = vpop.eup %2234 }
0x1166   :  { %v967_v56 = vsub.f32 1.0, %v2235_v34  ;;  %v973_v59 = vmul.f32 %v2235_v34, %v2578_v63 }
0x116d   :  { %v2237_v37 = vpop.eup %2236 }
0x116e   :  { %v1173_v1 = vsub.f32 1.0, %v2237_v37  ;;  %v1179_v13 = vmul.f32 0.0, %v2237_v37 }
0x11bc   :  { %v958_v9 = vpop.permute.xlu1 %957 }
0x11bd   :  { %v960_v35 = vmul.f32 %v2235_v34, %v958_v9  ;;  %v1204_v9 = vld [vmem:[#allocation4 + $0x18] sm:$0xf] }
0x11bf   :  { %962 = vrot.lane.b32.xlu1 %v960_v35, %s2294_s30  ;;  %v1253_v35 = vld [vmem:[#allocation3 + $0x18] sm:$0xf] }
0x11c3   :  { %977 = vperm.xlu1 %2180, %v899_v36  }
0x11c4   :  { %v1164_v11 = vpop.permute.xlu0 %1163 }
0x11c5   :  { %v1166_v38 = vmul.f32 %v2237_v37, %v1164_v11 }
0x11c7   :  { %1168 = vrot.lane.b32.xlu0 %v1166_v38, %s2294_s30 }
0x11cb   :  { %984 = vperm.xlu0 %2181, %v981_v40  }
0x11cf   :  { %1183 = vperm.xlu0 %2181, %v1094_v42  }
0x1231   :  { %v963_v44 = vpop.permute.xlu1 %962 }
0x1232   :  { %v965_v45 = vadd.f32 %v963_v44, %v948_v23 }
0x1234   :  { %2238 = vtanh.f32 %v965_v45  ;;  %v1286_v45 = vsub.f32 1.0, %v1204_v9 }
0x1239   :  { %v1169_v46 = vpop.permute.xlu0 %1168 }
0x123a   :  { %v1171_v47 = vadd.f32 %v1169_v46, %v1154_v25 }
0x123c   :  { %2240 = vtanh.f32 %v1171_v47 }
0x123e   :  { %v2239_v49 = vpop.eup %2238 }
0x123f   :  { %969 = vrot.lane.b32.xlu1 %v2239_v49, %s2295_s15 }
0x1242   :  { %v2626_v54 = vpop.permute.xlu1 %977 }
0x1243   :  { %1190 = vperm.xlu1 %2180, %v1187_v50  }
0x1246   :  { %v2241_v51 = vpop.eup %2240 }
0x1247   :  { %1175 = vrot.lane.b32.xlu0 %v2241_v51, %s2295_s15 }
0x124a   :  { %v985_v55 = vpop.permute.xlu0 %984 }
0x124b   :  { %v987_v0 = vmul.f32 %v985_v55, %v2578_v63 }
0x124e   :  { %v2629_v62 = vpop.permute.xlu0 %1183 }
0x12b1   :  { %v970_v58 = vpop.permute.xlu1 %969 }
0x12b2   :  { %v972_v60 = vmul.f32 %v970_v58, %v967_v56 }
0x12b4   :  { %v974_v61 = vadd.f32 %v973_v59, %v972_v60 }
0x12b6   :  { %v980_v3 = vmul.f32 %v2626_v54, %v974_v61 }
0x12b8   :  { %v2633_v6 = vadd.f32 %v987_v0, %v980_v3 }
0x12b9   :  { %v1176_v7 = vpop.permute.xlu0 %1175 }
0x12ba   :  { %v998_v8 = vpack.c.bf16 %v2633_v6, %v2633_v6  ;;  %v1178_v12 = vmul.f32 %v1176_v7, %v1173_v1 }
0x12bc   :  { %1000 = vrot.lane.b32.xlu1 %v998_v8, %s2295_s15  ;;  %v1180_v14 = vadd.f32 %v1179_v13, %v1178_v12 }
0x12be   :  { %v1186_v16 = vmul.f32 %v2629_v62, %v1180_v14 }
0x12c2   :  { %v1191_v19 = vpop.permute.xlu1 %1190 }
0x12c3   :  { %v1193_v20 = vmul.f32 0.0, %v1191_v19 }
0x12c5   :  { %v2639_v21 = vadd.f32 %v1193_v20, %v1186_v16  ;;  %v1303_v16 = vld [vmem:[#allocation4 + $0x14] sm:$0xf] }
0x12c6   :  { %v1352_v20 = vld [vmem:[#allocation3 + $0x14] sm:$0xf] }
0x12c7   :  { %v1205_v22 = vpack.c.bf16 %v2639_v21, %v2639_v21 }
0x12c9   :  { %1207 = vrot.lane.b32.xlu0 %v1205_v22, %s2295_s15 }
0x132e   :  { %v1001_v23 = vpop.permute.xlu1 %1000 }
0x132f   :  { %2108 = vmatmul.mubr.msk.bf16.vlgmr.msra.gmra.mrb[16].mxu1 %vm85_vm0, %v1001_v23 }
0x1330   :  { %2120 = vmatpush3.bf16.msra.mxu1 %v2586_v2  ;;  %2123 = vmatprep.mubr.msk.bf16.mxu1 %vm2293_vm1, %v2292_v10 }
0x1331   :  { %2121 = vmatprep.subr.bf16.mxu1 %v2292_v10 }
0x1334   :  { %2122 = vmatpush3.bf16.msra.mxu1 %v2593_v5 }
0x1335   :  { %2135 = vmatprep.subr.bf16.mxu1 %v2292_v10 }
0x133b   :  { %v1208_v27 = vpop.permute.xlu0 %1207 }
0x133c   :  { %2124 = vmatmul.mubr.msk.bf16.vlgmr.msra.gmra.mrb[20].mxu1 %vm85_vm0, %v1208_v27 }
0x133d   :  { %2136 = vmatpush3.bf16.msra.mxu1 %v2586_v2  ;;  %2139 = vmatprep.mubr.msk.bf16.mxu1 %vm2293_vm1, %v2292_v10 }
0x133e   :  { %2137 = vmatprep.subr.bf16.mxu1 %v2292_v10 }
0x1341   :  { %2138 = vmatpush3.bf16.msra.mxu1 %v2593_v5 }
0x1342   :  { %2151 = vmatprep.subr.bf16.mxu1 %v2292_v10 }
0x1402   :  { %v2658_v24 = vpop.f32.mrb[16].mxu1 }
0x1403   :  { %v2109_v25 = vpop.f32.mrb[17].mxu1 }
0x1404   :  { %v1042_v26 = vpop.f32.mrb[18].mxu1 }
0x1405   :  { %v2110_v29 = vpop.f32.mrb[19].mxu1 }
0x140f   :  { %v1246_v30 = vpop.f32.mrb[20].mxu1 }
0x1410   :  { %v1247_v31 = vadd.f32 %v2618_v15, %v1246_v30  ;;  %v2125_v32 = vpop.f32.mrb[21].mxu1 }
0x1411   :  { %v1249_v33 = vpop.f32.mrb[22].mxu1 }
0x1412   :  { %1262 = vrot.lane.b32.xlu1 %v1247_v31, %s2294_s30  ;;  %v2126_v34 = vpop.f32.mrb[23].mxu1  ;;  %v1254_v36 = vadd.f32 %v1253_v35, %v1247_v31  ;;  %v1385_v31 = vsub.f32 1.0, %v1303_v16 }
0x1414   :  { %v1950_v37 = vmul.f32 -1.442695, %v1254_v36 }
0x1416   :  { %1282 = vperm.xlu1 %2180, %v1204_v9   ;;  %2242 = vpow2.f32 %v1950_v37 }
0x1420   :  { %v2243_v11 = vpop.eup %2242 }
0x1421   :  { %v1258_v38 = vadd.f32 1.0, %v2243_v11 }
0x1423   :  { %2244 = vrcp.f32 %v1258_v38 }
0x142d   :  { %v2245_v40 = vpop.eup %2244 }
0x142e   :  { %v1272_v51 = vsub.f32 1.0, %v2245_v40  ;;  %v1278_v56 = vmul.f32 %v2245_v40, %v2639_v21 }
0x1484   :  { %v1263_v42 = vpop.permute.xlu1 %1262 }
0x1485   :  { %v1265_v44 = vmul.f32 %v2245_v40, %v1263_v42 }
0x1487   :  { %1267 = vrot.lane.b32.xlu0 %v1265_v44, %s2294_s30 }
0x148b   :  { %1289 = vperm.xlu0 %2181, %v1286_v45  }
0x1495   :  { %v2664_v50 = vpop.permute.xlu1 %1282 }
0x14f9   :  { %v1268_v46 = vpop.permute.xlu0 %1267 }
0x14fa   :  { %v1270_v47 = vadd.f32 %v1268_v46, %v1253_v35 }
0x14fc   :  { %2246 = vtanh.f32 %v1270_v47 }
0x1506   :  { %v2247_v49 = vpop.eup %2246 }
0x1507   :  { %1274 = vrot.lane.b32.xlu1 %v2247_v49, %s2295_s15 }
0x150a   :  { %v1290_v59 = vpop.permute.xlu0 %1289 }
0x150b   :  { %v1292_v61 = vmul.f32 %v1290_v59, %v2639_v21  ;;  %v1402_v59 = vld [vmem:[#allocation4 + $0x10] sm:$0xf] }
0x1579   :  { %v1275_v55 = vpop.permute.xlu1 %1274 }
0x157a   :  { %v1277_v58 = vmul.f32 %v1275_v55, %v1272_v51 }
0x157c   :  { %v1279_v60 = vadd.f32 %v1278_v56, %v1277_v58 }
0x157e   :  { %v1285_v0 = vmul.f32 %v2664_v50, %v1279_v60  ;;  %v1451_v60 = vld [vmem:[#allocation3 + $0x10] sm:$0xf] }
0x1580   :  { %v2669_v3 = vadd.f32 %v1292_v61, %v1285_v0 }
0x1582   :  { %v1304_v1 = vpack.c.bf16 %v2669_v3, %v2669_v3 }
0x1584   :  { %1306 = vrot.lane.b32.xlu0 %v1304_v1, %s2295_s15 }
0x15f6   :  { %v1307_v7 = vpop.permute.xlu0 %1306 }
0x15f7   :  { %2132 = vmatmul.mubr.msk.bf16.vlgmr.msra.gmra.mrb[24].mxu0 %vm85_vm0, %v1307_v7 }
0x15f8   :  { %2144 = vmatpush3.bf16.msra.mxu0 %v2586_v2  ;;  %2147 = vmatprep.mubr.msk.bf16.mxu0 %vm2293_vm1, %v2292_v10 }
0x15f9   :  { %2145 = vmatprep.subr.bf16.mxu0 %v2292_v10 }
0x15fc   :  { %2146 = vmatpush3.bf16.msra.mxu0 %v2593_v5 }
0x15fd   :  { %2159 = vmatprep.subr.bf16.mxu0 %v2292_v10 }
0x16ca   :  { %v1345_v8 = vpop.f32.mrb[24].mxu0 }
0x16cb   :  { %v1346_v12 = vadd.f32 %v2618_v15, %v1345_v8  ;;  %v2133_v13 = vpop.f32.mrb[25].mxu0 }
0x16cc   :  { %v1348_v14 = vpop.f32.mrb[26].mxu0 }
0x16cd   :  { %1361 = vrot.lane.b32.xlu1 %v1346_v12, %s2294_s30  ;;  %v2134_v19 = vpop.f32.mrb[27].mxu0  ;;  %v1353_v22 = vadd.f32 %v1352_v20, %v1346_v12  ;;  %v1484_v14 = vsub.f32 1.0, %v1402_v59 }
0x16cf   :  { %v1954_v23 = vmul.f32 -1.442695, %v1353_v22 }
0x16d1   :  { %1381 = vperm.xlu1 %2180, %v1303_v16   ;;  %2248 = vpow2.f32 %v1954_v23 }
0x16db   :  { %v2249_v27 = vpop.eup %2248 }
0x16dc   :  { %v1357_v25 = vadd.f32 1.0, %v2249_v27 }
0x16de   :  { %2250 = vrcp.f32 %v1357_v25 }
0x16e8   :  { %v2251_v26 = vpop.eup %2250 }
0x16e9   :  { %v1371_v35 = vsub.f32 1.0, %v2251_v26  ;;  %v1377_v37 = vmul.f32 %v2251_v26, %v2669_v3 }
0x173f   :  { %v1362_v29 = vpop.permute.xlu1 %1361 }
0x1740   :  { %v1364_v30 = vmul.f32 %v2251_v26, %v1362_v29 }
0x1742   :  { %1366 = vrot.lane.b32.xlu0 %v1364_v30, %s2294_s30 }
0x1746   :  { %1388 = vperm.xlu0 %2181, %v1385_v31  }
0x1750   :  { %v2685_v9 = vpop.permute.xlu1 %1381 }
0x17b4   :  { %v1367_v32 = vpop.permute.xlu0 %1366 }
0x17b5   :  { %v1369_v33 = vadd.f32 %v1367_v32, %v1352_v20 }
0x17b7   :  { %2252 = vtanh.f32 %v1369_v33 }
0x17c1   :  { %v2253_v34 = vpop.eup %2252 }
0x17c2   :  { %1373 = vrot.lane.b32.xlu1 %v2253_v34, %s2295_s15 }
0x17c5   :  { %v1389_v38 = vpop.permute.xlu0 %1388 }
0x17c6   :  { %v1391_v42 = vmul.f32 %v1389_v38, %v2669_v3 }
0x1834   :  { %v1374_v36 = vpop.permute.xlu1 %1373 }
0x1835   :  { %v1376_v11 = vmul.f32 %v1374_v36, %v1371_v35 }
0x1837   :  { %v1378_v40 = vadd.f32 %v1377_v37, %v1376_v11 }
0x1839   :  { %v1384_v44 = vmul.f32 %v2685_v9, %v1378_v40 }
0x183b   :  { %v2690_v45 = vadd.f32 %v1391_v42, %v1384_v44  ;;  %v1501_v42 = vld [vmem:[#allocation4 + $0xc] sm:$0xf] }
0x183c   :  { %v1550_v44 = vld [vmem:[#allocation3 + $0xc] sm:$0xf] }
0x183d   :  { %v1403_v46 = vpack.c.bf16 %v2690_v45, %v2690_v45 }
0x183f   :  { %1405 = vrot.lane.b32.xlu0 %v1403_v46, %s2295_s15 }
0x18b1   :  { %v1406_v47 = vpop.permute.xlu0 %1405 }
0x18b2   :  { %2140 = vmatmul.mubr.msk.bf16.vlgmr.msra.gmra.mrb[24].mxu1 %vm85_vm0, %v1406_v47 }
0x18b3   :  { %2152 = vmatpush3.bf16.msra.mxu1 %v2586_v2  ;;  %2155 = vmatprep.mubr.msk.bf16.mxu1 %vm2293_vm1, %v2292_v10 }
0x18b4   :  { %2153 = vmatprep.subr.bf16.mxu1 %v2292_v10 }
0x18b7   :  { %2154 = vmatpush3.bf16.msra.mxu1 %v2593_v5 }
0x18b8   :  { %2167 = vmatprep.subr.bf16.mxu1 %v2292_v10 }
0x1985   :  { %v1444_v49 = vpop.f32.mrb[24].mxu1 }
0x1986   :  { %v1445_v51 = vadd.f32 %v2618_v15, %v1444_v49  ;;  %v2141_v55 = vpop.f32.mrb[25].mxu1 }
0x1987   :  { %v1447_v56 = vpop.f32.mrb[26].mxu1 }
0x1988   :  { %1460 = vrot.lane.b32.xlu1 %v1445_v51, %s2294_s30  ;;  %v2142_v58 = vpop.f32.mrb[27].mxu1  ;;  %v1452_v61 = vadd.f32 %v1451_v60, %v1445_v51 }
0x198a   :  { %v1958_v0 = vmul.f32 -1.442695, %v1452_v61 }
0x198c   :  { %1480 = vperm.xlu1 %2180, %v1402_v59   ;;  %2254 = vpow2.f32 %v1958_v0  ;;  %v1583_v59 = vsub.f32 1.0, %v1501_v42 }
0x1996   :  { %v2255_v1 = vpop.eup %2254 }
0x1997   :  { %v1456_v7 = vadd.f32 1.0, %v2255_v1 }
0x1999   :  { %2256 = vrcp.f32 %v1456_v7 }
0x19a3   :  { %v2257_v8 = vpop.eup %2256 }
0x19a4   :  { %v1470_v23 = vsub.f32 1.0, %v2257_v8  ;;  %v1476_v25 = vmul.f32 %v2257_v8, %v2690_v45 }
0x19fa   :  { %v1461_v12 = vpop.permute.xlu1 %1460 }
0x19fb   :  { %v1463_v13 = vmul.f32 %v2257_v8, %v1461_v12 }
0x19fd   :  { %1465 = vrot.lane.b32.xlu0 %v1463_v13, %s2294_s30 }
0x1a01   :  { %1487 = vperm.xlu0 %2181, %v1484_v14  }
0x1a0b   :  { %v2706_v22 = vpop.permute.xlu1 %1480 }
0x1a6f   :  { %v1466_v19 = vpop.permute.xlu0 %1465 }
0x1a70   :  { %v1468_v16 = vadd.f32 %v1466_v19, %v1451_v60 }
0x1a72   :  { %2258 = vtanh.f32 %v1468_v16 }
0x1a7c   :  { %v2259_v20 = vpop.eup %2258 }
0x1a7d   :  { %1472 = vrot.lane.b32.xlu1 %v2259_v20, %s2295_s15 }
0x1a80   :  { %v1488_v29 = vpop.permute.xlu0 %1487 }
0x1a81   :  { %v1490_v31 = vmul.f32 %v1488_v29, %v2690_v45 }
0x1aef   :  { %v1473_v27 = vpop.permute.xlu1 %1472 }
0x1af0   :  { %v1475_v26 = vmul.f32 %v1473_v27, %v1470_v23 }
0x1af2   :  { %v1477_v30 = vadd.f32 %v1476_v25, %v1475_v26 }
0x1af4   :  { %v1483_v32 = vmul.f32 %v2706_v22, %v1477_v30 }
0x1af6   :  { %v2711_v33 = vadd.f32 %v1490_v31, %v1483_v32 }
0x1af8   :  { %v1502_v34 = vpack.c.bf16 %v2711_v33, %v2711_v33 }
0x1afa   :  { %1504 = vrot.lane.b32.xlu0 %v1502_v34, %s2295_s15  ;;  %v1600_v34 = vld [vmem:[#allocation4 + $0x8] sm:$0xf] }
0x1b6c   :  { %v1505_v35 = vpop.permute.xlu0 %1504 }
0x1b6d   :  { %2148 = vmatmul.mubr.msk.bf16.vlgmr.msra.gmra.mrb[28].mxu0 %vm85_vm0, %v1505_v35  ;;  %v1649_v35 = vld [vmem:[#allocation3 + $0x8] sm:$0xf] }
0x1b6e   :  { %2160 = vmatpush3.bf16.msra.mxu0 %v2586_v2  ;;  %2163 = vmatprep.mubr.msk.bf16.mxu0 %vm2293_vm1, %v2292_v10 }
0x1b6f   :  { %2161 = vmatprep.subr.bf16.mxu0 %v2292_v10 }
0x1b72   :  { %2162 = vmatpush3.bf16.msra.mxu0 %v2593_v5 }
0x1c40   :  { %v1543_v36 = vpop.f32.mrb[28].mxu0 }
0x1c41   :  { %v1544_v37 = vadd.f32 %v2618_v15, %v1543_v36  ;;  %v2149_v11 = vpop.f32.mrb[29].mxu0 }
0x1c42   :  { %v1546_v38 = vpop.f32.mrb[30].mxu0 }
0x1c43   :  { %1559 = vrot.lane.b32.xlu1 %v1544_v37, %s2294_s30  ;;  %v2150_v40 = vpop.f32.mrb[31].mxu0  ;;  %v1551_v46 = vadd.f32 %v1550_v44, %v1544_v37 }
0x1c44   :  { %v1682_v40 = vsub.f32 1.0, %v1600_v34 }
0x1c45   :  { %v1962_v47 = vmul.f32 -1.442695, %v1551_v46 }
0x1c47   :  { %1579 = vperm.xlu1 %2180, %v1501_v42   ;;  %2260 = vpow2.f32 %v1962_v47 }
0x1c51   :  { %v2261_v49 = vpop.eup %2260 }
0x1c52   :  { %v1555_v51 = vadd.f32 1.0, %v2261_v49 }
0x1c54   :  { %2262 = vrcp.f32 %v1555_v51 }
0x1c5e   :  { %v2263_v55 = vpop.eup %2262 }
0x1c5f   :  { %v1569_v7 = vsub.f32 1.0, %v2263_v55  ;;  %v1575_v12 = vmul.f32 %v2263_v55, %v2711_v33 }
0x1cb5   :  { %v1560_v56 = vpop.permute.xlu1 %1559 }
0x1cb6   :  { %v1562_v58 = vmul.f32 %v2263_v55, %v1560_v56 }
0x1cb8   :  { %1564 = vrot.lane.b32.xlu0 %v1562_v58, %s2294_s30 }
0x1cbc   :  { %1586 = vperm.xlu0 %2181, %v1583_v59  }
0x1cc6   :  { %v2726_v1 = vpop.permute.xlu1 %1579 }
0x1d2a   :  { %v1565_v60 = vpop.permute.xlu0 %1564 }
0x1d2b   :  { %v1567_v61 = vadd.f32 %v1565_v60, %v1550_v44 }
0x1d2d   :  { %2264 = vtanh.f32 %v1567_v61 }
0x1d37   :  { %v2265_v0 = vpop.eup %2264 }
0x1d38   :  { %1571 = vrot.lane.b32.xlu1 %v2265_v0, %s2295_s15 }
0x1d3b   :  { %v1587_v14 = vpop.permute.xlu0 %1586 }
0x1d3c   :  { %v1589_v16 = vmul.f32 %v1587_v14, %v2711_v33 }
0x1daa   :  { %v1572_v8 = vpop.permute.xlu1 %1571 }
0x1dab   :  { %v1574_v13 = vmul.f32 %v1572_v8, %v1569_v7 }
0x1dad   :  { %v1576_v19 = vadd.f32 %v1575_v12, %v1574_v13 }
0x1daf   :  { %v1582_v20 = vmul.f32 %v2726_v1, %v1576_v19 }
0x1db1   :  { %v2731_v23 = vadd.f32 %v1589_v16, %v1582_v20  ;;  %v1699_v20 = vld [vmem:[#allocation4 + $0x4] sm:$0xf] }
0x1db3   :  { %v1601_v27 = vpack.c.bf16 %v2731_v23, %v2731_v23 }
0x1db5   :  { %1603 = vrot.lane.b32.xlu0 %v1601_v27, %s2295_s15  ;;  %v1748_v27 = vld [vmem:[#allocation3 + $0x4] sm:$0xf] }
0x1e27   :  { %v1604_v25 = vpop.permute.xlu0 %1603 }
0x1e28   :  { %2156 = vmatmul.mubr.msk.bf16.vlgmr.msra.gmra.mrb[28].mxu1 %vm85_vm0, %v1604_v25 }
0x1e29   :  { %2168 = vmatpush3.bf16.msra.mxu1 %v2586_v2  ;;  %2171 = vmatprep.mubr.msk.bf16.mxu1 %vm2293_vm1, %v2292_v10 }
0x1e2a   :  { %2169 = vmatprep.subr.bf16.mxu1 %v2292_v10 }
0x1e2d   :  { %2170 = vmatpush3.bf16.msra.mxu1 %v2593_v5 }
0x1efb   :  { %v1642_v26 = vpop.f32.mrb[28].mxu1 }
0x1efc   :  { %v1643_v29 = vadd.f32 %v2618_v15, %v1642_v26  ;;  %v2157_v30 = vpop.f32.mrb[29].mxu1 }
0x1efd   :  { %v1645_v31 = vpop.f32.mrb[30].mxu1 }
0x1efe   :  { %1658 = vrot.lane.b32.xlu1 %v1643_v29, %s2294_s30  ;;  %v2158_v32 = vpop.f32.mrb[31].mxu1  ;;  %v1650_v36 = vadd.f32 %v1649_v35, %v1643_v29 }
0x1f00   :  { %v1966_v2 = vmul.f32 -1.442695, %v1650_v36 }
0x1f02   :  { %1678 = vperm.xlu1 %2180, %v1600_v34   ;;  %2266 = vpow2.f32 %v1966_v2 }
0x1f0c   :  { %v2267_v37 = vpop.eup %2266 }
0x1f0d   :  { %v1654_v11 = vadd.f32 1.0, %v2267_v37 }
0x1f0f   :  { %2268 = vrcp.f32 %v1654_v11  ;;  %v2290_v11 = vld [vmem:[%s2928_s5] ss:$0 sm:$0xff] }
0x1f19   :  { %v2269_v10 = vpop.eup %2268 }
0x1f1a   :  { %v1668_v49 = vsub.f32 1.0, %v2269_v10  ;;  %v1674_v55 = vmul.f32 %v2269_v10, %v2731_v23 }
0x1f70   :  { %v1659_v38 = vpop.permute.xlu1 %1658 }
0x1f71   :  { %v1661_v5 = vmul.f32 %v2269_v10, %v1659_v38  ;;  %v1040_v10 = vadd.f32 %v2290_v11, %v2658_v24  ;;  %v1046_v38 = vld [vmem:[#allocation2 + $0x1c] sm:$0xf] }
0x1f73   :  { %1663 = vrot.lane.b32.xlu0 %v1661_v5, %s2294_s30  ;;  %v1047_v5 = vadd.f32 %v1046_v38, %v1040_v10 }
0x1f77   :  { %1685 = vperm.xlu0 %2181, %v1682_v40   ;;  %v1941_v40 = vmul.f32 -1.442695, %v1047_v5 }
0x1f81   :  { %v2746_v47 = vpop.permute.xlu1 %1678 }
0x1fe5   :  { %v1664_v42 = vpop.permute.xlu0 %1663 }
0x1fe6   :  { %v1666_v44 = vadd.f32 %v1664_v42, %v1649_v35  ;;  %v1781_v35 = vsub.f32 1.0, %v1699_v20 }
0x1fe8   :  { %2270 = vtanh.f32 %v1666_v44 }
0x1ff2   :  { %v2271_v46 = vpop.eup %2270 }
0x1ff3   :  { %1670 = vrot.lane.b32.xlu1 %v2271_v46, %s2295_s15 }
0x1ff6   :  { %v1686_v58 = vpop.permute.xlu0 %1685 }
0x1ff7   :  { %v1688_v60 = vmul.f32 %v1686_v58, %v2731_v23 }
0x2065   :  { %v1671_v51 = vpop.permute.xlu1 %1670 }
0x2066   :  { %v1673_v56 = vmul.f32 %v1671_v51, %v1668_v49 }
0x2068   :  { %v1675_v59 = vadd.f32 %v1674_v55, %v1673_v56 }
0x206a   :  { %v1681_v61 = vmul.f32 %v2746_v47, %v1675_v59 }
0x206c   :  { %v2751_v0 = vadd.f32 %v1688_v60, %v1681_v61 }
0x206e   :  { %v1700_v7 = vpack.c.bf16 %v2751_v0, %v2751_v0 }
0x2070   :  { %1702 = vrot.lane.b32.xlu0 %v1700_v7, %s2295_s15 }
0x20e2   :  { %v1703_v8 = vpop.permute.xlu0 %1702 }
0x20e3   :  { %2164 = vmatmul.mubr.msk.bf16.vlgmr.msra.gmra.mrb[32].mxu0 %vm85_vm0, %v1703_v8 }
0x21b6   :  { %v1741_v12 = vpop.f32.mrb[32].mxu0 }
0x21b7   :  { %v1742_v13 = vadd.f32 %v2618_v15, %v1741_v12  ;;  %v2165_v14 = vpop.f32.mrb[33].mxu0 }
0x21b8   :  { %v1744_v19 = vpop.f32.mrb[34].mxu0 }
0x21b9   :  { %1757 = vrot.lane.b32.xlu1 %v1742_v13, %s2294_s30  ;;  %v2166_v16 = vpop.f32.mrb[35].mxu0  ;;  %v1749_v25 = vadd.f32 %v1748_v27, %v1742_v13  ;;  %v997_v13 = vld [vmem:[#allocation4 + $0x1c] sm:$0xf] }
0x21bb   :  { %v1970_v26 = vmul.f32 -1.442695, %v1749_v25 }
0x21bd   :  { %1777 = vperm.xlu1 %2180, %v1699_v20   ;;  %2272 = vpow2.f32 %v1970_v26 }
0x21c7   :  { %v2273_v29 = vpop.eup %2272 }
0x21c8   :  { %v1753_v30 = vadd.f32 1.0, %v2273_v29  ;;  %v401_v29 = vmul.f32 %v2447_v57, %v2444_v48  ;;  %v1196_v48 = vmul.f32 %v2639_v21, %v2629_v62  ;;  %v1394_v57 = vmul.f32 %v2690_v45, %v2685_v9 }
0x21ca   :  { %2274 = vrcp.f32 %v1753_v30  ;;  %v597_v30 = vmul.f32 %v2506_v17, %v2501_v4  ;;  %v1592_v4 = vmul.f32 %v2731_v23, %v2726_v1 }
0x21d4   :  { %v2275_v31 = vpop.eup %2274 }
0x21d5   :  { %v1767_v49 = vsub.f32 1.0, %v2275_v31  ;;  %v1773_v55 = vmul.f32 %v2275_v31, %v2751_v0 }
0x222b   :  { %v1758_v32 = vpop.permute.xlu1 %1757 }
0x222c   :  { %v1760_v34 = vmul.f32 %v2275_v31, %v1758_v32  ;;  %v793_v31 = vmul.f32 %v2554_v28, %v2549_v18  ;;  %v989_v32 = vmul.f32 %v2633_v6, %v2626_v54 }
0x222e   :  { %1762 = vrot.lane.b32.xlu0 %v1760_v34, %s2294_s30 }
0x2232   :  { %1784 = vperm.xlu0 %2181, %v1781_v35  }
0x223c   :  { %v1778_v46 = vpop.permute.xlu1 %1777 }
0x22a0   :  { %v1763_v36 = vpop.permute.xlu0 %1762 }
0x22a1   :  { %v1765_v2 = vadd.f32 %v1763_v36, %v1748_v27  ;;  %v1798_v27 = vld [vmem:[#allocation4] sm:$0xf] }
0x22a2   :  { %v1879_v26 = vsub.f32 1.0, %v1798_v27 }
0x22a3   :  { %2276 = vtanh.f32 %v1765_v2  ;;  %v1846_v2 = vld [vmem:[#allocation3] sm:$0xf] }
0x22a4   :  { %2278 = vpow2.f32 %v1941_v40 }
0x22ad   :  { %v2277_v37 = vpop.eup %2276 }
0x22ae   :  { %1769 = vrot.lane.b32.xlu1 %v2277_v37, %s2295_s15  ;;  %v2279_v42 = vpop.eup %2278 }
0x22af   :  { %v1051_v44 = vadd.f32 1.0, %v2279_v42 }
0x22b1   :  { %2280 = vrcp.f32 %v1051_v44  ;;  %v1785_v58 = vpop.permute.xlu0 %1784  ;;  %v1079_v44 = vsub.f32 1.0, %v997_v13 }
0x22b2   :  { %1055 = vrot.lane.b32.xlu1 %v1040_v10, %s2294_s30  ;;  %v1787_v61 = vmul.f32 %v1785_v58, %v2751_v0 }
0x22bb   :  { %v2767_v60 = vpop.eup %2280 }
0x22bc   :  { %v1071_v58 = vmul.f32 %v2767_v60, %v2633_v6 }
0x2320   :  { %v1770_v51 = vpop.permute.xlu1 %1769 }
0x2321   :  { %v1772_v56 = vmul.f32 %v1770_v51, %v1767_v49  ;;  %v1065_v49 = vsub.f32 1.0, %v2767_v60 }
0x2323   :  { %v1774_v59 = vadd.f32 %v1773_v55, %v1772_v56  ;;  %v499_v56 = vmul.f32 %v2482_v43, %v2478_v39  ;;  %v1295_v43 = vmul.f32 %v2669_v3, %v2664_v50 }
0x2324   :  { %v1056_v24 = vpop.permute.xlu1 %1055 }
0x2325   :  { %v1780_v7 = vmul.f32 %v1778_v46, %v1774_v59  ;;  %v1058_v8 = vmul.f32 %v2767_v60, %v1056_v24 }
0x2327   :  { %v2771_v12 = vadd.f32 %v1787_v61, %v1780_v7  ;;  %1060 = vrot.lane.b32.xlu1 %v1058_v8, %s2294_s30  ;;  %v695_v7 = vmul.f32 %v2530_v52, %v2525_v41  ;;  %v1493_v41 = vmul.f32 %v2711_v33, %v2706_v22  ;;  %v1691_v52 = vmul.f32 %v2751_v0, %v2746_v47 }
0x2329   :  { %v1799_v14 = vpack.c.bf16 %v2771_v12, %v2771_v12  ;;  %v1790_v17 = vmul.f32 %v2771_v12, %v1778_v46 }
0x232b   :  { %1075 = vperm.xlu1 %2180, %v997_v13   ;;  %1801 = vrot.lane.b32.xlu0 %v1799_v14, %s2295_s15  ;;  %v891_v14 = vmul.f32 %v2578_v63, %v2573_v53 }
0x2399   :  { %v1061_v19 = vpop.permute.xlu1 %1060 }
0x239a   :  { %v1063_v16 = vadd.f32 %v1061_v19, %v1046_v38 }
0x239c   :  { %2282 = vtanh.f32 %v1063_v16 }
0x239d   :  { %v1802_v20 = vpop.permute.xlu0 %1801 }
0x239e   :  { %2172 = vmatmul.mubr.msk.bf16.vlgmr.msra.gmra.mrb[32].mxu1 %vm85_vm0, %v1802_v20 }
0x23a6   :  { %v2283_v25 = vpop.eup %2282 }
0x23a7   :  { %1067 = vrot.lane.b32.xlu1 %v2283_v25, %s2295_s15 }
0x23aa   :  { %v1076_v18 = vpop.permute.xlu1 %1075 }
0x23ab   :  { %1882 = vperm.xlu1 %2180, %v1879_v26  }
0x23af   :  { %403 = vrot.lane.b32.xlu1 %v401_v29, %s2295_s15 }
0x23b3   :  { %599 = vrot.lane.b32.xlu1 %v597_v30, %s2295_s15 }
0x23b7   :  { %795 = vrot.lane.b32.xlu1 %v793_v31, %s2295_s15 }
0x23bb   :  { %991 = vrot.lane.b32.xlu1 %v989_v32, %s2295_s15 }
0x23bf   :  { %1198 = vrot.lane.b32.xlu1 %v1196_v48, %s2295_s15 }
0x23c3   :  { %1396 = vrot.lane.b32.xlu1 %v1394_v57, %s2295_s15 }
0x23c7   :  { %1594 = vrot.lane.b32.xlu1 %v1592_v4, %s2295_s15 }
0x23cb   :  { %1792 = vrot.lane.b32.xlu1 %v1790_v17, %s2295_s15 }
0x2419   :  { %v1068_v28 = vpop.permute.xlu1 %1067 }
0x241a   :  { %v1070_v55 = vmul.f32 %v1068_v28, %v1065_v49 }
0x241c   :  { %v1072_v24 = vadd.f32 %v1071_v58, %v1070_v55 }
0x241e   :  { %v1078_v8 = vmul.f32 %v1076_v18, %v1072_v24 }
0x242a   :  { %v2802_v54 = vpop.permute.xlu1 %1882 }
0x242b   :  { %v1885_v22 = vmul.f32 %v2802_v54, %v2771_v12 }
0x242e   :  { %v404_v62 = vpop.permute.xlu1 %403 }
0x242f   :  { %407 = vst.msk [vmem:[%s2933_s10] sm:$0xf] %vm406_vm12, %v404_v62 }
0x2432   :  { %v600_v21 = vpop.permute.xlu1 %599 }
0x2433   :  { %1927 = vst.msk [vmem:[%s2933_s10 + $0x8] sm:$0xf] %vm406_vm12, %v600_v21 }
0x2436   :  { %v796_v9 = vpop.permute.xlu1 %795 }
0x2437   :  { %1933 = vst.msk [vmem:[%s2933_s10 + $0x10] sm:$0xf] %vm406_vm12, %v796_v9 }
0x243a   :  { %v992_v45 = vpop.permute.xlu1 %991 }
0x243b   :  { %1939 = vst.msk [vmem:[%s2933_s10 + $0x18] sm:$0xf] %vm406_vm12, %v992_v45 }
0x243e   :  { %v1199_v53 = vpop.permute.xlu1 %1198 }
0x2442   :  { %v1397_v60 = vpop.permute.xlu1 %1396 }
0x2446   :  { %v1595_v47 = vpop.permute.xlu1 %1594 }
0x244a   :  { %v1793_v26 = vpop.permute.xlu1 %1792 }
0x2471   :  { %v1840_v1 = vpop.f32.mrb[32].mxu1 }
0x2472   :  { %v1841_v23 = vadd.f32 %v2618_v15, %v1840_v1  ;;  %v2173_v34 = vpop.f32.mrb[33].mxu1  ;;  %v1959_v1 = vld [vmem:[%s2933_s10 + $0x10] sm:$0xf] }
0x2473   :  { %v1843_v35 = vpop.f32.mrb[34].mxu1 }
0x2474   :  { %1855 = vrot.lane.b32.xlu0 %v1841_v23, %s2294_s30  ;;  %v2174_v36 = vpop.f32.mrb[35].mxu1  ;;  %v1847_v37 = vadd.f32 %v1846_v2, %v1841_v23 }
0x2476   :  { %v1974_v11 = vmul.f32 -1.442695, %v1847_v37  ;;  %v1967_v37 = vld [vmem:[%s2933_s10 + $0x8] sm:$0xf] }
0x2478   :  { %2284 = vpow2.f32 %v1974_v11 }
0x2482   :  { %v2285_v10 = vpop.eup %2284 }
0x2483   :  { %v1851_v38 = vadd.f32 1.0, %v2285_v10 }
0x2485   :  { %2286 = vrcp.f32 %v1851_v38 }
0x248f   :  { %v2287_v5 = vpop.eup %2286 }
0x2490   :  { %v1871_v16 = vmul.f32 %v2287_v5, %v2771_v12 }
0x24e6   :  { %v1856_v40 = vpop.permute.xlu0 %1855 }
0x24e7   :  { %v1858_v42 = vmul.f32 %v2287_v5, %v1856_v40 }
0x24e9   :  { %1860 = vrot.lane.b32.xlu0 %v1858_v42, %s2294_s30 }
0x24ed   :  { %1082 = vperm.xlu0 %2181, %v1079_v44  }
0x24f1   :  { %1875 = vperm.xlu0 %2181, %v1798_v27  }
0x255b   :  { %v1861_v15 = vpop.permute.xlu0 %1860 }
0x255c   :  { %v1863_v46 = vadd.f32 %v1861_v15, %v1846_v2 }
0x255e   :  { %2288 = vtanh.f32 %v1863_v46 }
0x2568   :  { %v2289_v51 = vpop.eup %2288 }
0x2569   :  { %1867 = vrot.lane.b32.xlu0 %v2289_v51, %s2295_s15 }
0x256c   :  { %v1083_v59 = vpop.permute.xlu0 %1082 }
0x256d   :  { %501 = vrot.lane.b32.xlu0 %v499_v56, %s2295_s15  ;;  %v1085_v61 = vmul.f32 %v1083_v59, %v2633_v6  ;;  %v1865_v6 = vsub.f32 1.0, %v2287_v5  ;;  %v1887_v5 = vld [vmem:[%s2933_s10] sm:$0xf] }
0x256f   :  { %v1086_v13 = vadd.f32 %v1085_v61, %v1078_v8 }
0x2570   :  { %v1876_v63 = vpop.permute.xlu0 %1875 }
0x2571   :  { %697 = vrot.lane.b32.xlu0 %v695_v7, %s2295_s15  ;;  %v1087_v39 = vmul.f32 %v1086_v13, %v1076_v18  ;;  %v1951_v18 = vld [vmem:[%s2933_s10 + $0x18] sm:$0xf] }
0x2575   :  { %893 = vrot.lane.b32.xlu0 %v891_v14, %s2295_s15 }
0x2579   :  { %1089 = vrot.lane.b32.xlu0 %v1087_v39, %s2295_s15 }
0x257d   :  { %1297 = vrot.lane.b32.xlu0 %v1295_v43, %s2295_s15 }
0x2581   :  { %1495 = vrot.lane.b32.xlu0 %v1493_v41, %s2295_s15 }
0x2585   :  { %1693 = vrot.lane.b32.xlu0 %v1691_v52, %s2295_s15 }
0x25db   :  { %v1868_v19 = vpop.permute.xlu0 %1867 }
0x25dc   :  { %v1870_v50 = vmul.f32 %v1868_v19, %v1865_v6 }
0x25de   :  { %v1872_v3 = vadd.f32 %v1871_v16, %v1870_v50 }
0x25df   :  { %v502_v20 = vpop.permute.xlu0 %501 }
0x25e0   :  { %v1878_v33 = vmul.f32 %v1876_v63, %v1872_v3  ;;  %1924 = vst.msk [vmem:[%s2933_s10 + $0x4] sm:$0xf] %vm406_vm12, %v502_v20 }
0x25e2   :  { %v1886_v0 = vadd.f32 %v1885_v22, %v1878_v33 }
0x25e3   :  { %v698_v27 = vpop.permute.xlu0 %697 }
0x25e4   :  { %1930 = vst.msk [vmem:[%s2933_s10 + $0xc] sm:$0xf] %vm406_vm12, %v698_v27  ;;  %v1888_v25 = vmul.f32 %v1886_v0, %v1876_v63 }
0x25e6   :  { %1890 = vrot.lane.b32.xlu0 %v1888_v25, %s2295_s15 }
0x25e7   :  { %v1971_v12 = vld [vmem:[%s2933_s10 + $0x4] sm:$0xf]  ;;  %v894_v29 = vpop.permute.xlu0 %893 }
0x25e8   :  { %v1795_v30 = vadd.f32 %v1971_v12, %v1793_v26  ;;  %1936 = vst.msk [vmem:[%s2933_s10 + $0x14] sm:$0xf] %vm406_vm12, %v894_v29 }
0x25ea   :  { %v1796_v31 = vmul.f32 0.5, %v1795_v30 }
0x25eb   :  { %v1963_v32 = vld [vmem:[%s2933_s10 + $0xc] sm:$0xf]  ;;  %v1090_v48 = vpop.permute.xlu0 %1089 }
0x25ec   :  { %1972 = vst.msk [vmem:[%s2933_s10 + $0x4] sm:$0xf] %vm406_vm12, %v1796_v31  ;;  %v1597_v57 = vadd.f32 %v1963_v32, %v1595_v47  ;;  %1942 = vst.msk [vmem:[%s2933_s10 + $0x1c] sm:$0xf] %vm406_vm12, %v1090_v48 }
0x25ee   :  { %v1598_v4 = vmul.f32 0.5, %v1597_v57 }
0x25ef   :  { %v1955_v17 = vld [vmem:[%s2933_s10 + $0x14] sm:$0xf]  ;;  %v1298_v28 = vpop.permute.xlu0 %1297 }
0x25f0   :  { %1964 = vst.msk [vmem:[%s2933_s10 + $0xc] sm:$0xf] %vm406_vm12, %v1598_v4  ;;  %v1399_v54 = vadd.f32 %v1955_v17, %v1397_v60  ;;  %v1300_v62 = vadd.f32 %v1951_v18, %v1298_v28 }
0x25f2   :  { %v1400_v21 = vmul.f32 0.5, %v1399_v54  ;;  %v1301_v9 = vmul.f32 0.5, %v1300_v62 }
0x25f3   :  { %v1947_v45 = vld [vmem:[%s2933_s10 + $0x1c] sm:$0xf]  ;;  %v1496_v23 = vpop.permute.xlu0 %1495 }
0x25f4   :  { %1956 = vst.msk [vmem:[%s2933_s10 + $0x14] sm:$0xf] %vm406_vm12, %v1400_v21  ;;  %v1201_v34 = vadd.f32 %v1947_v45, %v1199_v53  ;;  %1952 = vst.msk [vmem:[%s2933_s10 + $0x18] sm:$0xf] %vm406_vm12, %v1301_v9  ;;  %v1498_v35 = vadd.f32 %v1959_v1, %v1496_v23 }
0x25f6   :  { %v1202_v36 = vmul.f32 0.5, %v1201_v34  ;;  %v1499_v2 = vmul.f32 0.5, %v1498_v35 }
0x25f7   :  { %v1694_v11 = vpop.permute.xlu0 %1693 }
0x25f8   :  { %1948 = vst.msk [vmem:[%s2933_s10 + $0x1c] sm:$0xf] %vm406_vm12, %v1202_v36  ;;  %1960 = vst.msk [vmem:[%s2933_s10 + $0x10] sm:$0xf] %vm406_vm12, %v1499_v2  ;;  %v1696_v10 = vadd.f32 %v1967_v37, %v1694_v11 }
0x25fa   :  { %v1697_v38 = vmul.f32 0.5, %v1696_v10 }
0x25fc   :  { %1968 = vst.msk [vmem:[%s2933_s10 + $0x8] sm:$0xf] %vm406_vm12, %v1697_v38 }
0x2658   :  { %v1891_v40 = vpop.permute.xlu0 %1890 }
0x2659   :  { %v1893_v42 = vadd.f32 %v1891_v40, %v1887_v5 }
0x265b   :  { %v1894_v44 = vmul.f32 0.5, %v1893_v42 }
0x265d   :  { %1895 = vst.msk [vmem:[%s2933_s10] sm:$0xf] %vm406_vm12, %v1894_v44 }

</bundles_post_ra>
